<compile_context>
chip_gen: v5e
topology: v5e:2x2
jax: 0.10.0
libtpu: 0.0.40
codegen_flags: <defaults>
</compile_context>

<pallas_src>
import functools
import numpy as np
import jax
import jax.numpy as jnp
from jax.experimental import pallas as pl
from jax.experimental.pallas import tpu as pltpu


# ------------------------------ fused kernel ------------------------------- #

def _fused_convnet_kernel(x_ref, w1_ref, b1_ref, w2_ref, b2_ref, w3_ref,
                          b3_ref, w4_ref, b4_ref, w5_ref, b5_ref, out_ref,
                          *, H, W):
    """One batch tile (TB examples) per grid step; batch on sublanes,
    channels on lanes; everything stays in VMEM/vregs."""
    f32, bf16 = jnp.float32, jnp.bfloat16
    TB = out_ref.shape[0]
    H1, W1 = H - 1, W - 1          # conv1 output grid
    Hp, Wp = H1 // 2, W1 // 2      # maxpool output grid (floor mode)
    H2, W2 = Hp - 1, Wp - 1        # conv2 output grid
    H3, W3 = H2 - 1, W2 - 1        # conv3 output grid

    w1, w2, w3 = w1_ref[...], w2_ref[...], w3_ref[...]
    w4, w5 = w4_ref[...], w5_ref[...]

    # Hoisted bias broadcasts (JAX does not CSE broadcast_in_dim).
    bias1 = jnp.broadcast_to(b1_ref[...], (TB, w1.shape[1]))
    bias2 = jnp.broadcast_to(b2_ref[...], (TB, w2.shape[1]))
    bias3 = jnp.broadcast_to(b3_ref[...], (TB, w3.shape[1]))

    # ---- Conv2d(3, 16, (2,2)) + ReLU -------------------------------------
    # x_ref[p] is the host-built im2col patch [TB, 4*Cin] (bf16) for conv1
    # output position p; one fused-tap matmul per position.
    c1 = []
    for p in range(H1 * W1):
        y = jnp.dot(x_ref[p], w1, preferred_element_type=f32)
        c1.append(jnp.maximum(y + bias1, 0.0))            # [TB, 16] f32

    # ---- MaxPool2d((2,2)), stride 2: elementwise max of 4 whole slabs -----
    pooled = {}
    for pi in range(Hp):
        for pj in range(Wp):
            a = c1[(2 * pi) * W1 + 2 * pj]
            b = c1[(2 * pi) * W1 + 2 * pj + 1]
            c = c1[(2 * pi + 1) * W1 + 2 * pj]
            d = c1[(2 * pi + 1) * W1 + 2 * pj + 1]
            pooled[(pi, pj)] = jnp.maximum(jnp.maximum(a, b),
                                           jnp.maximum(c, d))

    # ---- Conv2d(16, 32, (2,2)) + ReLU: fused-tap K = 64 matmuls -----------
    c2 = {}
    for i in range(H2):
        for j in range(W2):
            feat = jnp.concatenate(
                [pooled[(i, j)], pooled[(i, j + 1)],
                 pooled[(i + 1, j)], pooled[(i + 1, j + 1)]], axis=1)
            y = jnp.dot(feat.astype(bf16), w2, preferred_element_type=f32)
            c2[(i, j)] = jnp.maximum(y + bias2, 0.0)       # [TB, 32] f32

    # ---- Conv2d(32, 64, (2,2)) + ReLU: fused-tap K = 128 matmuls ----------
    c3 = {}
    for i in range(H3):
        for j in range(W3):
            feat = jnp.concatenate(
                [c2[(i, j)], c2[(i, j + 1)],
                 c2[(i + 1, j)], c2[(i + 1, j + 1)]], axis=1)
            y = jnp.dot(feat.astype(bf16), w3, preferred_element_type=f32)
            c3[(i, j)] = jnp.maximum(y + bias3, 0.0)       # [TB, 64] f32

    # ---- Linear(emb, 128) + ReLU: single [TB, emb] @ [emb, 128] matmul ----
    # TODO(synk): the original nn.Sequential has no nn.Flatten before this
    # Linear (it would raise in PyTorch); we implement the intended NCHW
    # flatten, folded into the host-side w4 column permutation.
    flat = jnp.concatenate([c3[(i, j)] for i in range(H3) for j in range(W3)],
                           axis=1)                         # [TB, H3*W3*64]
    f1 = jnp.maximum(jnp.dot(flat.astype(bf16), w4,
                             preferred_element_type=f32) + b4_ref[...], 0.0)

    # ---- Linear(128, A), A zero-padded to NPAD lanes (dense vst) ----------
    out_ref[...] = (jnp.dot(f1.astype(bf16), w5, preferred_element_type=f32)
                    + b5_ref[...])


# ------------------- host-side weight prep (runs once) --------------------- #

def preprocess_params(params, state_shape, action_shape):
    """One-time layout transforms / padding / bf16 casts, outside the jit."""
    H, W = state_shape[0], state_shape[1]
    H3, W3 = (H - 1) // 2 - 2, (W - 1) // 2 - 2
    A = int(np.prod(action_shape))
    NPAD = max(128, ((A + 127) // 128) * 128)
    bf16, f32 = jnp.bfloat16, jnp.float32

    def conv_fused(w):
        # torch [Cout, Cin, 2, 2] -> [4*Cin, Cout], rows tap-major
        # (tap = di*2 + dj), channel-minor -- matches the in-kernel im2col.
        cout, cin = w.shape[0], w.shape[1]
        return jnp.transpose(w, (2, 3, 1, 0)).reshape(4 * cin, cout).astype(bf16)

    # fc1: fold the intended NCHW flatten into a column permutation so the
    # kernel's (position-major, channel-minor) lane order matches.
    w4 = params["w4"]                                          # [128, H3*W3*64]
    w4_mat = jnp.transpose(w4.reshape(128, 64, H3, W3),
                           (2, 3, 1, 0)).reshape(H3 * W3 * 64, 128).astype(bf16)

    # fc2: transpose + zero-pad the output dim to a lane-dense 128 multiple.
    w5 = params["w5"]                                          # [A, 128]
    w5_mat = jnp.zeros((128, NPAD), f32).at[:, :A].set(w5.T).astype(bf16)
    b5_pad = jnp.zeros((NPAD,), f32).at[:A].set(params["b5"]).reshape(1, NPAD)

    prep = {
        "w1": conv_fused(params["w1"]), "w2": conv_fused(params["w2"]),
        "w3": conv_fused(params["w3"]), "w4": w4_mat, "w5": w5_mat,
        "b1": params["b1"].reshape(1, -1).astype(f32),
        "b2": params["b2"].reshape(1, -1).astype(f32),
        "b3": params["b3"].reshape(1, -1).astype(f32),
        "b4": params["b4"].reshape(1, -1).astype(f32),
        "b5": b5_pad,
    }
    meta = dict(H=H, W=W, A=A, NPAD=NPAD)
    return prep, meta


# -------------------------------- forward ---------------------------------- #

def _round_up(x, m):
    return ((x + m - 1) // m) * m


def choose_batch_tile(B):
    """Batch tile: multiple of 16 sublanes, capped at 128, and >= 2 grid
    steps when the batch allows it (v7x has 2 TensorCores)."""
    tb = min(128, _round_up(B, 16))
    if B > 16 and pl.cdiv(B, tb) < 2:
        tb = max(16, _round_up(tb // 2, 16))
    return tb


@functools.partial(jax.jit, static_argnames=("H", "W", "A", "NPAD", "TB"))
def convnet_forward(prep, obs_nchw, *, H, W, A, NPAD, TB):
    """Replicates ConvNet.forward: returns (logits, state=None)."""
    B, C = obs_nchw.shape[0], obs_nchw.shape[1]
    H1, W1 = H - 1, W - 1
    x = obs_nchw.astype(jnp.float32)

    # Host-side conv1 im2col (pure layout plumbing): one [B, 4*C] bf16 patch
    # slab per conv1 output position, batch on sublanes, taps/channels on
    # lanes (tap-major, channel-minor -- matches the fused conv1 weight).
    taps = [x[:, :, di:di + H1, dj:dj + W1]
            for (di, dj) in ((0, 0), (0, 1), (1, 0), (1, 1))]   # [B,C,H1,W1]
    xi = jnp.stack(taps, axis=1)                    # [B, 4, C, H1, W1]
    xi = jnp.transpose(xi, (3, 4, 0, 1, 2))         # [H1, W1, B, 4, C]
    xi = xi.reshape(H1 * W1, B, 4 * C).astype(jnp.bfloat16)

    Bp = _round_up(B, TB)
    if Bp != B:
        xi = jnp.pad(xi, ((0, 0), (0, Bp - B), (0, 0)))
    grid = (Bp // TB,)

    kern = functools.partial(_fused_convnet_kernel, H=H, W=W)

    def full(shape):
        nd = len(shape)
        return pl.BlockSpec(shape, lambda g, _nd=nd: (0,) * _nd)

    out = pl.pallas_call(
        kern,
        out_shape=jax.ShapeDtypeStruct((Bp, NPAD), jnp.float32),
        grid=grid,
        in_specs=[
            pl.BlockSpec((H1 * W1, TB, 4 * C), lambda g: (0, g, 0)),
            full(prep["w1"].shape), full(prep["b1"].shape),
            full(prep["w2"].shape), full(prep["b2"].shape),
            full(prep["w3"].shape), full(prep["b3"].shape),
            full(prep["w4"].shape), full(prep["b4"].shape),
            full(prep["w5"].shape), full(prep["b5"].shape),
        ],
        out_specs=pl.BlockSpec((TB, NPAD), lambda g: (g, 0)),
        compiler_params=pltpu.CompilerParams(
            dimension_semantics=("parallel",)),
    )(xi, prep["w1"], prep["b1"], prep["w2"], prep["b2"],
      prep["w3"], prep["b3"], prep["w4"], prep["b4"],
      prep["w5"], prep["b5"])

    logits = out[:B, :A]
    return logits, None


# ------------------------- params / reference / main ----------------------- #

def init_params(key, state_shape, action_shape):
    n, m = state_shape[0], state_shape[1]
    emb = ((n - 1) // 2 - 2) * ((m - 1) // 2 - 2) * 64
    a = int(np.prod(action_shape))
    ks = jax.random.split(key, 10)

    def rnd(k, shape, scale=0.1):
        return scale * jax.random.normal(k, shape, jnp.float32)

    params = {
        "w1": rnd(ks[0], (16, 3, 2, 2)),  "b1": rnd(ks[1], (16,)),
        "w2": rnd(ks[2], (32, 16, 2, 2)), "b2": rnd(ks[3], (32,)),
        "w3": rnd(ks[4], (64, 32, 2, 2)), "b3": rnd(ks[5], (64,)),
        "w4": rnd(ks[6], (128, emb)),     "b4": rnd(ks[7], (128,)),
        "w5": rnd(ks[8], (a, 128)),       "b5": rnd(ks[9], (a,)),
    }
    return params, emb


def reference_forward(params, obs):
    """Pure-JAX reference (XLA convs, f32) for correctness checking."""
    x = obs.astype(jnp.float32)

    def conv(x, w, b):
        y = jax.lax.conv_general_dilated(
            x, w, (1, 1), "VALID", dimension_numbers=("NCHW", "OIHW", "NCHW"))
        return jax.nn.relu(y + b[None, :, None, None])

    h = conv(x, params["w1"], params["b1"])
    h = jax.lax.reduce_window(h, -jnp.inf, jax.lax.max,
                              (1, 1, 2, 2), (1, 1, 2, 2), "VALID")
    h = conv(h, params["w2"], params["b2"])
    h = conv(h, params["w3"], params["b3"])
    feat = h.reshape(h.shape[0], -1)
    f1 = jax.nn.relu(feat @ params["w4"].T + params["b4"])
    return f1 @ params["w5"].T + params["b5"]


if __name__ == "__main__":
    state_shape = (9, 9, 3)      # (n, m, channels): image_embedding_size = 2*2*64 = 256
    action_shape = (5,)
    batch = 64                   # small, but enough for 2 batch tiles (v7x)

    key = jax.random.PRNGKey(0)
    k_param, k_obs = jax.random.split(key)
    params, emb = init_params(k_param, state_shape, action_shape)

    obs = jax.random.normal(k_obs, (batch, 3, state_shape[0], state_shape[1]),
                            jnp.float32)  # NCHW, like PyTorch

    # One-time weight prep (layout permutations, padding, bf16 casts).
    prep, meta = preprocess_params(params, state_shape, action_shape)
    TB = choose_batch_tile(batch)

    logits, state = convnet_forward(prep, obs, TB=TB, **meta)
    logits = jax.block_until_ready(logits)
    assert logits.shape == (batch, int(np.prod(action_shape)))

    ref = jax.block_until_ready(reference_forward(params, obs))
    np.testing.assert_allclose(np.asarray(logits), np.asarray(ref),
                               rtol=2e-2, atol=2e-2)

    print("KERNEL_OK")
</pallas_src>

<mosaic_0001>
module attributes {stable_mosaic.version = 11 : i64} {
  func.func @_fused_convnet_kernel(%arg0: i32, %arg1: memref<64x32x12xbf16, #tpu.memory_space<vmem>>, %arg2: memref<12x16xbf16, #tpu.memory_space<vmem>>, %arg3: memref<1x16xf32, #tpu.memory_space<vmem>>, %arg4: memref<64x32xbf16, #tpu.memory_space<vmem>>, %arg5: memref<1x32xf32, #tpu.memory_space<vmem>>, %arg6: memref<128x64xbf16, #tpu.memory_space<vmem>>, %arg7: memref<1x64xf32, #tpu.memory_space<vmem>>, %arg8: memref<256x128xbf16, #tpu.memory_space<vmem>>, %arg9: memref<1x128xf32, #tpu.memory_space<vmem>>, %arg10: memref<128x128xbf16, #tpu.memory_space<vmem>>, %arg11: memref<1x128xf32, #tpu.memory_space<vmem>>, %arg12: memref<32x128xf32, #tpu.memory_space<vmem>>) attributes {dimension_semantics = [#tpu.dimension_semantics<parallel>], iteration_bounds = array<i64: 2>, scalar_prefetch = 0 : i64, scratch_operands = 0 : i64, tpu.core_type = #tpu.core_type<tc>, window_params = [{transform_indices = @transform_0, window_bounds = array<i64: 64, 32, 12>}, {pipeline_mode = #tpu.pipeline_mode<synchronous>, transform_indices = @transform_1, window_bounds = array<i64: 12, 16>}, {pipeline_mode = #tpu.pipeline_mode<synchronous>, transform_indices = @transform_2, window_bounds = array<i64: 1, 16>}, {pipeline_mode = #tpu.pipeline_mode<synchronous>, transform_indices = @transform_3, window_bounds = array<i64: 64, 32>}, {pipeline_mode = #tpu.pipeline_mode<synchronous>, transform_indices = @transform_4, window_bounds = array<i64: 1, 32>}, {pipeline_mode = #tpu.pipeline_mode<synchronous>, transform_indices = @transform_5, window_bounds = array<i64: 128, 64>}, {pipeline_mode = #tpu.pipeline_mode<synchronous>, transform_indices = @transform_6, window_bounds = array<i64: 1, 64>}, {pipeline_mode = #tpu.pipeline_mode<synchronous>, transform_indices = @transform_7, window_bounds = array<i64: 256, 128>}, {pipeline_mode = #tpu.pipeline_mode<synchronous>, transform_indices = @transform_8, window_bounds = array<i64: 1, 128>}, {pipeline_mode = #tpu.pipeline_mode<synchronous>, transform_indices = @transform_9, window_bounds = array<i64: 128, 128>}, {pipeline_mode = #tpu.pipeline_mode<synchronous>, transform_indices = @transform_10, window_bounds = array<i64: 1, 128>}, {transform_indices = @transform_11, window_bounds = array<i64: 32, 128>}]} {
    %c0 = arith.constant 0 : index
    %c0_0 = arith.constant 0 : index
    %0 = vector.load %arg2[%c0, %c0_0] : memref<12x16xbf16, #tpu.memory_space<vmem>>, vector<12x16xbf16>
    %c0_1 = arith.constant 0 : index
    %c0_2 = arith.constant 0 : index
    %1 = vector.load %arg4[%c0_1, %c0_2] : memref<64x32xbf16, #tpu.memory_space<vmem>>, vector<64x32xbf16>
    %c0_3 = arith.constant 0 : index
    %c0_4 = arith.constant 0 : index
    %2 = vector.load %arg6[%c0_3, %c0_4] : memref<128x64xbf16, #tpu.memory_space<vmem>>, vector<128x64xbf16>
    %c0_5 = arith.constant 0 : index
    %c0_6 = arith.constant 0 : index
    %3 = vector.load %arg8[%c0_5, %c0_6] : memref<256x128xbf16, #tpu.memory_space<vmem>>, vector<256x128xbf16>
    %c0_7 = arith.constant 0 : index
    %c0_8 = arith.constant 0 : index
    %4 = vector.load %arg10[%c0_7, %c0_8] : memref<128x128xbf16, #tpu.memory_space<vmem>>, vector<128x128xbf16>
    %c0_9 = arith.constant 0 : index
    %c0_10 = arith.constant 0 : index
    %5 = vector.load %arg3[%c0_9, %c0_10] : memref<1x16xf32, #tpu.memory_space<vmem>>, vector<1x16xf32>
    %6 = vector.shape_cast %5 : vector<1x16xf32> to vector<1x16xf32>
    %7 = vector.broadcast %6 : vector<1x16xf32> to vector<32x16xf32>
    %c0_11 = arith.constant 0 : index
    %c0_12 = arith.constant 0 : index
    %8 = vector.load %arg5[%c0_11, %c0_12] : memref<1x32xf32, #tpu.memory_space<vmem>>, vector<1x32xf32>
    %9 = vector.shape_cast %8 : vector<1x32xf32> to vector<1x32xf32>
    %10 = vector.broadcast %9 : vector<1x32xf32> to vector<32x32xf32>
    %c0_13 = arith.constant 0 : index
    %c0_14 = arith.constant 0 : index
    %11 = vector.load %arg7[%c0_13, %c0_14] : memref<1x64xf32, #tpu.memory_space<vmem>>, vector<1x64xf32>
    %12 = vector.shape_cast %11 : vector<1x64xf32> to vector<1x64xf32>
    %13 = vector.broadcast %12 : vector<1x64xf32> to vector<32x64xf32>
    %c0_15 = arith.constant 0 : index
    %c0_16 = arith.constant 0 : index
    %c0_17 = arith.constant 0 : index
    %14 = vector.load %arg1[%c0_15, %c0_16, %c0_17] : memref<64x32x12xbf16, #tpu.memory_space<vmem>>, vector<1x32x12xbf16>
    %15 = vector.shape_cast %14 : vector<1x32x12xbf16> to vector<32x12xbf16>
    %cst = arith.constant dense<0.000000e+00> : vector<32x16xf32>
    %16 = tpu.matmul %15, %0, %cst {dimension_numbers = #tpu.dot_dimension_numbers<[1], [0], [0], [1], [0, 0, 1, 1], [], []>} : vector<32x12xbf16>, vector<12x16xbf16>, vector<32x16xf32> -> vector<32x16xf32>
    %17 = arith.addf %16, %7 : vector<32x16xf32>
    %cst_18 = arith.constant 0.000000e+00 : f32
    %18 = vector.broadcast %cst_18 : f32 to vector<32x16xf32>
    %19 = arith.maximumf %17, %18 : vector<32x16xf32>
    %c1 = arith.constant 1 : index
    %c0_19 = arith.constant 0 : index
    %c0_20 = arith.constant 0 : index
    %20 = vector.load %arg1[%c1, %c0_19, %c0_20] : memref<64x32x12xbf16, #tpu.memory_space<vmem>>, vector<1x32x12xbf16>
    %21 = vector.shape_cast %20 : vector<1x32x12xbf16> to vector<32x12xbf16>
    %cst_21 = arith.constant dense<0.000000e+00> : vector<32x16xf32>
    %22 = tpu.matmul %21, %0, %cst_21 {dimension_numbers = #tpu.dot_dimension_numbers<[1], [0], [0], [1], [0, 0, 1, 1], [], []>} : vector<32x12xbf16>, vector<12x16xbf16>, vector<32x16xf32> -> vector<32x16xf32>
    %23 = arith.addf %22, %7 : vector<32x16xf32>
    %cst_22 = arith.constant 0.000000e+00 : f32
    %24 = vector.broadcast %cst_22 : f32 to vector<32x16xf32>
    %25 = arith.maximumf %23, %24 : vector<32x16xf32>
    %c2 = arith.constant 2 : index
    %c0_23 = arith.constant 0 : index
    %c0_24 = arith.constant 0 : index
    %26 = vector.load %arg1[%c2, %c0_23, %c0_24] : memref<64x32x12xbf16, #tpu.memory_space<vmem>>, vector<1x32x12xbf16>
    %27 = vector.shape_cast %26 : vector<1x32x12xbf16> to vector<32x12xbf16>
    %cst_25 = arith.constant dense<0.000000e+00> : vector<32x16xf32>
    %28 = tpu.matmul %27, %0, %cst_25 {dimension_numbers = #tpu.dot_dimension_numbers<[1], [0], [0], [1], [0, 0, 1, 1], [], []>} : vector<32x12xbf16>, vector<12x16xbf16>, vector<32x16xf32> -> vector<32x16xf32>
    %29 = arith.addf %28, %7 : vector<32x16xf32>
    %cst_26 = arith.constant 0.000000e+00 : f32
    %30 = vector.broadcast %cst_26 : f32 to vector<32x16xf32>
    %31 = arith.maximumf %29, %30 : vector<32x16xf32>
    %c3 = arith.constant 3 : index
    %c0_27 = arith.constant 0 : index
    %c0_28 = arith.constant 0 : index
    %32 = vector.load %arg1[%c3, %c0_27, %c0_28] : memref<64x32x12xbf16, #tpu.memory_space<vmem>>, vector<1x32x12xbf16>
    %33 = vector.shape_cast %32 : vector<1x32x12xbf16> to vector<32x12xbf16>
    %cst_29 = arith.constant dense<0.000000e+00> : vector<32x16xf32>
    %34 = tpu.matmul %33, %0, %cst_29 {dimension_numbers = #tpu.dot_dimension_numbers<[1], [0], [0], [1], [0, 0, 1, 1], [], []>} : vector<32x12xbf16>, vector<12x16xbf16>, vector<32x16xf32> -> vector<32x16xf32>
    %35 = arith.addf %34, %7 : vector<32x16xf32>
    %cst_30 = arith.constant 0.000000e+00 : f32
    %36 = vector.broadcast %cst_30 : f32 to vector<32x16xf32>
    %37 = arith.maximumf %35, %36 : vector<32x16xf32>
    %c4 = arith.constant 4 : index
    %c0_31 = arith.constant 0 : index
    %c0_32 = arith.constant 0 : index
    %38 = vector.load %arg1[%c4, %c0_31, %c0_32] : memref<64x32x12xbf16, #tpu.memory_space<vmem>>, vector<1x32x12xbf16>
    %39 = vector.shape_cast %38 : vector<1x32x12xbf16> to vector<32x12xbf16>
    %cst_33 = arith.constant dense<0.000000e+00> : vector<32x16xf32>
    %40 = tpu.matmul %39, %0, %cst_33 {dimension_numbers = #tpu.dot_dimension_numbers<[1], [0], [0], [1], [0, 0, 1, 1], [], []>} : vector<32x12xbf16>, vector<12x16xbf16>, vector<32x16xf32> -> vector<32x16xf32>
    %41 = arith.addf %40, %7 : vector<32x16xf32>
    %cst_34 = arith.constant 0.000000e+00 : f32
    %42 = vector.broadcast %cst_34 : f32 to vector<32x16xf32>
    %43 = arith.maximumf %41, %42 : vector<32x16xf32>
    %c5 = arith.constant 5 : index
    %c0_35 = arith.constant 0 : index
    %c0_36 = arith.constant 0 : index
    %44 = vector.load %arg1[%c5, %c0_35, %c0_36] : memref<64x32x12xbf16, #tpu.memory_space<vmem>>, vector<1x32x12xbf16>
    %45 = vector.shape_cast %44 : vector<1x32x12xbf16> to vector<32x12xbf16>
    %cst_37 = arith.constant dense<0.000000e+00> : vector<32x16xf32>
    %46 = tpu.matmul %45, %0, %cst_37 {dimension_numbers = #tpu.dot_dimension_numbers<[1], [0], [0], [1], [0, 0, 1, 1], [], []>} : vector<32x12xbf16>, vector<12x16xbf16>, vector<32x16xf32> -> vector<32x16xf32>
    %47 = arith.addf %46, %7 : vector<32x16xf32>
    %cst_38 = arith.constant 0.000000e+00 : f32
    %48 = vector.broadcast %cst_38 : f32 to vector<32x16xf32>
    %49 = arith.maximumf %47, %48 : vector<32x16xf32>
    %c6 = arith.constant 6 : index
    %c0_39 = arith.constant 0 : index
    %c0_40 = arith.constant 0 : index
    %50 = vector.load %arg1[%c6, %c0_39, %c0_40] : memref<64x32x12xbf16, #tpu.memory_space<vmem>>, vector<1x32x12xbf16>
    %51 = vector.shape_cast %50 : vector<1x32x12xbf16> to vector<32x12xbf16>
    %cst_41 = arith.constant dense<0.000000e+00> : vector<32x16xf32>
    %52 = tpu.matmul %51, %0, %cst_41 {dimension_numbers = #tpu.dot_dimension_numbers<[1], [0], [0], [1], [0, 0, 1, 1], [], []>} : vector<32x12xbf16>, vector<12x16xbf16>, vector<32x16xf32> -> vector<32x16xf32>
    %53 = arith.addf %52, %7 : vector<32x16xf32>
    %cst_42 = arith.constant 0.000000e+00 : f32
    %54 = vector.broadcast %cst_42 : f32 to vector<32x16xf32>
    %55 = arith.maximumf %53, %54 : vector<32x16xf32>
    %c7 = arith.constant 7 : index
    %c0_43 = arith.constant 0 : index
    %c0_44 = arith.constant 0 : index
    %56 = vector.load %arg1[%c7, %c0_43, %c0_44] : memref<64x32x12xbf16, #tpu.memory_space<vmem>>, vector<1x32x12xbf16>
    %57 = vector.shape_cast %56 : vector<1x32x12xbf16> to vector<32x12xbf16>
    %cst_45 = arith.constant dense<0.000000e+00> : vector<32x16xf32>
    %58 = tpu.matmul %57, %0, %cst_45 {dimension_numbers = #tpu.dot_dimension_numbers<[1], [0], [0], [1], [0, 0, 1, 1], [], []>} : vector<32x12xbf16>, vector<12x16xbf16>, vector<32x16xf32> -> vector<32x16xf32>
    %59 = arith.addf %58, %7 : vector<32x16xf32>
    %cst_46 = arith.constant 0.000000e+00 : f32
    %60 = vector.broadcast %cst_46 : f32 to vector<32x16xf32>
    %61 = arith.maximumf %59, %60 : vector<32x16xf32>
    %c8 = arith.constant 8 : index
    %c0_47 = arith.constant 0 : index
    %c0_48 = arith.constant 0 : index
    %62 = vector.load %arg1[%c8, %c0_47, %c0_48] : memref<64x32x12xbf16, #tpu.memory_space<vmem>>, vector<1x32x12xbf16>
    %63 = vector.shape_cast %62 : vector<1x32x12xbf16> to vector<32x12xbf16>
    %cst_49 = arith.constant dense<0.000000e+00> : vector<32x16xf32>
    %64 = tpu.matmul %63, %0, %cst_49 {dimension_numbers = #tpu.dot_dimension_numbers<[1], [0], [0], [1], [0, 0, 1, 1], [], []>} : vector<32x12xbf16>, vector<12x16xbf16>, vector<32x16xf32> -> vector<32x16xf32>
    %65 = arith.addf %64, %7 : vector<32x16xf32>
    %cst_50 = arith.constant 0.000000e+00 : f32
    %66 = vector.broadcast %cst_50 : f32 to vector<32x16xf32>
    %67 = arith.maximumf %65, %66 : vector<32x16xf32>
    %c9 = arith.constant 9 : index
    %c0_51 = arith.constant 0 : index
    %c0_52 = arith.constant 0 : index
    %68 = vector.load %arg1[%c9, %c0_51, %c0_52] : memref<64x32x12xbf16, #tpu.memory_space<vmem>>, vector<1x32x12xbf16>
    %69 = vector.shape_cast %68 : vector<1x32x12xbf16> to vector<32x12xbf16>
    %cst_53 = arith.constant dense<0.000000e+00> : vector<32x16xf32>
    %70 = tpu.matmul %69, %0, %cst_53 {dimension_numbers = #tpu.dot_dimension_numbers<[1], [0], [0], [1], [0, 0, 1, 1], [], []>} : vector<32x12xbf16>, vector<12x16xbf16>, vector<32x16xf32> -> vector<32x16xf32>
    %71 = arith.addf %70, %7 : vector<32x16xf32>
    %cst_54 = arith.constant 0.000000e+00 : f32
    %72 = vector.broadcast %cst_54 : f32 to vector<32x16xf32>
    %73 = arith.maximumf %71, %72 : vector<32x16xf32>
    %c10 = arith.constant 10 : index
    %c0_55 = arith.constant 0 : index
    %c0_56 = arith.constant 0 : index
    %74 = vector.load %arg1[%c10, %c0_55, %c0_56] : memref<64x32x12xbf16, #tpu.memory_space<vmem>>, vector<1x32x12xbf16>
    %75 = vector.shape_cast %74 : vector<1x32x12xbf16> to vector<32x12xbf16>
    %cst_57 = arith.constant dense<0.000000e+00> : vector<32x16xf32>
    %76 = tpu.matmul %75, %0, %cst_57 {dimension_numbers = #tpu.dot_dimension_numbers<[1], [0], [0], [1], [0, 0, 1, 1], [], []>} : vector<32x12xbf16>, vector<12x16xbf16>, vector<32x16xf32> -> vector<32x16xf32>
    %77 = arith.addf %76, %7 : vector<32x16xf32>
    %cst_58 = arith.constant 0.000000e+00 : f32
    %78 = vector.broadcast %cst_58 : f32 to vector<32x16xf32>
    %79 = arith.maximumf %77, %78 : vector<32x16xf32>
    %c11 = arith.constant 11 : index
    %c0_59 = arith.constant 0 : index
    %c0_60 = arith.constant 0 : index
    %80 = vector.load %arg1[%c11, %c0_59, %c0_60] : memref<64x32x12xbf16, #tpu.memory_space<vmem>>, vector<1x32x12xbf16>
    %81 = vector.shape_cast %80 : vector<1x32x12xbf16> to vector<32x12xbf16>
    %cst_61 = arith.constant dense<0.000000e+00> : vector<32x16xf32>
    %82 = tpu.matmul %81, %0, %cst_61 {dimension_numbers = #tpu.dot_dimension_numbers<[1], [0], [0], [1], [0, 0, 1, 1], [], []>} : vector<32x12xbf16>, vector<12x16xbf16>, vector<32x16xf32> -> vector<32x16xf32>
    %83 = arith.addf %82, %7 : vector<32x16xf32>
    %cst_62 = arith.constant 0.000000e+00 : f32
    %84 = vector.broadcast %cst_62 : f32 to vector<32x16xf32>
    %85 = arith.maximumf %83, %84 : vector<32x16xf32>
    %c12 = arith.constant 12 : index
    %c0_63 = arith.constant 0 : index
    %c0_64 = arith.constant 0 : index
    %86 = vector.load %arg1[%c12, %c0_63, %c0_64] : memref<64x32x12xbf16, #tpu.memory_space<vmem>>, vector<1x32x12xbf16>
    %87 = vector.shape_cast %86 : vector<1x32x12xbf16> to vector<32x12xbf16>
    %cst_65 = arith.constant dense<0.000000e+00> : vector<32x16xf32>
    %88 = tpu.matmul %87, %0, %cst_65 {dimension_numbers = #tpu.dot_dimension_numbers<[1], [0], [0], [1], [0, 0, 1, 1], [], []>} : vector<32x12xbf16>, vector<12x16xbf16>, vector<32x16xf32> -> vector<32x16xf32>
    %89 = arith.addf %88, %7 : vector<32x16xf32>
    %cst_66 = arith.constant 0.000000e+00 : f32
    %90 = vector.broadcast %cst_66 : f32 to vector<32x16xf32>
    %91 = arith.maximumf %89, %90 : vector<32x16xf32>
    %c13 = arith.constant 13 : index
    %c0_67 = arith.constant 0 : index
    %c0_68 = arith.constant 0 : index
    %92 = vector.load %arg1[%c13, %c0_67, %c0_68] : memref<64x32x12xbf16, #tpu.memory_space<vmem>>, vector<1x32x12xbf16>
    %93 = vector.shape_cast %92 : vector<1x32x12xbf16> to vector<32x12xbf16>
    %cst_69 = arith.constant dense<0.000000e+00> : vector<32x16xf32>
    %94 = tpu.matmul %93, %0, %cst_69 {dimension_numbers = #tpu.dot_dimension_numbers<[1], [0], [0], [1], [0, 0, 1, 1], [], []>} : vector<32x12xbf16>, vector<12x16xbf16>, vector<32x16xf32> -> vector<32x16xf32>
    %95 = arith.addf %94, %7 : vector<32x16xf32>
    %cst_70 = arith.constant 0.000000e+00 : f32
    %96 = vector.broadcast %cst_70 : f32 to vector<32x16xf32>
    %97 = arith.maximumf %95, %96 : vector<32x16xf32>
    %c14 = arith.constant 14 : index
    %c0_71 = arith.constant 0 : index
    %c0_72 = arith.constant 0 : index
    %98 = vector.load %arg1[%c14, %c0_71, %c0_72] : memref<64x32x12xbf16, #tpu.memory_space<vmem>>, vector<1x32x12xbf16>
    %99 = vector.shape_cast %98 : vector<1x32x12xbf16> to vector<32x12xbf16>
    %cst_73 = arith.constant dense<0.000000e+00> : vector<32x16xf32>
    %100 = tpu.matmul %99, %0, %cst_73 {dimension_numbers = #tpu.dot_dimension_numbers<[1], [0], [0], [1], [0, 0, 1, 1], [], []>} : vector<32x12xbf16>, vector<12x16xbf16>, vector<32x16xf32> -> vector<32x16xf32>
    %101 = arith.addf %100, %7 : vector<32x16xf32>
    %cst_74 = arith.constant 0.000000e+00 : f32
    %102 = vector.broadcast %cst_74 : f32 to vector<32x16xf32>
    %103 = arith.maximumf %101, %102 : vector<32x16xf32>
    %c15 = arith.constant 15 : index
    %c0_75 = arith.constant 0 : index
    %c0_76 = arith.constant 0 : index
    %104 = vector.load %arg1[%c15, %c0_75, %c0_76] : memref<64x32x12xbf16, #tpu.memory_space<vmem>>, vector<1x32x12xbf16>
    %105 = vector.shape_cast %104 : vector<1x32x12xbf16> to vector<32x12xbf16>
    %cst_77 = arith.constant dense<0.000000e+00> : vector<32x16xf32>
    %106 = tpu.matmul %105, %0, %cst_77 {dimension_numbers = #tpu.dot_dimension_numbers<[1], [0], [0], [1], [0, 0, 1, 1], [], []>} : vector<32x12xbf16>, vector<12x16xbf16>, vector<32x16xf32> -> vector<32x16xf32>
    %107 = arith.addf %106, %7 : vector<32x16xf32>
    %cst_78 = arith.constant 0.000000e+00 : f32
    %108 = vector.broadcast %cst_78 : f32 to vector<32x16xf32>
    %109 = arith.maximumf %107, %108 : vector<32x16xf32>
    %c16 = arith.constant 16 : index
    %c0_79 = arith.constant 0 : index
    %c0_80 = arith.constant 0 : index
    %110 = vector.load %arg1[%c16, %c0_79, %c0_80] : memref<64x32x12xbf16, #tpu.memory_space<vmem>>, vector<1x32x12xbf16>
    %111 = vector.shape_cast %110 : vector<1x32x12xbf16> to vector<32x12xbf16>
    %cst_81 = arith.constant dense<0.000000e+00> : vector<32x16xf32>
    %112 = tpu.matmul %111, %0, %cst_81 {dimension_numbers = #tpu.dot_dimension_numbers<[1], [0], [0], [1], [0, 0, 1, 1], [], []>} : vector<32x12xbf16>, vector<12x16xbf16>, vector<32x16xf32> -> vector<32x16xf32>
    %113 = arith.addf %112, %7 : vector<32x16xf32>
    %cst_82 = arith.constant 0.000000e+00 : f32
    %114 = vector.broadcast %cst_82 : f32 to vector<32x16xf32>
    %115 = arith.maximumf %113, %114 : vector<32x16xf32>
    %c17 = arith.constant 17 : index
    %c0_83 = arith.constant 0 : index
    %c0_84 = arith.constant 0 : index
    %116 = vector.load %arg1[%c17, %c0_83, %c0_84] : memref<64x32x12xbf16, #tpu.memory_space<vmem>>, vector<1x32x12xbf16>
    %117 = vector.shape_cast %116 : vector<1x32x12xbf16> to vector<32x12xbf16>
    %cst_85 = arith.constant dense<0.000000e+00> : vector<32x16xf32>
    %118 = tpu.matmul %117, %0, %cst_85 {dimension_numbers = #tpu.dot_dimension_numbers<[1], [0], [0], [1], [0, 0, 1, 1], [], []>} : vector<32x12xbf16>, vector<12x16xbf16>, vector<32x16xf32> -> vector<32x16xf32>
    %119 = arith.addf %118, %7 : vector<32x16xf32>
    %cst_86 = arith.constant 0.000000e+00 : f32
    %120 = vector.broadcast %cst_86 : f32 to vector<32x16xf32>
    %121 = arith.maximumf %119, %120 : vector<32x16xf32>
    %c18 = arith.constant 18 : index
    %c0_87 = arith.constant 0 : index
    %c0_88 = arith.constant 0 : index
    %122 = vector.load %arg1[%c18, %c0_87, %c0_88] : memref<64x32x12xbf16, #tpu.memory_space<vmem>>, vector<1x32x12xbf16>
    %123 = vector.shape_cast %122 : vector<1x32x12xbf16> to vector<32x12xbf16>
    %cst_89 = arith.constant dense<0.000000e+00> : vector<32x16xf32>
    %124 = tpu.matmul %123, %0, %cst_89 {dimension_numbers = #tpu.dot_dimension_numbers<[1], [0], [0], [1], [0, 0, 1, 1], [], []>} : vector<32x12xbf16>, vector<12x16xbf16>, vector<32x16xf32> -> vector<32x16xf32>
    %125 = arith.addf %124, %7 : vector<32x16xf32>
    %cst_90 = arith.constant 0.000000e+00 : f32
    %126 = vector.broadcast %cst_90 : f32 to vector<32x16xf32>
    %127 = arith.maximumf %125, %126 : vector<32x16xf32>
    %c19 = arith.constant 19 : index
    %c0_91 = arith.constant 0 : index
    %c0_92 = arith.constant 0 : index
    %128 = vector.load %arg1[%c19, %c0_91, %c0_92] : memref<64x32x12xbf16, #tpu.memory_space<vmem>>, vector<1x32x12xbf16>
    %129 = vector.shape_cast %128 : vector<1x32x12xbf16> to vector<32x12xbf16>
    %cst_93 = arith.constant dense<0.000000e+00> : vector<32x16xf32>
    %130 = tpu.matmul %129, %0, %cst_93 {dimension_numbers = #tpu.dot_dimension_numbers<[1], [0], [0], [1], [0, 0, 1, 1], [], []>} : vector<32x12xbf16>, vector<12x16xbf16>, vector<32x16xf32> -> vector<32x16xf32>
    %131 = arith.addf %130, %7 : vector<32x16xf32>
    %cst_94 = arith.constant 0.000000e+00 : f32
    %132 = vector.broadcast %cst_94 : f32 to vector<32x16xf32>
    %133 = arith.maximumf %131, %132 : vector<32x16xf32>
    %c20 = arith.constant 20 : index
    %c0_95 = arith.constant 0 : index
    %c0_96 = arith.constant 0 : index
    %134 = vector.load %arg1[%c20, %c0_95, %c0_96] : memref<64x32x12xbf16, #tpu.memory_space<vmem>>, vector<1x32x12xbf16>
    %135 = vector.shape_cast %134 : vector<1x32x12xbf16> to vector<32x12xbf16>
    %cst_97 = arith.constant dense<0.000000e+00> : vector<32x16xf32>
    %136 = tpu.matmul %135, %0, %cst_97 {dimension_numbers = #tpu.dot_dimension_numbers<[1], [0], [0], [1], [0, 0, 1, 1], [], []>} : vector<32x12xbf16>, vector<12x16xbf16>, vector<32x16xf32> -> vector<32x16xf32>
    %137 = arith.addf %136, %7 : vector<32x16xf32>
    %cst_98 = arith.constant 0.000000e+00 : f32
    %138 = vector.broadcast %cst_98 : f32 to vector<32x16xf32>
    %139 = arith.maximumf %137, %138 : vector<32x16xf32>
    %c21 = arith.constant 21 : index
    %c0_99 = arith.constant 0 : index
    %c0_100 = arith.constant 0 : index
    %140 = vector.load %arg1[%c21, %c0_99, %c0_100] : memref<64x32x12xbf16, #tpu.memory_space<vmem>>, vector<1x32x12xbf16>
    %141 = vector.shape_cast %140 : vector<1x32x12xbf16> to vector<32x12xbf16>
    %cst_101 = arith.constant dense<0.000000e+00> : vector<32x16xf32>
    %142 = tpu.matmul %141, %0, %cst_101 {dimension_numbers = #tpu.dot_dimension_numbers<[1], [0], [0], [1], [0, 0, 1, 1], [], []>} : vector<32x12xbf16>, vector<12x16xbf16>, vector<32x16xf32> -> vector<32x16xf32>
    %143 = arith.addf %142, %7 : vector<32x16xf32>
    %cst_102 = arith.constant 0.000000e+00 : f32
    %144 = vector.broadcast %cst_102 : f32 to vector<32x16xf32>
    %145 = arith.maximumf %143, %144 : vector<32x16xf32>
    %c22 = arith.constant 22 : index
    %c0_103 = arith.constant 0 : index
    %c0_104 = arith.constant 0 : index
    %146 = vector.load %arg1[%c22, %c0_103, %c0_104] : memref<64x32x12xbf16, #tpu.memory_space<vmem>>, vector<1x32x12xbf16>
    %147 = vector.shape_cast %146 : vector<1x32x12xbf16> to vector<32x12xbf16>
    %cst_105 = arith.constant dense<0.000000e+00> : vector<32x16xf32>
    %148 = tpu.matmul %147, %0, %cst_105 {dimension_numbers = #tpu.dot_dimension_numbers<[1], [0], [0], [1], [0, 0, 1, 1], [], []>} : vector<32x12xbf16>, vector<12x16xbf16>, vector<32x16xf32> -> vector<32x16xf32>
    %149 = arith.addf %148, %7 : vector<32x16xf32>
    %cst_106 = arith.constant 0.000000e+00 : f32
    %150 = vector.broadcast %cst_106 : f32 to vector<32x16xf32>
    %151 = arith.maximumf %149, %150 : vector<32x16xf32>
    %c23 = arith.constant 23 : index
    %c0_107 = arith.constant 0 : index
    %c0_108 = arith.constant 0 : index
    %152 = vector.load %arg1[%c23, %c0_107, %c0_108] : memref<64x32x12xbf16, #tpu.memory_space<vmem>>, vector<1x32x12xbf16>
    %153 = vector.shape_cast %152 : vector<1x32x12xbf16> to vector<32x12xbf16>
    %cst_109 = arith.constant dense<0.000000e+00> : vector<32x16xf32>
    %154 = tpu.matmul %153, %0, %cst_109 {dimension_numbers = #tpu.dot_dimension_numbers<[1], [0], [0], [1], [0, 0, 1, 1], [], []>} : vector<32x12xbf16>, vector<12x16xbf16>, vector<32x16xf32> -> vector<32x16xf32>
    %155 = arith.addf %154, %7 : vector<32x16xf32>
    %cst_110 = arith.constant 0.000000e+00 : f32
    %156 = vector.broadcast %cst_110 : f32 to vector<32x16xf32>
    %157 = arith.maximumf %155, %156 : vector<32x16xf32>
    %c24 = arith.constant 24 : index
    %c0_111 = arith.constant 0 : index
    %c0_112 = arith.constant 0 : index
    %158 = vector.load %arg1[%c24, %c0_111, %c0_112] : memref<64x32x12xbf16, #tpu.memory_space<vmem>>, vector<1x32x12xbf16>
    %159 = vector.shape_cast %158 : vector<1x32x12xbf16> to vector<32x12xbf16>
    %cst_113 = arith.constant dense<0.000000e+00> : vector<32x16xf32>
    %160 = tpu.matmul %159, %0, %cst_113 {dimension_numbers = #tpu.dot_dimension_numbers<[1], [0], [0], [1], [0, 0, 1, 1], [], []>} : vector<32x12xbf16>, vector<12x16xbf16>, vector<32x16xf32> -> vector<32x16xf32>
    %161 = arith.addf %160, %7 : vector<32x16xf32>
    %cst_114 = arith.constant 0.000000e+00 : f32
    %162 = vector.broadcast %cst_114 : f32 to vector<32x16xf32>
    %163 = arith.maximumf %161, %162 : vector<32x16xf32>
    %c25 = arith.constant 25 : index
    %c0_115 = arith.constant 0 : index
    %c0_116 = arith.constant 0 : index
    %164 = vector.load %arg1[%c25, %c0_115, %c0_116] : memref<64x32x12xbf16, #tpu.memory_space<vmem>>, vector<1x32x12xbf16>
    %165 = vector.shape_cast %164 : vector<1x32x12xbf16> to vector<32x12xbf16>
    %cst_117 = arith.constant dense<0.000000e+00> : vector<32x16xf32>
    %166 = tpu.matmul %165, %0, %cst_117 {dimension_numbers = #tpu.dot_dimension_numbers<[1], [0], [0], [1], [0, 0, 1, 1], [], []>} : vector<32x12xbf16>, vector<12x16xbf16>, vector<32x16xf32> -> vector<32x16xf32>
    %167 = arith.addf %166, %7 : vector<32x16xf32>
    %cst_118 = arith.constant 0.000000e+00 : f32
    %168 = vector.broadcast %cst_118 : f32 to vector<32x16xf32>
    %169 = arith.maximumf %167, %168 : vector<32x16xf32>
    %c26 = arith.constant 26 : index
    %c0_119 = arith.constant 0 : index
    %c0_120 = arith.constant 0 : index
    %170 = vector.load %arg1[%c26, %c0_119, %c0_120] : memref<64x32x12xbf16, #tpu.memory_space<vmem>>, vector<1x32x12xbf16>
    %171 = vector.shape_cast %170 : vector<1x32x12xbf16> to vector<32x12xbf16>
    %cst_121 = arith.constant dense<0.000000e+00> : vector<32x16xf32>
    %172 = tpu.matmul %171, %0, %cst_121 {dimension_numbers = #tpu.dot_dimension_numbers<[1], [0], [0], [1], [0, 0, 1, 1], [], []>} : vector<32x12xbf16>, vector<12x16xbf16>, vector<32x16xf32> -> vector<32x16xf32>
    %173 = arith.addf %172, %7 : vector<32x16xf32>
    %cst_122 = arith.constant 0.000000e+00 : f32
    %174 = vector.broadcast %cst_122 : f32 to vector<32x16xf32>
    %175 = arith.maximumf %173, %174 : vector<32x16xf32>
    %c27 = arith.constant 27 : index
    %c0_123 = arith.constant 0 : index
    %c0_124 = arith.constant 0 : index
    %176 = vector.load %arg1[%c27, %c0_123, %c0_124] : memref<64x32x12xbf16, #tpu.memory_space<vmem>>, vector<1x32x12xbf16>
    %177 = vector.shape_cast %176 : vector<1x32x12xbf16> to vector<32x12xbf16>
    %cst_125 = arith.constant dense<0.000000e+00> : vector<32x16xf32>
    %178 = tpu.matmul %177, %0, %cst_125 {dimension_numbers = #tpu.dot_dimension_numbers<[1], [0], [0], [1], [0, 0, 1, 1], [], []>} : vector<32x12xbf16>, vector<12x16xbf16>, vector<32x16xf32> -> vector<32x16xf32>
    %179 = arith.addf %178, %7 : vector<32x16xf32>
    %cst_126 = arith.constant 0.000000e+00 : f32
    %180 = vector.broadcast %cst_126 : f32 to vector<32x16xf32>
    %181 = arith.maximumf %179, %180 : vector<32x16xf32>
    %c28 = arith.constant 28 : index
    %c0_127 = arith.constant 0 : index
    %c0_128 = arith.constant 0 : index
    %182 = vector.load %arg1[%c28, %c0_127, %c0_128] : memref<64x32x12xbf16, #tpu.memory_space<vmem>>, vector<1x32x12xbf16>
    %183 = vector.shape_cast %182 : vector<1x32x12xbf16> to vector<32x12xbf16>
    %cst_129 = arith.constant dense<0.000000e+00> : vector<32x16xf32>
    %184 = tpu.matmul %183, %0, %cst_129 {dimension_numbers = #tpu.dot_dimension_numbers<[1], [0], [0], [1], [0, 0, 1, 1], [], []>} : vector<32x12xbf16>, vector<12x16xbf16>, vector<32x16xf32> -> vector<32x16xf32>
    %185 = arith.addf %184, %7 : vector<32x16xf32>
    %cst_130 = arith.constant 0.000000e+00 : f32
    %186 = vector.broadcast %cst_130 : f32 to vector<32x16xf32>
    %187 = arith.maximumf %185, %186 : vector<32x16xf32>
    %c29 = arith.constant 29 : index
    %c0_131 = arith.constant 0 : index
    %c0_132 = arith.constant 0 : index
    %188 = vector.load %arg1[%c29, %c0_131, %c0_132] : memref<64x32x12xbf16, #tpu.memory_space<vmem>>, vector<1x32x12xbf16>
    %189 = vector.shape_cast %188 : vector<1x32x12xbf16> to vector<32x12xbf16>
    %cst_133 = arith.constant dense<0.000000e+00> : vector<32x16xf32>
    %190 = tpu.matmul %189, %0, %cst_133 {dimension_numbers = #tpu.dot_dimension_numbers<[1], [0], [0], [1], [0, 0, 1, 1], [], []>} : vector<32x12xbf16>, vector<12x16xbf16>, vector<32x16xf32> -> vector<32x16xf32>
    %191 = arith.addf %190, %7 : vector<32x16xf32>
    %cst_134 = arith.constant 0.000000e+00 : f32
    %192 = vector.broadcast %cst_134 : f32 to vector<32x16xf32>
    %193 = arith.maximumf %191, %192 : vector<32x16xf32>
    %c30 = arith.constant 30 : index
    %c0_135 = arith.constant 0 : index
    %c0_136 = arith.constant 0 : index
    %194 = vector.load %arg1[%c30, %c0_135, %c0_136] : memref<64x32x12xbf16, #tpu.memory_space<vmem>>, vector<1x32x12xbf16>
    %195 = vector.shape_cast %194 : vector<1x32x12xbf16> to vector<32x12xbf16>
    %cst_137 = arith.constant dense<0.000000e+00> : vector<32x16xf32>
    %196 = tpu.matmul %195, %0, %cst_137 {dimension_numbers = #tpu.dot_dimension_numbers<[1], [0], [0], [1], [0, 0, 1, 1], [], []>} : vector<32x12xbf16>, vector<12x16xbf16>, vector<32x16xf32> -> vector<32x16xf32>
    %197 = arith.addf %196, %7 : vector<32x16xf32>
    %cst_138 = arith.constant 0.000000e+00 : f32
    %198 = vector.broadcast %cst_138 : f32 to vector<32x16xf32>
    %199 = arith.maximumf %197, %198 : vector<32x16xf32>
    %c31 = arith.constant 31 : index
    %c0_139 = arith.constant 0 : index
    %c0_140 = arith.constant 0 : index
    %200 = vector.load %arg1[%c31, %c0_139, %c0_140] : memref<64x32x12xbf16, #tpu.memory_space<vmem>>, vector<1x32x12xbf16>
    %201 = vector.shape_cast %200 : vector<1x32x12xbf16> to vector<32x12xbf16>
    %cst_141 = arith.constant dense<0.000000e+00> : vector<32x16xf32>
    %202 = tpu.matmul %201, %0, %cst_141 {dimension_numbers = #tpu.dot_dimension_numbers<[1], [0], [0], [1], [0, 0, 1, 1], [], []>} : vector<32x12xbf16>, vector<12x16xbf16>, vector<32x16xf32> -> vector<32x16xf32>
    %203 = arith.addf %202, %7 : vector<32x16xf32>
    %cst_142 = arith.constant 0.000000e+00 : f32
    %204 = vector.broadcast %cst_142 : f32 to vector<32x16xf32>
    %205 = arith.maximumf %203, %204 : vector<32x16xf32>
    %c32 = arith.constant 32 : index
    %c0_143 = arith.constant 0 : index
    %c0_144 = arith.constant 0 : index
    %206 = vector.load %arg1[%c32, %c0_143, %c0_144] : memref<64x32x12xbf16, #tpu.memory_space<vmem>>, vector<1x32x12xbf16>
    %207 = vector.shape_cast %206 : vector<1x32x12xbf16> to vector<32x12xbf16>
    %cst_145 = arith.constant dense<0.000000e+00> : vector<32x16xf32>
    %208 = tpu.matmul %207, %0, %cst_145 {dimension_numbers = #tpu.dot_dimension_numbers<[1], [0], [0], [1], [0, 0, 1, 1], [], []>} : vector<32x12xbf16>, vector<12x16xbf16>, vector<32x16xf32> -> vector<32x16xf32>
    %209 = arith.addf %208, %7 : vector<32x16xf32>
    %cst_146 = arith.constant 0.000000e+00 : f32
    %210 = vector.broadcast %cst_146 : f32 to vector<32x16xf32>
    %211 = arith.maximumf %209, %210 : vector<32x16xf32>
    %c33 = arith.constant 33 : index
    %c0_147 = arith.constant 0 : index
    %c0_148 = arith.constant 0 : index
    %212 = vector.load %arg1[%c33, %c0_147, %c0_148] : memref<64x32x12xbf16, #tpu.memory_space<vmem>>, vector<1x32x12xbf16>
    %213 = vector.shape_cast %212 : vector<1x32x12xbf16> to vector<32x12xbf16>
    %cst_149 = arith.constant dense<0.000000e+00> : vector<32x16xf32>
    %214 = tpu.matmul %213, %0, %cst_149 {dimension_numbers = #tpu.dot_dimension_numbers<[1], [0], [0], [1], [0, 0, 1, 1], [], []>} : vector<32x12xbf16>, vector<12x16xbf16>, vector<32x16xf32> -> vector<32x16xf32>
    %215 = arith.addf %214, %7 : vector<32x16xf32>
    %cst_150 = arith.constant 0.000000e+00 : f32
    %216 = vector.broadcast %cst_150 : f32 to vector<32x16xf32>
    %217 = arith.maximumf %215, %216 : vector<32x16xf32>
    %c34 = arith.constant 34 : index
    %c0_151 = arith.constant 0 : index
    %c0_152 = arith.constant 0 : index
    %218 = vector.load %arg1[%c34, %c0_151, %c0_152] : memref<64x32x12xbf16, #tpu.memory_space<vmem>>, vector<1x32x12xbf16>
    %219 = vector.shape_cast %218 : vector<1x32x12xbf16> to vector<32x12xbf16>
    %cst_153 = arith.constant dense<0.000000e+00> : vector<32x16xf32>
    %220 = tpu.matmul %219, %0, %cst_153 {dimension_numbers = #tpu.dot_dimension_numbers<[1], [0], [0], [1], [0, 0, 1, 1], [], []>} : vector<32x12xbf16>, vector<12x16xbf16>, vector<32x16xf32> -> vector<32x16xf32>
    %221 = arith.addf %220, %7 : vector<32x16xf32>
    %cst_154 = arith.constant 0.000000e+00 : f32
    %222 = vector.broadcast %cst_154 : f32 to vector<32x16xf32>
    %223 = arith.maximumf %221, %222 : vector<32x16xf32>
    %c35 = arith.constant 35 : index
    %c0_155 = arith.constant 0 : index
    %c0_156 = arith.constant 0 : index
    %224 = vector.load %arg1[%c35, %c0_155, %c0_156] : memref<64x32x12xbf16, #tpu.memory_space<vmem>>, vector<1x32x12xbf16>
    %225 = vector.shape_cast %224 : vector<1x32x12xbf16> to vector<32x12xbf16>
    %cst_157 = arith.constant dense<0.000000e+00> : vector<32x16xf32>
    %226 = tpu.matmul %225, %0, %cst_157 {dimension_numbers = #tpu.dot_dimension_numbers<[1], [0], [0], [1], [0, 0, 1, 1], [], []>} : vector<32x12xbf16>, vector<12x16xbf16>, vector<32x16xf32> -> vector<32x16xf32>
    %227 = arith.addf %226, %7 : vector<32x16xf32>
    %cst_158 = arith.constant 0.000000e+00 : f32
    %228 = vector.broadcast %cst_158 : f32 to vector<32x16xf32>
    %229 = arith.maximumf %227, %228 : vector<32x16xf32>
    %c36 = arith.constant 36 : index
    %c0_159 = arith.constant 0 : index
    %c0_160 = arith.constant 0 : index
    %230 = vector.load %arg1[%c36, %c0_159, %c0_160] : memref<64x32x12xbf16, #tpu.memory_space<vmem>>, vector<1x32x12xbf16>
    %231 = vector.shape_cast %230 : vector<1x32x12xbf16> to vector<32x12xbf16>
    %cst_161 = arith.constant dense<0.000000e+00> : vector<32x16xf32>
    %232 = tpu.matmul %231, %0, %cst_161 {dimension_numbers = #tpu.dot_dimension_numbers<[1], [0], [0], [1], [0, 0, 1, 1], [], []>} : vector<32x12xbf16>, vector<12x16xbf16>, vector<32x16xf32> -> vector<32x16xf32>
    %233 = arith.addf %232, %7 : vector<32x16xf32>
    %cst_162 = arith.constant 0.000000e+00 : f32
    %234 = vector.broadcast %cst_162 : f32 to vector<32x16xf32>
    %235 = arith.maximumf %233, %234 : vector<32x16xf32>
    %c37 = arith.constant 37 : index
    %c0_163 = arith.constant 0 : index
    %c0_164 = arith.constant 0 : index
    %236 = vector.load %arg1[%c37, %c0_163, %c0_164] : memref<64x32x12xbf16, #tpu.memory_space<vmem>>, vector<1x32x12xbf16>
    %237 = vector.shape_cast %236 : vector<1x32x12xbf16> to vector<32x12xbf16>
    %cst_165 = arith.constant dense<0.000000e+00> : vector<32x16xf32>
    %238 = tpu.matmul %237, %0, %cst_165 {dimension_numbers = #tpu.dot_dimension_numbers<[1], [0], [0], [1], [0, 0, 1, 1], [], []>} : vector<32x12xbf16>, vector<12x16xbf16>, vector<32x16xf32> -> vector<32x16xf32>
    %239 = arith.addf %238, %7 : vector<32x16xf32>
    %cst_166 = arith.constant 0.000000e+00 : f32
    %240 = vector.broadcast %cst_166 : f32 to vector<32x16xf32>
    %241 = arith.maximumf %239, %240 : vector<32x16xf32>
    %c38 = arith.constant 38 : index
    %c0_167 = arith.constant 0 : index
    %c0_168 = arith.constant 0 : index
    %242 = vector.load %arg1[%c38, %c0_167, %c0_168] : memref<64x32x12xbf16, #tpu.memory_space<vmem>>, vector<1x32x12xbf16>
    %243 = vector.shape_cast %242 : vector<1x32x12xbf16> to vector<32x12xbf16>
    %cst_169 = arith.constant dense<0.000000e+00> : vector<32x16xf32>
    %244 = tpu.matmul %243, %0, %cst_169 {dimension_numbers = #tpu.dot_dimension_numbers<[1], [0], [0], [1], [0, 0, 1, 1], [], []>} : vector<32x12xbf16>, vector<12x16xbf16>, vector<32x16xf32> -> vector<32x16xf32>
    %245 = arith.addf %244, %7 : vector<32x16xf32>
    %cst_170 = arith.constant 0.000000e+00 : f32
    %246 = vector.broadcast %cst_170 : f32 to vector<32x16xf32>
    %247 = arith.maximumf %245, %246 : vector<32x16xf32>
    %c39 = arith.constant 39 : index
    %c0_171 = arith.constant 0 : index
    %c0_172 = arith.constant 0 : index
    %248 = vector.load %arg1[%c39, %c0_171, %c0_172] : memref<64x32x12xbf16, #tpu.memory_space<vmem>>, vector<1x32x12xbf16>
    %249 = vector.shape_cast %248 : vector<1x32x12xbf16> to vector<32x12xbf16>
    %cst_173 = arith.constant dense<0.000000e+00> : vector<32x16xf32>
    %250 = tpu.matmul %249, %0, %cst_173 {dimension_numbers = #tpu.dot_dimension_numbers<[1], [0], [0], [1], [0, 0, 1, 1], [], []>} : vector<32x12xbf16>, vector<12x16xbf16>, vector<32x16xf32> -> vector<32x16xf32>
    %251 = arith.addf %250, %7 : vector<32x16xf32>
    %cst_174 = arith.constant 0.000000e+00 : f32
    %252 = vector.broadcast %cst_174 : f32 to vector<32x16xf32>
    %253 = arith.maximumf %251, %252 : vector<32x16xf32>
    %c40 = arith.constant 40 : index
    %c0_175 = arith.constant 0 : index
    %c0_176 = arith.constant 0 : index
    %254 = vector.load %arg1[%c40, %c0_175, %c0_176] : memref<64x32x12xbf16, #tpu.memory_space<vmem>>, vector<1x32x12xbf16>
    %255 = vector.shape_cast %254 : vector<1x32x12xbf16> to vector<32x12xbf16>
    %cst_177 = arith.constant dense<0.000000e+00> : vector<32x16xf32>
    %256 = tpu.matmul %255, %0, %cst_177 {dimension_numbers = #tpu.dot_dimension_numbers<[1], [0], [0], [1], [0, 0, 1, 1], [], []>} : vector<32x12xbf16>, vector<12x16xbf16>, vector<32x16xf32> -> vector<32x16xf32>
    %257 = arith.addf %256, %7 : vector<32x16xf32>
    %cst_178 = arith.constant 0.000000e+00 : f32
    %258 = vector.broadcast %cst_178 : f32 to vector<32x16xf32>
    %259 = arith.maximumf %257, %258 : vector<32x16xf32>
    %c41 = arith.constant 41 : index
    %c0_179 = arith.constant 0 : index
    %c0_180 = arith.constant 0 : index
    %260 = vector.load %arg1[%c41, %c0_179, %c0_180] : memref<64x32x12xbf16, #tpu.memory_space<vmem>>, vector<1x32x12xbf16>
    %261 = vector.shape_cast %260 : vector<1x32x12xbf16> to vector<32x12xbf16>
    %cst_181 = arith.constant dense<0.000000e+00> : vector<32x16xf32>
    %262 = tpu.matmul %261, %0, %cst_181 {dimension_numbers = #tpu.dot_dimension_numbers<[1], [0], [0], [1], [0, 0, 1, 1], [], []>} : vector<32x12xbf16>, vector<12x16xbf16>, vector<32x16xf32> -> vector<32x16xf32>
    %263 = arith.addf %262, %7 : vector<32x16xf32>
    %cst_182 = arith.constant 0.000000e+00 : f32
    %264 = vector.broadcast %cst_182 : f32 to vector<32x16xf32>
    %265 = arith.maximumf %263, %264 : vector<32x16xf32>
    %c42 = arith.constant 42 : index
    %c0_183 = arith.constant 0 : index
    %c0_184 = arith.constant 0 : index
    %266 = vector.load %arg1[%c42, %c0_183, %c0_184] : memref<64x32x12xbf16, #tpu.memory_space<vmem>>, vector<1x32x12xbf16>
    %267 = vector.shape_cast %266 : vector<1x32x12xbf16> to vector<32x12xbf16>
    %cst_185 = arith.constant dense<0.000000e+00> : vector<32x16xf32>
    %268 = tpu.matmul %267, %0, %cst_185 {dimension_numbers = #tpu.dot_dimension_numbers<[1], [0], [0], [1], [0, 0, 1, 1], [], []>} : vector<32x12xbf16>, vector<12x16xbf16>, vector<32x16xf32> -> vector<32x16xf32>
    %269 = arith.addf %268, %7 : vector<32x16xf32>
    %cst_186 = arith.constant 0.000000e+00 : f32
    %270 = vector.broadcast %cst_186 : f32 to vector<32x16xf32>
    %271 = arith.maximumf %269, %270 : vector<32x16xf32>
    %c43 = arith.constant 43 : index
    %c0_187 = arith.constant 0 : index
    %c0_188 = arith.constant 0 : index
    %272 = vector.load %arg1[%c43, %c0_187, %c0_188] : memref<64x32x12xbf16, #tpu.memory_space<vmem>>, vector<1x32x12xbf16>
    %273 = vector.shape_cast %272 : vector<1x32x12xbf16> to vector<32x12xbf16>
    %cst_189 = arith.constant dense<0.000000e+00> : vector<32x16xf32>
    %274 = tpu.matmul %273, %0, %cst_189 {dimension_numbers = #tpu.dot_dimension_numbers<[1], [0], [0], [1], [0, 0, 1, 1], [], []>} : vector<32x12xbf16>, vector<12x16xbf16>, vector<32x16xf32> -> vector<32x16xf32>
    %275 = arith.addf %274, %7 : vector<32x16xf32>
    %cst_190 = arith.constant 0.000000e+00 : f32
    %276 = vector.broadcast %cst_190 : f32 to vector<32x16xf32>
    %277 = arith.maximumf %275, %276 : vector<32x16xf32>
    %c44 = arith.constant 44 : index
    %c0_191 = arith.constant 0 : index
    %c0_192 = arith.constant 0 : index
    %278 = vector.load %arg1[%c44, %c0_191, %c0_192] : memref<64x32x12xbf16, #tpu.memory_space<vmem>>, vector<1x32x12xbf16>
    %279 = vector.shape_cast %278 : vector<1x32x12xbf16> to vector<32x12xbf16>
    %cst_193 = arith.constant dense<0.000000e+00> : vector<32x16xf32>
    %280 = tpu.matmul %279, %0, %cst_193 {dimension_numbers = #tpu.dot_dimension_numbers<[1], [0], [0], [1], [0, 0, 1, 1], [], []>} : vector<32x12xbf16>, vector<12x16xbf16>, vector<32x16xf32> -> vector<32x16xf32>
    %281 = arith.addf %280, %7 : vector<32x16xf32>
    %cst_194 = arith.constant 0.000000e+00 : f32
    %282 = vector.broadcast %cst_194 : f32 to vector<32x16xf32>
    %283 = arith.maximumf %281, %282 : vector<32x16xf32>
    %c45 = arith.constant 45 : index
    %c0_195 = arith.constant 0 : index
    %c0_196 = arith.constant 0 : index
    %284 = vector.load %arg1[%c45, %c0_195, %c0_196] : memref<64x32x12xbf16, #tpu.memory_space<vmem>>, vector<1x32x12xbf16>
    %285 = vector.shape_cast %284 : vector<1x32x12xbf16> to vector<32x12xbf16>
    %cst_197 = arith.constant dense<0.000000e+00> : vector<32x16xf32>
    %286 = tpu.matmul %285, %0, %cst_197 {dimension_numbers = #tpu.dot_dimension_numbers<[1], [0], [0], [1], [0, 0, 1, 1], [], []>} : vector<32x12xbf16>, vector<12x16xbf16>, vector<32x16xf32> -> vector<32x16xf32>
    %287 = arith.addf %286, %7 : vector<32x16xf32>
    %cst_198 = arith.constant 0.000000e+00 : f32
    %288 = vector.broadcast %cst_198 : f32 to vector<32x16xf32>
    %289 = arith.maximumf %287, %288 : vector<32x16xf32>
    %c46 = arith.constant 46 : index
    %c0_199 = arith.constant 0 : index
    %c0_200 = arith.constant 0 : index
    %290 = vector.load %arg1[%c46, %c0_199, %c0_200] : memref<64x32x12xbf16, #tpu.memory_space<vmem>>, vector<1x32x12xbf16>
    %291 = vector.shape_cast %290 : vector<1x32x12xbf16> to vector<32x12xbf16>
    %cst_201 = arith.constant dense<0.000000e+00> : vector<32x16xf32>
    %292 = tpu.matmul %291, %0, %cst_201 {dimension_numbers = #tpu.dot_dimension_numbers<[1], [0], [0], [1], [0, 0, 1, 1], [], []>} : vector<32x12xbf16>, vector<12x16xbf16>, vector<32x16xf32> -> vector<32x16xf32>
    %293 = arith.addf %292, %7 : vector<32x16xf32>
    %cst_202 = arith.constant 0.000000e+00 : f32
    %294 = vector.broadcast %cst_202 : f32 to vector<32x16xf32>
    %295 = arith.maximumf %293, %294 : vector<32x16xf32>
    %c47 = arith.constant 47 : index
    %c0_203 = arith.constant 0 : index
    %c0_204 = arith.constant 0 : index
    %296 = vector.load %arg1[%c47, %c0_203, %c0_204] : memref<64x32x12xbf16, #tpu.memory_space<vmem>>, vector<1x32x12xbf16>
    %297 = vector.shape_cast %296 : vector<1x32x12xbf16> to vector<32x12xbf16>
    %cst_205 = arith.constant dense<0.000000e+00> : vector<32x16xf32>
    %298 = tpu.matmul %297, %0, %cst_205 {dimension_numbers = #tpu.dot_dimension_numbers<[1], [0], [0], [1], [0, 0, 1, 1], [], []>} : vector<32x12xbf16>, vector<12x16xbf16>, vector<32x16xf32> -> vector<32x16xf32>
    %299 = arith.addf %298, %7 : vector<32x16xf32>
    %cst_206 = arith.constant 0.000000e+00 : f32
    %300 = vector.broadcast %cst_206 : f32 to vector<32x16xf32>
    %301 = arith.maximumf %299, %300 : vector<32x16xf32>
    %c48 = arith.constant 48 : index
    %c0_207 = arith.constant 0 : index
    %c0_208 = arith.constant 0 : index
    %302 = vector.load %arg1[%c48, %c0_207, %c0_208] : memref<64x32x12xbf16, #tpu.memory_space<vmem>>, vector<1x32x12xbf16>
    %303 = vector.shape_cast %302 : vector<1x32x12xbf16> to vector<32x12xbf16>
    %cst_209 = arith.constant dense<0.000000e+00> : vector<32x16xf32>
    %304 = tpu.matmul %303, %0, %cst_209 {dimension_numbers = #tpu.dot_dimension_numbers<[1], [0], [0], [1], [0, 0, 1, 1], [], []>} : vector<32x12xbf16>, vector<12x16xbf16>, vector<32x16xf32> -> vector<32x16xf32>
    %305 = arith.addf %304, %7 : vector<32x16xf32>
    %cst_210 = arith.constant 0.000000e+00 : f32
    %306 = vector.broadcast %cst_210 : f32 to vector<32x16xf32>
    %307 = arith.maximumf %305, %306 : vector<32x16xf32>
    %c49 = arith.constant 49 : index
    %c0_211 = arith.constant 0 : index
    %c0_212 = arith.constant 0 : index
    %308 = vector.load %arg1[%c49, %c0_211, %c0_212] : memref<64x32x12xbf16, #tpu.memory_space<vmem>>, vector<1x32x12xbf16>
    %309 = vector.shape_cast %308 : vector<1x32x12xbf16> to vector<32x12xbf16>
    %cst_213 = arith.constant dense<0.000000e+00> : vector<32x16xf32>
    %310 = tpu.matmul %309, %0, %cst_213 {dimension_numbers = #tpu.dot_dimension_numbers<[1], [0], [0], [1], [0, 0, 1, 1], [], []>} : vector<32x12xbf16>, vector<12x16xbf16>, vector<32x16xf32> -> vector<32x16xf32>
    %311 = arith.addf %310, %7 : vector<32x16xf32>
    %cst_214 = arith.constant 0.000000e+00 : f32
    %312 = vector.broadcast %cst_214 : f32 to vector<32x16xf32>
    %313 = arith.maximumf %311, %312 : vector<32x16xf32>
    %c50 = arith.constant 50 : index
    %c0_215 = arith.constant 0 : index
    %c0_216 = arith.constant 0 : index
    %314 = vector.load %arg1[%c50, %c0_215, %c0_216] : memref<64x32x12xbf16, #tpu.memory_space<vmem>>, vector<1x32x12xbf16>
    %315 = vector.shape_cast %314 : vector<1x32x12xbf16> to vector<32x12xbf16>
    %cst_217 = arith.constant dense<0.000000e+00> : vector<32x16xf32>
    %316 = tpu.matmul %315, %0, %cst_217 {dimension_numbers = #tpu.dot_dimension_numbers<[1], [0], [0], [1], [0, 0, 1, 1], [], []>} : vector<32x12xbf16>, vector<12x16xbf16>, vector<32x16xf32> -> vector<32x16xf32>
    %317 = arith.addf %316, %7 : vector<32x16xf32>
    %cst_218 = arith.constant 0.000000e+00 : f32
    %318 = vector.broadcast %cst_218 : f32 to vector<32x16xf32>
    %319 = arith.maximumf %317, %318 : vector<32x16xf32>
    %c51 = arith.constant 51 : index
    %c0_219 = arith.constant 0 : index
    %c0_220 = arith.constant 0 : index
    %320 = vector.load %arg1[%c51, %c0_219, %c0_220] : memref<64x32x12xbf16, #tpu.memory_space<vmem>>, vector<1x32x12xbf16>
    %321 = vector.shape_cast %320 : vector<1x32x12xbf16> to vector<32x12xbf16>
    %cst_221 = arith.constant dense<0.000000e+00> : vector<32x16xf32>
    %322 = tpu.matmul %321, %0, %cst_221 {dimension_numbers = #tpu.dot_dimension_numbers<[1], [0], [0], [1], [0, 0, 1, 1], [], []>} : vector<32x12xbf16>, vector<12x16xbf16>, vector<32x16xf32> -> vector<32x16xf32>
    %323 = arith.addf %322, %7 : vector<32x16xf32>
    %cst_222 = arith.constant 0.000000e+00 : f32
    %324 = vector.broadcast %cst_222 : f32 to vector<32x16xf32>
    %325 = arith.maximumf %323, %324 : vector<32x16xf32>
    %c52 = arith.constant 52 : index
    %c0_223 = arith.constant 0 : index
    %c0_224 = arith.constant 0 : index
    %326 = vector.load %arg1[%c52, %c0_223, %c0_224] : memref<64x32x12xbf16, #tpu.memory_space<vmem>>, vector<1x32x12xbf16>
    %327 = vector.shape_cast %326 : vector<1x32x12xbf16> to vector<32x12xbf16>
    %cst_225 = arith.constant dense<0.000000e+00> : vector<32x16xf32>
    %328 = tpu.matmul %327, %0, %cst_225 {dimension_numbers = #tpu.dot_dimension_numbers<[1], [0], [0], [1], [0, 0, 1, 1], [], []>} : vector<32x12xbf16>, vector<12x16xbf16>, vector<32x16xf32> -> vector<32x16xf32>
    %329 = arith.addf %328, %7 : vector<32x16xf32>
    %cst_226 = arith.constant 0.000000e+00 : f32
    %330 = vector.broadcast %cst_226 : f32 to vector<32x16xf32>
    %331 = arith.maximumf %329, %330 : vector<32x16xf32>
    %c53 = arith.constant 53 : index
    %c0_227 = arith.constant 0 : index
    %c0_228 = arith.constant 0 : index
    %332 = vector.load %arg1[%c53, %c0_227, %c0_228] : memref<64x32x12xbf16, #tpu.memory_space<vmem>>, vector<1x32x12xbf16>
    %333 = vector.shape_cast %332 : vector<1x32x12xbf16> to vector<32x12xbf16>
    %cst_229 = arith.constant dense<0.000000e+00> : vector<32x16xf32>
    %334 = tpu.matmul %333, %0, %cst_229 {dimension_numbers = #tpu.dot_dimension_numbers<[1], [0], [0], [1], [0, 0, 1, 1], [], []>} : vector<32x12xbf16>, vector<12x16xbf16>, vector<32x16xf32> -> vector<32x16xf32>
    %335 = arith.addf %334, %7 : vector<32x16xf32>
    %cst_230 = arith.constant 0.000000e+00 : f32
    %336 = vector.broadcast %cst_230 : f32 to vector<32x16xf32>
    %337 = arith.maximumf %335, %336 : vector<32x16xf32>
    %c54 = arith.constant 54 : index
    %c0_231 = arith.constant 0 : index
    %c0_232 = arith.constant 0 : index
    %338 = vector.load %arg1[%c54, %c0_231, %c0_232] : memref<64x32x12xbf16, #tpu.memory_space<vmem>>, vector<1x32x12xbf16>
    %339 = vector.shape_cast %338 : vector<1x32x12xbf16> to vector<32x12xbf16>
    %cst_233 = arith.constant dense<0.000000e+00> : vector<32x16xf32>
    %340 = tpu.matmul %339, %0, %cst_233 {dimension_numbers = #tpu.dot_dimension_numbers<[1], [0], [0], [1], [0, 0, 1, 1], [], []>} : vector<32x12xbf16>, vector<12x16xbf16>, vector<32x16xf32> -> vector<32x16xf32>
    %341 = arith.addf %340, %7 : vector<32x16xf32>
    %cst_234 = arith.constant 0.000000e+00 : f32
    %342 = vector.broadcast %cst_234 : f32 to vector<32x16xf32>
    %343 = arith.maximumf %341, %342 : vector<32x16xf32>
    %c55 = arith.constant 55 : index
    %c0_235 = arith.constant 0 : index
    %c0_236 = arith.constant 0 : index
    %344 = vector.load %arg1[%c55, %c0_235, %c0_236] : memref<64x32x12xbf16, #tpu.memory_space<vmem>>, vector<1x32x12xbf16>
    %345 = vector.shape_cast %344 : vector<1x32x12xbf16> to vector<32x12xbf16>
    %cst_237 = arith.constant dense<0.000000e+00> : vector<32x16xf32>
    %346 = tpu.matmul %345, %0, %cst_237 {dimension_numbers = #tpu.dot_dimension_numbers<[1], [0], [0], [1], [0, 0, 1, 1], [], []>} : vector<32x12xbf16>, vector<12x16xbf16>, vector<32x16xf32> -> vector<32x16xf32>
    %347 = arith.addf %346, %7 : vector<32x16xf32>
    %cst_238 = arith.constant 0.000000e+00 : f32
    %348 = vector.broadcast %cst_238 : f32 to vector<32x16xf32>
    %349 = arith.maximumf %347, %348 : vector<32x16xf32>
    %c56 = arith.constant 56 : index
    %c0_239 = arith.constant 0 : index
    %c0_240 = arith.constant 0 : index
    %350 = vector.load %arg1[%c56, %c0_239, %c0_240] : memref<64x32x12xbf16, #tpu.memory_space<vmem>>, vector<1x32x12xbf16>
    %351 = vector.shape_cast %350 : vector<1x32x12xbf16> to vector<32x12xbf16>
    %cst_241 = arith.constant dense<0.000000e+00> : vector<32x16xf32>
    %352 = tpu.matmul %351, %0, %cst_241 {dimension_numbers = #tpu.dot_dimension_numbers<[1], [0], [0], [1], [0, 0, 1, 1], [], []>} : vector<32x12xbf16>, vector<12x16xbf16>, vector<32x16xf32> -> vector<32x16xf32>
    %353 = arith.addf %352, %7 : vector<32x16xf32>
    %cst_242 = arith.constant 0.000000e+00 : f32
    %354 = vector.broadcast %cst_242 : f32 to vector<32x16xf32>
    %355 = arith.maximumf %353, %354 : vector<32x16xf32>
    %c57 = arith.constant 57 : index
    %c0_243 = arith.constant 0 : index
    %c0_244 = arith.constant 0 : index
    %356 = vector.load %arg1[%c57, %c0_243, %c0_244] : memref<64x32x12xbf16, #tpu.memory_space<vmem>>, vector<1x32x12xbf16>
    %357 = vector.shape_cast %356 : vector<1x32x12xbf16> to vector<32x12xbf16>
    %cst_245 = arith.constant dense<0.000000e+00> : vector<32x16xf32>
    %358 = tpu.matmul %357, %0, %cst_245 {dimension_numbers = #tpu.dot_dimension_numbers<[1], [0], [0], [1], [0, 0, 1, 1], [], []>} : vector<32x12xbf16>, vector<12x16xbf16>, vector<32x16xf32> -> vector<32x16xf32>
    %359 = arith.addf %358, %7 : vector<32x16xf32>
    %cst_246 = arith.constant 0.000000e+00 : f32
    %360 = vector.broadcast %cst_246 : f32 to vector<32x16xf32>
    %361 = arith.maximumf %359, %360 : vector<32x16xf32>
    %c58 = arith.constant 58 : index
    %c0_247 = arith.constant 0 : index
    %c0_248 = arith.constant 0 : index
    %362 = vector.load %arg1[%c58, %c0_247, %c0_248] : memref<64x32x12xbf16, #tpu.memory_space<vmem>>, vector<1x32x12xbf16>
    %363 = vector.shape_cast %362 : vector<1x32x12xbf16> to vector<32x12xbf16>
    %cst_249 = arith.constant dense<0.000000e+00> : vector<32x16xf32>
    %364 = tpu.matmul %363, %0, %cst_249 {dimension_numbers = #tpu.dot_dimension_numbers<[1], [0], [0], [1], [0, 0, 1, 1], [], []>} : vector<32x12xbf16>, vector<12x16xbf16>, vector<32x16xf32> -> vector<32x16xf32>
    %365 = arith.addf %364, %7 : vector<32x16xf32>
    %cst_250 = arith.constant 0.000000e+00 : f32
    %366 = vector.broadcast %cst_250 : f32 to vector<32x16xf32>
    %367 = arith.maximumf %365, %366 : vector<32x16xf32>
    %c59 = arith.constant 59 : index
    %c0_251 = arith.constant 0 : index
    %c0_252 = arith.constant 0 : index
    %368 = vector.load %arg1[%c59, %c0_251, %c0_252] : memref<64x32x12xbf16, #tpu.memory_space<vmem>>, vector<1x32x12xbf16>
    %369 = vector.shape_cast %368 : vector<1x32x12xbf16> to vector<32x12xbf16>
    %cst_253 = arith.constant dense<0.000000e+00> : vector<32x16xf32>
    %370 = tpu.matmul %369, %0, %cst_253 {dimension_numbers = #tpu.dot_dimension_numbers<[1], [0], [0], [1], [0, 0, 1, 1], [], []>} : vector<32x12xbf16>, vector<12x16xbf16>, vector<32x16xf32> -> vector<32x16xf32>
    %371 = arith.addf %370, %7 : vector<32x16xf32>
    %cst_254 = arith.constant 0.000000e+00 : f32
    %372 = vector.broadcast %cst_254 : f32 to vector<32x16xf32>
    %373 = arith.maximumf %371, %372 : vector<32x16xf32>
    %c60 = arith.constant 60 : index
    %c0_255 = arith.constant 0 : index
    %c0_256 = arith.constant 0 : index
    %374 = vector.load %arg1[%c60, %c0_255, %c0_256] : memref<64x32x12xbf16, #tpu.memory_space<vmem>>, vector<1x32x12xbf16>
    %375 = vector.shape_cast %374 : vector<1x32x12xbf16> to vector<32x12xbf16>
    %cst_257 = arith.constant dense<0.000000e+00> : vector<32x16xf32>
    %376 = tpu.matmul %375, %0, %cst_257 {dimension_numbers = #tpu.dot_dimension_numbers<[1], [0], [0], [1], [0, 0, 1, 1], [], []>} : vector<32x12xbf16>, vector<12x16xbf16>, vector<32x16xf32> -> vector<32x16xf32>
    %377 = arith.addf %376, %7 : vector<32x16xf32>
    %cst_258 = arith.constant 0.000000e+00 : f32
    %378 = vector.broadcast %cst_258 : f32 to vector<32x16xf32>
    %379 = arith.maximumf %377, %378 : vector<32x16xf32>
    %c61 = arith.constant 61 : index
    %c0_259 = arith.constant 0 : index
    %c0_260 = arith.constant 0 : index
    %380 = vector.load %arg1[%c61, %c0_259, %c0_260] : memref<64x32x12xbf16, #tpu.memory_space<vmem>>, vector<1x32x12xbf16>
    %381 = vector.shape_cast %380 : vector<1x32x12xbf16> to vector<32x12xbf16>
    %cst_261 = arith.constant dense<0.000000e+00> : vector<32x16xf32>
    %382 = tpu.matmul %381, %0, %cst_261 {dimension_numbers = #tpu.dot_dimension_numbers<[1], [0], [0], [1], [0, 0, 1, 1], [], []>} : vector<32x12xbf16>, vector<12x16xbf16>, vector<32x16xf32> -> vector<32x16xf32>
    %383 = arith.addf %382, %7 : vector<32x16xf32>
    %cst_262 = arith.constant 0.000000e+00 : f32
    %384 = vector.broadcast %cst_262 : f32 to vector<32x16xf32>
    %385 = arith.maximumf %383, %384 : vector<32x16xf32>
    %c62 = arith.constant 62 : index
    %c0_263 = arith.constant 0 : index
    %c0_264 = arith.constant 0 : index
    %386 = vector.load %arg1[%c62, %c0_263, %c0_264] : memref<64x32x12xbf16, #tpu.memory_space<vmem>>, vector<1x32x12xbf16>
    %387 = vector.shape_cast %386 : vector<1x32x12xbf16> to vector<32x12xbf16>
    %cst_265 = arith.constant dense<0.000000e+00> : vector<32x16xf32>
    %388 = tpu.matmul %387, %0, %cst_265 {dimension_numbers = #tpu.dot_dimension_numbers<[1], [0], [0], [1], [0, 0, 1, 1], [], []>} : vector<32x12xbf16>, vector<12x16xbf16>, vector<32x16xf32> -> vector<32x16xf32>
    %389 = arith.addf %388, %7 : vector<32x16xf32>
    %cst_266 = arith.constant 0.000000e+00 : f32
    %390 = vector.broadcast %cst_266 : f32 to vector<32x16xf32>
    %391 = arith.maximumf %389, %390 : vector<32x16xf32>
    %c63 = arith.constant 63 : index
    %c0_267 = arith.constant 0 : index
    %c0_268 = arith.constant 0 : index
    %392 = vector.load %arg1[%c63, %c0_267, %c0_268] : memref<64x32x12xbf16, #tpu.memory_space<vmem>>, vector<1x32x12xbf16>
    %393 = vector.shape_cast %392 : vector<1x32x12xbf16> to vector<32x12xbf16>
    %cst_269 = arith.constant dense<0.000000e+00> : vector<32x16xf32>
    %394 = tpu.matmul %393, %0, %cst_269 {dimension_numbers = #tpu.dot_dimension_numbers<[1], [0], [0], [1], [0, 0, 1, 1], [], []>} : vector<32x12xbf16>, vector<12x16xbf16>, vector<32x16xf32> -> vector<32x16xf32>
    %395 = arith.addf %394, %7 : vector<32x16xf32>
    %cst_270 = arith.constant 0.000000e+00 : f32
    %396 = vector.broadcast %cst_270 : f32 to vector<32x16xf32>
    %397 = arith.maximumf %395, %396 : vector<32x16xf32>
    %398 = arith.maximumf %19, %25 : vector<32x16xf32>
    %399 = arith.maximumf %67, %73 : vector<32x16xf32>
    %400 = arith.maximumf %398, %399 : vector<32x16xf32>
    %401 = arith.maximumf %31, %37 : vector<32x16xf32>
    %402 = arith.maximumf %79, %85 : vector<32x16xf32>
    %403 = arith.maximumf %401, %402 : vector<32x16xf32>
    %404 = arith.maximumf %43, %49 : vector<32x16xf32>
    %405 = arith.maximumf %91, %97 : vector<32x16xf32>
    %406 = arith.maximumf %404, %405 : vector<32x16xf32>
    %407 = arith.maximumf %55, %61 : vector<32x16xf32>
    %408 = arith.maximumf %103, %109 : vector<32x16xf32>
    %409 = arith.maximumf %407, %408 : vector<32x16xf32>
    %410 = arith.maximumf %115, %121 : vector<32x16xf32>
    %411 = arith.maximumf %163, %169 : vector<32x16xf32>
    %412 = arith.maximumf %410, %411 : vector<32x16xf32>
    %413 = arith.maximumf %127, %133 : vector<32x16xf32>
    %414 = arith.maximumf %175, %181 : vector<32x16xf32>
    %415 = arith.maximumf %413, %414 : vector<32x16xf32>
    %416 = arith.maximumf %139, %145 : vector<32x16xf32>
    %417 = arith.maximumf %187, %193 : vector<32x16xf32>
    %418 = arith.maximumf %416, %417 : vector<32x16xf32>
    %419 = arith.maximumf %151, %157 : vector<32x16xf32>
    %420 = arith.maximumf %199, %205 : vector<32x16xf32>
    %421 = arith.maximumf %419, %420 : vector<32x16xf32>
    %422 = arith.maximumf %211, %217 : vector<32x16xf32>
    %423 = arith.maximumf %259, %265 : vector<32x16xf32>
    %424 = arith.maximumf %422, %423 : vector<32x16xf32>
    %425 = arith.maximumf %223, %229 : vector<32x16xf32>
    %426 = arith.maximumf %271, %277 : vector<32x16xf32>
    %427 = arith.maximumf %425, %426 : vector<32x16xf32>
    %428 = arith.maximumf %235, %241 : vector<32x16xf32>
    %429 = arith.maximumf %283, %289 : vector<32x16xf32>
    %430 = arith.maximumf %428, %429 : vector<32x16xf32>
    %431 = arith.maximumf %247, %253 : vector<32x16xf32>
    %432 = arith.maximumf %295, %301 : vector<32x16xf32>
    %433 = arith.maximumf %431, %432 : vector<32x16xf32>
    %434 = arith.maximumf %307, %313 : vector<32x16xf32>
    %435 = arith.maximumf %355, %361 : vector<32x16xf32>
    %436 = arith.maximumf %434, %435 : vector<32x16xf32>
    %437 = arith.maximumf %319, %325 : vector<32x16xf32>
    %438 = arith.maximumf %367, %373 : vector<32x16xf32>
    %439 = arith.maximumf %437, %438 : vector<32x16xf32>
    %440 = arith.maximumf %331, %337 : vector<32x16xf32>
    %441 = arith.maximumf %379, %385 : vector<32x16xf32>
    %442 = arith.maximumf %440, %441 : vector<32x16xf32>
    %443 = arith.maximumf %343, %349 : vector<32x16xf32>
    %444 = arith.maximumf %391, %397 : vector<32x16xf32>
    %445 = arith.maximumf %443, %444 : vector<32x16xf32>
    %446 = tpu.concatenate %400, %403, %412, %415 in 1 : vector<32x16xf32>, vector<32x16xf32>, vector<32x16xf32>, vector<32x16xf32> -> vector<32x64xf32>
    %447 = arith.truncf %446 : vector<32x64xf32> to vector<32x64xbf16>
    %cst_271 = arith.constant dense<0.000000e+00> : vector<32x32xf32>
    %448 = tpu.matmul %447, %1, %cst_271 {dimension_numbers = #tpu.dot_dimension_numbers<[1], [0], [0], [1], [0, 0, 1, 1], [], []>} : vector<32x64xbf16>, vector<64x32xbf16>, vector<32x32xf32> -> vector<32x32xf32>
    %449 = arith.addf %448, %10 : vector<32x32xf32>
    %cst_272 = arith.constant 0.000000e+00 : f32
    %450 = vector.broadcast %cst_272 : f32 to vector<32x32xf32>
    %451 = arith.maximumf %449, %450 : vector<32x32xf32>
    %452 = tpu.concatenate %403, %406, %415, %418 in 1 : vector<32x16xf32>, vector<32x16xf32>, vector<32x16xf32>, vector<32x16xf32> -> vector<32x64xf32>
    %453 = arith.truncf %452 : vector<32x64xf32> to vector<32x64xbf16>
    %cst_273 = arith.constant dense<0.000000e+00> : vector<32x32xf32>
    %454 = tpu.matmul %453, %1, %cst_273 {dimension_numbers = #tpu.dot_dimension_numbers<[1], [0], [0], [1], [0, 0, 1, 1], [], []>} : vector<32x64xbf16>, vector<64x32xbf16>, vector<32x32xf32> -> vector<32x32xf32>
    %455 = arith.addf %454, %10 : vector<32x32xf32>
    %cst_274 = arith.constant 0.000000e+00 : f32
    %456 = vector.broadcast %cst_274 : f32 to vector<32x32xf32>
    %457 = arith.maximumf %455, %456 : vector<32x32xf32>
    %458 = tpu.concatenate %406, %409, %418, %421 in 1 : vector<32x16xf32>, vector<32x16xf32>, vector<32x16xf32>, vector<32x16xf32> -> vector<32x64xf32>
    %459 = arith.truncf %458 : vector<32x64xf32> to vector<32x64xbf16>
    %cst_275 = arith.constant dense<0.000000e+00> : vector<32x32xf32>
    %460 = tpu.matmul %459, %1, %cst_275 {dimension_numbers = #tpu.dot_dimension_numbers<[1], [0], [0], [1], [0, 0, 1, 1], [], []>} : vector<32x64xbf16>, vector<64x32xbf16>, vector<32x32xf32> -> vector<32x32xf32>
    %461 = arith.addf %460, %10 : vector<32x32xf32>
    %cst_276 = arith.constant 0.000000e+00 : f32
    %462 = vector.broadcast %cst_276 : f32 to vector<32x32xf32>
    %463 = arith.maximumf %461, %462 : vector<32x32xf32>
    %464 = tpu.concatenate %412, %415, %424, %427 in 1 : vector<32x16xf32>, vector<32x16xf32>, vector<32x16xf32>, vector<32x16xf32> -> vector<32x64xf32>
    %465 = arith.truncf %464 : vector<32x64xf32> to vector<32x64xbf16>
    %cst_277 = arith.constant dense<0.000000e+00> : vector<32x32xf32>
    %466 = tpu.matmul %465, %1, %cst_277 {dimension_numbers = #tpu.dot_dimension_numbers<[1], [0], [0], [1], [0, 0, 1, 1], [], []>} : vector<32x64xbf16>, vector<64x32xbf16>, vector<32x32xf32> -> vector<32x32xf32>
    %467 = arith.addf %466, %10 : vector<32x32xf32>
    %cst_278 = arith.constant 0.000000e+00 : f32
    %468 = vector.broadcast %cst_278 : f32 to vector<32x32xf32>
    %469 = arith.maximumf %467, %468 : vector<32x32xf32>
    %470 = tpu.concatenate %415, %418, %427, %430 in 1 : vector<32x16xf32>, vector<32x16xf32>, vector<32x16xf32>, vector<32x16xf32> -> vector<32x64xf32>
    %471 = arith.truncf %470 : vector<32x64xf32> to vector<32x64xbf16>
    %cst_279 = arith.constant dense<0.000000e+00> : vector<32x32xf32>
    %472 = tpu.matmul %471, %1, %cst_279 {dimension_numbers = #tpu.dot_dimension_numbers<[1], [0], [0], [1], [0, 0, 1, 1], [], []>} : vector<32x64xbf16>, vector<64x32xbf16>, vector<32x32xf32> -> vector<32x32xf32>
    %473 = arith.addf %472, %10 : vector<32x32xf32>
    %cst_280 = arith.constant 0.000000e+00 : f32
    %474 = vector.broadcast %cst_280 : f32 to vector<32x32xf32>
    %475 = arith.maximumf %473, %474 : vector<32x32xf32>
    %476 = tpu.concatenate %418, %421, %430, %433 in 1 : vector<32x16xf32>, vector<32x16xf32>, vector<32x16xf32>, vector<32x16xf32> -> vector<32x64xf32>
    %477 = arith.truncf %476 : vector<32x64xf32> to vector<32x64xbf16>
    %cst_281 = arith.constant dense<0.000000e+00> : vector<32x32xf32>
    %478 = tpu.matmul %477, %1, %cst_281 {dimension_numbers = #tpu.dot_dimension_numbers<[1], [0], [0], [1], [0, 0, 1, 1], [], []>} : vector<32x64xbf16>, vector<64x32xbf16>, vector<32x32xf32> -> vector<32x32xf32>
    %479 = arith.addf %478, %10 : vector<32x32xf32>
    %cst_282 = arith.constant 0.000000e+00 : f32
    %480 = vector.broadcast %cst_282 : f32 to vector<32x32xf32>
    %481 = arith.maximumf %479, %480 : vector<32x32xf32>
    %482 = tpu.concatenate %424, %427, %436, %439 in 1 : vector<32x16xf32>, vector<32x16xf32>, vector<32x16xf32>, vector<32x16xf32> -> vector<32x64xf32>
    %483 = arith.truncf %482 : vector<32x64xf32> to vector<32x64xbf16>
    %cst_283 = arith.constant dense<0.000000e+00> : vector<32x32xf32>
    %484 = tpu.matmul %483, %1, %cst_283 {dimension_numbers = #tpu.dot_dimension_numbers<[1], [0], [0], [1], [0, 0, 1, 1], [], []>} : vector<32x64xbf16>, vector<64x32xbf16>, vector<32x32xf32> -> vector<32x32xf32>
    %485 = arith.addf %484, %10 : vector<32x32xf32>
    %cst_284 = arith.constant 0.000000e+00 : f32
    %486 = vector.broadcast %cst_284 : f32 to vector<32x32xf32>
    %487 = arith.maximumf %485, %486 : vector<32x32xf32>
    %488 = tpu.concatenate %427, %430, %439, %442 in 1 : vector<32x16xf32>, vector<32x16xf32>, vector<32x16xf32>, vector<32x16xf32> -> vector<32x64xf32>
    %489 = arith.truncf %488 : vector<32x64xf32> to vector<32x64xbf16>
    %cst_285 = arith.constant dense<0.000000e+00> : vector<32x32xf32>
    %490 = tpu.matmul %489, %1, %cst_285 {dimension_numbers = #tpu.dot_dimension_numbers<[1], [0], [0], [1], [0, 0, 1, 1], [], []>} : vector<32x64xbf16>, vector<64x32xbf16>, vector<32x32xf32> -> vector<32x32xf32>
    %491 = arith.addf %490, %10 : vector<32x32xf32>
    %cst_286 = arith.constant 0.000000e+00 : f32
    %492 = vector.broadcast %cst_286 : f32 to vector<32x32xf32>
    %493 = arith.maximumf %491, %492 : vector<32x32xf32>
    %494 = tpu.concatenate %430, %433, %442, %445 in 1 : vector<32x16xf32>, vector<32x16xf32>, vector<32x16xf32>, vector<32x16xf32> -> vector<32x64xf32>
    %495 = arith.truncf %494 : vector<32x64xf32> to vector<32x64xbf16>
    %cst_287 = arith.constant dense<0.000000e+00> : vector<32x32xf32>
    %496 = tpu.matmul %495, %1, %cst_287 {dimension_numbers = #tpu.dot_dimension_numbers<[1], [0], [0], [1], [0, 0, 1, 1], [], []>} : vector<32x64xbf16>, vector<64x32xbf16>, vector<32x32xf32> -> vector<32x32xf32>
    %497 = arith.addf %496, %10 : vector<32x32xf32>
    %cst_288 = arith.constant 0.000000e+00 : f32
    %498 = vector.broadcast %cst_288 : f32 to vector<32x32xf32>
    %499 = arith.maximumf %497, %498 : vector<32x32xf32>
    %500 = tpu.concatenate %451, %457, %469, %475 in 1 : vector<32x32xf32>, vector<32x32xf32>, vector<32x32xf32>, vector<32x32xf32> -> vector<32x128xf32>
    %501 = arith.truncf %500 : vector<32x128xf32> to vector<32x128xbf16>
    %cst_289 = arith.constant dense<0.000000e+00> : vector<32x64xf32>
    %502 = tpu.matmul %501, %2, %cst_289 {dimension_numbers = #tpu.dot_dimension_numbers<[1], [0], [0], [1], [0, 0, 1, 1], [], []>} : vector<32x128xbf16>, vector<128x64xbf16>, vector<32x64xf32> -> vector<32x64xf32>
    %503 = arith.addf %502, %13 : vector<32x64xf32>
    %cst_290 = arith.constant 0.000000e+00 : f32
    %504 = vector.broadcast %cst_290 : f32 to vector<32x64xf32>
    %505 = arith.maximumf %503, %504 : vector<32x64xf32>
    %506 = tpu.concatenate %457, %463, %475, %481 in 1 : vector<32x32xf32>, vector<32x32xf32>, vector<32x32xf32>, vector<32x32xf32> -> vector<32x128xf32>
    %507 = arith.truncf %506 : vector<32x128xf32> to vector<32x128xbf16>
    %cst_291 = arith.constant dense<0.000000e+00> : vector<32x64xf32>
    %508 = tpu.matmul %507, %2, %cst_291 {dimension_numbers = #tpu.dot_dimension_numbers<[1], [0], [0], [1], [0, 0, 1, 1], [], []>} : vector<32x128xbf16>, vector<128x64xbf16>, vector<32x64xf32> -> vector<32x64xf32>
    %509 = arith.addf %508, %13 : vector<32x64xf32>
    %cst_292 = arith.constant 0.000000e+00 : f32
    %510 = vector.broadcast %cst_292 : f32 to vector<32x64xf32>
    %511 = arith.maximumf %509, %510 : vector<32x64xf32>
    %512 = tpu.concatenate %469, %475, %487, %493 in 1 : vector<32x32xf32>, vector<32x32xf32>, vector<32x32xf32>, vector<32x32xf32> -> vector<32x128xf32>
    %513 = arith.truncf %512 : vector<32x128xf32> to vector<32x128xbf16>
    %cst_293 = arith.constant dense<0.000000e+00> : vector<32x64xf32>
    %514 = tpu.matmul %513, %2, %cst_293 {dimension_numbers = #tpu.dot_dimension_numbers<[1], [0], [0], [1], [0, 0, 1, 1], [], []>} : vector<32x128xbf16>, vector<128x64xbf16>, vector<32x64xf32> -> vector<32x64xf32>
    %515 = arith.addf %514, %13 : vector<32x64xf32>
    %cst_294 = arith.constant 0.000000e+00 : f32
    %516 = vector.broadcast %cst_294 : f32 to vector<32x64xf32>
    %517 = arith.maximumf %515, %516 : vector<32x64xf32>
    %518 = tpu.concatenate %475, %481, %493, %499 in 1 : vector<32x32xf32>, vector<32x32xf32>, vector<32x32xf32>, vector<32x32xf32> -> vector<32x128xf32>
    %519 = arith.truncf %518 : vector<32x128xf32> to vector<32x128xbf16>
    %cst_295 = arith.constant dense<0.000000e+00> : vector<32x64xf32>
    %520 = tpu.matmul %519, %2, %cst_295 {dimension_numbers = #tpu.dot_dimension_numbers<[1], [0], [0], [1], [0, 0, 1, 1], [], []>} : vector<32x128xbf16>, vector<128x64xbf16>, vector<32x64xf32> -> vector<32x64xf32>
    %521 = arith.addf %520, %13 : vector<32x64xf32>
    %cst_296 = arith.constant 0.000000e+00 : f32
    %522 = vector.broadcast %cst_296 : f32 to vector<32x64xf32>
    %523 = arith.maximumf %521, %522 : vector<32x64xf32>
    %524 = tpu.concatenate %505, %511, %517, %523 in 1 : vector<32x64xf32>, vector<32x64xf32>, vector<32x64xf32>, vector<32x64xf32> -> vector<32x256xf32>
    %525 = arith.truncf %524 : vector<32x256xf32> to vector<32x256xbf16>
    %cst_297 = arith.constant dense<0.000000e+00> : vector<32x128xf32>
    %526 = tpu.matmul %525, %3, %cst_297 {dimension_numbers = #tpu.dot_dimension_numbers<[1], [0], [0], [1], [0, 0, 1, 1], [], []>} : vector<32x256xbf16>, vector<256x128xbf16>, vector<32x128xf32> -> vector<32x128xf32>
    %c0_298 = arith.constant 0 : index
    %c0_299 = arith.constant 0 : index
    %527 = vector.load %arg9[%c0_298, %c0_299] : memref<1x128xf32, #tpu.memory_space<vmem>>, vector<1x128xf32>
    %528 = vector.broadcast %527 : vector<1x128xf32> to vector<32x128xf32>
    %529 = arith.addf %526, %528 : vector<32x128xf32>
    %cst_300 = arith.constant 0.000000e+00 : f32
    %530 = vector.broadcast %cst_300 : f32 to vector<32x128xf32>
    %531 = arith.maximumf %529, %530 : vector<32x128xf32>
    %532 = arith.truncf %531 : vector<32x128xf32> to vector<32x128xbf16>
    %cst_301 = arith.constant dense<0.000000e+00> : vector<32x128xf32>
    %533 = tpu.matmul %532, %4, %cst_301 {dimension_numbers = #tpu.dot_dimension_numbers<[1], [0], [0], [1], [0, 0, 1, 1], [], []>} : vector<32x128xbf16>, vector<128x128xbf16>, vector<32x128xf32> -> vector<32x128xf32>
    %c0_302 = arith.constant 0 : index
    %c0_303 = arith.constant 0 : index
    %534 = vector.load %arg11[%c0_302, %c0_303] : memref<1x128xf32, #tpu.memory_space<vmem>>, vector<1x128xf32>
    %535 = vector.broadcast %534 : vector<1x128xf32> to vector<32x128xf32>
    %536 = arith.addf %533, %535 : vector<32x128xf32>
    %c0_304 = arith.constant 0 : index
    %c0_305 = arith.constant 0 : index
    %537 = vector.load %arg12[%c0_304, %c0_305] : memref<32x128xf32, #tpu.memory_space<vmem>>, vector<32x128xf32>
    tpu.vector_store %arg12[%c0_304, %c0_305], %536 {strides = array<i32>} : memref<32x128xf32, #tpu.memory_space<vmem>>, vector<32x128xf32>,
    return
  }
  func.func @transform_0(%arg0: i32) -> (i32, i32, i32) {
    %c0_i32 = arith.constant 0 : i32
    %c0_i32_0 = arith.constant 0 : i32
    %c0_i32_1 = arith.constant 0 : i32
    return %c0_i32, %arg0, %c0_i32_0 : i32, i32, i32
  }
  func.func @transform_1(%arg0: i32) -> (i32, i32) {
    %c0_i32 = arith.constant 0 : i32
    %c0_i32_0 = arith.constant 0 : i32
    %c0_i32_1 = arith.constant 0 : i32
    return %c0_i32, %c0_i32_0 : i32, i32
  }
  func.func @transform_2(%arg0: i32) -> (i32, i32) {
    %c0_i32 = arith.constant 0 : i32
    %c0_i32_0 = arith.constant 0 : i32
    %c0_i32_1 = arith.constant 0 : i32
    return %c0_i32, %c0_i32_0 : i32, i32
  }
  func.func @transform_3(%arg0: i32) -> (i32, i32) {
    %c0_i32 = arith.constant 0 : i32
    %c0_i32_0 = arith.constant 0 : i32
    %c0_i32_1 = arith.constant 0 : i32
    return %c0_i32, %c0_i32_0 : i32, i32
  }
  func.func @transform_4(%arg0: i32) -> (i32, i32) {
    %c0_i32 = arith.constant 0 : i32
    %c0_i32_0 = arith.constant 0 : i32
    %c0_i32_1 = arith.constant 0 : i32
    return %c0_i32, %c0_i32_0 : i32, i32
  }
  func.func @transform_5(%arg0: i32) -> (i32, i32) {
    %c0_i32 = arith.constant 0 : i32
    %c0_i32_0 = arith.constant 0 : i32
    %c0_i32_1 = arith.constant 0 : i32
    return %c0_i32, %c0_i32_0 : i32, i32
  }
  func.func @transform_6(%arg0: i32) -> (i32, i32) {
    %c0_i32 = arith.constant 0 : i32
    %c0_i32_0 = arith.constant 0 : i32
    %c0_i32_1 = arith.constant 0 : i32
    return %c0_i32, %c0_i32_0 : i32, i32
  }
  func.func @transform_7(%arg0: i32) -> (i32, i32) {
    %c0_i32 = arith.constant 0 : i32
    %c0_i32_0 = arith.constant 0 : i32
    %c0_i32_1 = arith.constant 0 : i32
    return %c0_i32, %c0_i32_0 : i32, i32
  }
  func.func @transform_8(%arg0: i32) -> (i32, i32) {
    %c0_i32 = arith.constant 0 : i32
    %c0_i32_0 = arith.constant 0 : i32
    %c0_i32_1 = arith.constant 0 : i32
    return %c0_i32, %c0_i32_0 : i32, i32
  }
  func.func @transform_9(%arg0: i32) -> (i32, i32) {
    %c0_i32 = arith.constant 0 : i32
    %c0_i32_0 = arith.constant 0 : i32
    %c0_i32_1 = arith.constant 0 : i32
    return %c0_i32, %c0_i32_0 : i32, i32
  }
  func.func @transform_10(%arg0: i32) -> (i32, i32) {
    %c0_i32 = arith.constant 0 : i32
    %c0_i32_0 = arith.constant 0 : i32
    %c0_i32_1 = arith.constant 0 : i32
    return %c0_i32, %c0_i32_0 : i32, i32
  }
  func.func @transform_11(%arg0: i32) -> (i32, i32) {
    %c0_i32 = arith.constant 0 : i32
    %c0_i32_0 = arith.constant 0 : i32
    return %arg0, %c0_i32 : i32, i32
  }
}

</mosaic_0001>

<bundles_post_ra>
// kernel: convnet_forward.1
= control target key start
LH: loop header
LB: loop body
LE: loop exit
PB: predicated region body
PF: predicated region fallthrough
CT: control target
= control target key end

     0   :  { %s8884_s17 = smov 0   ;;  %s8886_s18 = smov 0   ;;  %s10891_s0 = inlined_call_operand.vmem [shape: bf16[64,64,12], index: 0, kind: input, shape index: {}]   ;;  %s10892_s1 = inlined_call_operand.vmem [shape: bf16[12,16], index: 1, kind: input, shape index: {}]   ;;  %s10893_s2 = inlined_call_operand.vmem [shape: f32[1,16], index: 2, kind: input, shape index: {}]   ;;  %s10894_s3 = inlined_call_operand.vmem [shape: bf16[64,32], index: 3, kind: input, shape index: {}]   ;;  %s10895_s4 = inlined_call_operand.vmem [shape: f32[1,32], index: 4, kind: input, shape index: {}]   ;;  %s10896_s5 = inlined_call_operand.vmem [shape: bf16[128,64], index: 5, kind: input, shape index: {}]   ;;  %s10897_s6 = inlined_call_operand.vmem [shape: f32[1,64], index: 6, kind: input, shape index: {}]   ;;  %s10898_s7 = inlined_call_operand.vmem [shape: bf16[256,128], index: 7, kind: input, shape index: {}]   ;;  %s10899_s8 = inlined_call_operand.vmem [shape: f32[1,128], index: 8, kind: input, shape index: {}]   ;;  %s10900_s9 = inlined_call_operand.vmem [shape: bf16[128,128], index: 9, kind: input, shape index: {}]   ;;  %s10901_s10 = inlined_call_operand.vmem [shape: f32[1,128], index: 10, kind: input, shape index: {}]   ;;  %s10902_s11 = inlined_call_operand.vmem [shape: f32[64,128], index: 11, kind: output, shape index: {}]  }
   0x1   :  { %s8888_s19 = smov 0  }
   0x2 LB: > { %s7112_s20 = sadd.s32 4294967295, %s8817_s19   ;;  %s8901_s21 = sadd.s32 1, %s8817_s19   ;;  %s8817_s19 = sphi %s8888_s19, %s10954_s19   ;;  %s8813_s18 = sphi %s8886_s18, %s10953_s18   ;;  %s8809_s17 = sphi %s8884_s17, %s10952_s17  }
   0x3   : > { %s25_s22 = ssub.s32 %s8817_s19, %s8901_s21  ;;  %s28_s23 = sadd.s32 1, %s8813_s18 }
   0x4   : > { %p26_p0 = scmp.eq.s32.totalorder %s25_s22, 0  ;;  %p35_p1 = scmp.ne.s32.totalorder %s8813_s18, %s8809_s17 }
   0x5   : > { %p36_p2 = scmp.eq.s32.totalorder %s8817_s19, 0  ;;  %p7115_p4 = scmp.ge.s32.totalorder %s8817_s19, 2 }
   0x6   : > { %s8910_s24 = scalar_select %p26_p0, %s8813_s18, %s28_s23  }
   0x7   : > { %p37_p3 = por %p36_p2, %p35_p1  ;;  %327 = sbr.rel (%p7115_p4) target bundleno = 144 (0x90), region = 56 }
   0xc   : > { %330 = sbr.rel (!%p37_p3) target bundleno = 144 (0x90), region = 60  ;;  %s332_s25 = sand.u32 (%p37_p3), 1, %s8813_s18  }
   0xd   : > { %s8183_s26 = sshll.u32 (%p37_p3), %s8817_s19, 4  ;;  %s7116_s27 = sshll.u32 (%p37_p3), %s332_s25, 10 }
   0xe   : > { %s8918_s30 = scalar_lea.vmem (%p37_p3), %s10891_s0, %s8183_s26  ;;  %s8923_s12 = scalar_lea.vmem (%p37_p3), [#allocation2], %s7116_s27 }
   0xf   : > { %v354_v0 = vld [vmem:[%s8918_s30] sm:$0xff] (%p37_p3)   ;;  %v358_v1 = vld [vmem:[%s8918_s30 + $0x8] sm:$0xff] (%p37_p3)  }
  0x10   : > { %v362_v2 = vld [vmem:[%s8918_s30 + $0x20] sm:$0xff] (%p37_p3)   ;;  %355 = vst [vmem:[%s8923_s12] sm:$0xff] (%p37_p3), %v354_v0   ;;  %v366_v3 = vld [vmem:[%s8918_s30 + $0x28] sm:$0xff] (%p37_p3)  }
  0x11   : > { %359 = vst [vmem:[%s8923_s12 + $0x8] sm:$0xff] %v358_v1   ;;  %v370_v4 = vld [vmem:[%s8918_s30 + $0x40] sm:$0xff]   ;;  %v374_v5 = vld [vmem:[%s8918_s30 + $0x48] sm:$0xff]  }
  0x12   : > { %363 = vst [vmem:[%s8923_s12 + $0x10] sm:$0xff] %v362_v2   ;;  %v378_v6 = vld [vmem:[%s8918_s30 + $0x60] sm:$0xff]   ;;  %v382_v7 = vld [vmem:[%s8918_s30 + $0x68] sm:$0xff]  }
  0x13   : > { %367 = vst [vmem:[%s8923_s12 + $0x18] sm:$0xff] %v366_v3   ;;  %v386_v8 = vld [vmem:[%s8918_s30 + $0x80] sm:$0xff]   ;;  %v390_v9 = vld [vmem:[%s8918_s30 + $0x88] sm:$0xff]  }
  0x14   : > { %371 = vst [vmem:[%s8923_s12 + $0x20] sm:$0xff] %v370_v4   ;;  %v394_v10 = vld [vmem:[%s8918_s30 + $0xa0] sm:$0xff]   ;;  %v398_v11 = vld [vmem:[%s8918_s30 + $0xa8] sm:$0xff]  }
  0x15   : > { %375 = vst [vmem:[%s8923_s12 + $0x28] sm:$0xff] %v374_v5   ;;  %v402_v12 = vld [vmem:[%s8918_s30 + $0xc0] sm:$0xff]   ;;  %v406_v13 = vld [vmem:[%s8918_s30 + $0xc8] sm:$0xff]  }
  0x16   : > { %379 = vst [vmem:[%s8923_s12 + $0x30] sm:$0xff] %v378_v6   ;;  %v410_v14 = vld [vmem:[%s8918_s30 + $0xe0] sm:$0xff]   ;;  %v414_v15 = vld [vmem:[%s8918_s30 + $0xe8] sm:$0xff]  }
  0x17   : > { %383 = vst [vmem:[%s8923_s12 + $0x38] sm:$0xff] %v382_v7   ;;  %v418_v16 = vld [vmem:[%s8918_s30 + $0x100] sm:$0xff]   ;;  %v422_v17 = vld [vmem:[%s8918_s30 + $0x108] sm:$0xff]  }
  0x18   : > { %387 = vst [vmem:[%s8923_s12 + $0x40] sm:$0xff] %v386_v8   ;;  %v426_v18 = vld [vmem:[%s8918_s30 + $0x120] sm:$0xff]   ;;  %v430_v19 = vld [vmem:[%s8918_s30 + $0x128] sm:$0xff]  }
  0x19   : > { %391 = vst [vmem:[%s8923_s12 + $0x48] sm:$0xff] %v390_v9   ;;  %v434_v20 = vld [vmem:[%s8918_s30 + $0x140] sm:$0xff]   ;;  %v438_v21 = vld [vmem:[%s8918_s30 + $0x148] sm:$0xff]  }
  0x1a   : > { %395 = vst [vmem:[%s8923_s12 + $0x50] sm:$0xff] %v394_v10   ;;  %v442_v22 = vld [vmem:[%s8918_s30 + $0x160] sm:$0xff]   ;;  %v446_v23 = vld [vmem:[%s8918_s30 + $0x168] sm:$0xff]  }
  0x1b   : > { %399 = vst [vmem:[%s8923_s12 + $0x58] sm:$0xff] %v398_v11   ;;  %v450_v24 = vld [vmem:[%s8918_s30 + $0x180] sm:$0xff]   ;;  %v454_v25 = vld [vmem:[%s8918_s30 + $0x188] sm:$0xff]  }
  0x1c   : > { %403 = vst [vmem:[%s8923_s12 + $0x60] sm:$0xff] %v402_v12   ;;  %v458_v26 = vld [vmem:[%s8918_s30 + $0x1a0] sm:$0xff]   ;;  %v462_v27 = vld [vmem:[%s8918_s30 + $0x1a8] sm:$0xff]  }
  0x1d   : > { %407 = vst [vmem:[%s8923_s12 + $0x68] sm:$0xff] %v406_v13   ;;  %v466_v28 = vld [vmem:[%s8918_s30 + $0x1c0] sm:$0xff]   ;;  %v470_v29 = vld [vmem:[%s8918_s30 + $0x1c8] sm:$0xff]  }
  0x1e   : > { %411 = vst [vmem:[%s8923_s12 + $0x70] sm:$0xff] %v410_v14   ;;  %v474_v30 = vld [vmem:[%s8918_s30 + $0x1e0] sm:$0xff]   ;;  %v478_v31 = vld [vmem:[%s8918_s30 + $0x1e8] sm:$0xff]  }
  0x1f   : > { %415 = vst [vmem:[%s8923_s12 + $0x78] sm:$0xff] %v414_v15   ;;  %v482_v32 = vld [vmem:[%s8918_s30 + $0x200] sm:$0xff]   ;;  %v486_v33 = vld [vmem:[%s8918_s30 + $0x208] sm:$0xff]  }
  0x20   : > { %419 = vst [vmem:[%s8923_s12 + $0x80] sm:$0xff] %v418_v16   ;;  %v490_v34 = vld [vmem:[%s8918_s30 + $0x220] sm:$0xff]   ;;  %v494_v35 = vld [vmem:[%s8918_s30 + $0x228] sm:$0xff]  }
  0x21   : > { %423 = vst [vmem:[%s8923_s12 + $0x88] sm:$0xff] %v422_v17   ;;  %v498_v36 = vld [vmem:[%s8918_s30 + $0x240] sm:$0xff]   ;;  %v502_v37 = vld [vmem:[%s8918_s30 + $0x248] sm:$0xff]  }
  0x22   : > { %427 = vst [vmem:[%s8923_s12 + $0x90] sm:$0xff] %v426_v18   ;;  %v506_v38 = vld [vmem:[%s8918_s30 + $0x260] sm:$0xff]   ;;  %v510_v39 = vld [vmem:[%s8918_s30 + $0x268] sm:$0xff]  }
  0x23   : > { %431 = vst [vmem:[%s8923_s12 + $0x98] sm:$0xff] %v430_v19   ;;  %v514_v40 = vld [vmem:[%s8918_s30 + $0x280] sm:$0xff]   ;;  %v518_v41 = vld [vmem:[%s8918_s30 + $0x288] sm:$0xff]  }
  0x24   : > { %435 = vst [vmem:[%s8923_s12 + $0xa0] sm:$0xff] %v434_v20   ;;  %v522_v42 = vld [vmem:[%s8918_s30 + $0x2a0] sm:$0xff]   ;;  %v526_v43 = vld [vmem:[%s8918_s30 + $0x2a8] sm:$0xff]  }
  0x25   : > { %439 = vst [vmem:[%s8923_s12 + $0xa8] sm:$0xff] %v438_v21   ;;  %v530_v44 = vld [vmem:[%s8918_s30 + $0x2c0] sm:$0xff]   ;;  %v534_v45 = vld [vmem:[%s8918_s30 + $0x2c8] sm:$0xff]  }
  0x26   : > { %443 = vst [vmem:[%s8923_s12 + $0xb0] sm:$0xff] %v442_v22   ;;  %v538_v46 = vld [vmem:[%s8918_s30 + $0x2e0] sm:$0xff]   ;;  %v542_v47 = vld [vmem:[%s8918_s30 + $0x2e8] sm:$0xff]  }
  0x27   : > { %447 = vst [vmem:[%s8923_s12 + $0xb8] sm:$0xff] %v446_v23   ;;  %v546_v48 = vld [vmem:[%s8918_s30 + $0x300] sm:$0xff]   ;;  %v550_v49 = vld [vmem:[%s8918_s30 + $0x308] sm:$0xff]  }
  0x28   : > { %451 = vst [vmem:[%s8923_s12 + $0xc0] sm:$0xff] %v450_v24   ;;  %v554_v50 = vld [vmem:[%s8918_s30 + $0x320] sm:$0xff]   ;;  %v558_v51 = vld [vmem:[%s8918_s30 + $0x328] sm:$0xff]  }
  0x29   : > { %455 = vst [vmem:[%s8923_s12 + $0xc8] sm:$0xff] %v454_v25   ;;  %v562_v52 = vld [vmem:[%s8918_s30 + $0x340] sm:$0xff]   ;;  %v566_v53 = vld [vmem:[%s8918_s30 + $0x348] sm:$0xff]  }
  0x2a   : > { %459 = vst [vmem:[%s8923_s12 + $0xd0] sm:$0xff] %v458_v26   ;;  %v570_v54 = vld [vmem:[%s8918_s30 + $0x360] sm:$0xff]   ;;  %v574_v55 = vld [vmem:[%s8918_s30 + $0x368] sm:$0xff]  }
  0x2b   : > { %463 = vst [vmem:[%s8923_s12 + $0xd8] sm:$0xff] %v462_v27   ;;  %v578_v56 = vld [vmem:[%s8918_s30 + $0x380] sm:$0xff]   ;;  %v582_v57 = vld [vmem:[%s8918_s30 + $0x388] sm:$0xff]  }
  0x2c   : > { %467 = vst [vmem:[%s8923_s12 + $0xe0] sm:$0xff] %v466_v28   ;;  %v586_v58 = vld [vmem:[%s8918_s30 + $0x3a0] sm:$0xff]   ;;  %v590_v59 = vld [vmem:[%s8918_s30 + $0x3a8] sm:$0xff]  }
  0x2d   : > { %471 = vst [vmem:[%s8923_s12 + $0xe8] sm:$0xff] %v470_v29   ;;  %v594_v60 = vld [vmem:[%s8918_s30 + $0x3c0] sm:$0xff]   ;;  %v598_v61 = vld [vmem:[%s8918_s30 + $0x3c8] sm:$0xff]  }
  0x2e   : > { %475 = vst [vmem:[%s8923_s12 + $0xf0] sm:$0xff] %v474_v30   ;;  %v602_v62 = vld [vmem:[%s8918_s30 + $0x3e0] sm:$0xff]   ;;  %v606_v63 = vld [vmem:[%s8918_s30 + $0x3e8] sm:$0xff]  }
  0x2f   : > { %479 = vst [vmem:[%s8923_s12 + $0xf8] sm:$0xff] %v478_v31   ;;  %v610_v0 = vld [vmem:[%s8918_s30 + $0x400] sm:$0xff]   ;;  %v614_v1 = vld [vmem:[%s8918_s30 + $0x408] sm:$0xff]  }
  0x30   : > { %483 = vst [vmem:[%s8923_s12 + $0x100] sm:$0xff] %v482_v32   ;;  %v618_v2 = vld [vmem:[%s8918_s30 + $0x420] sm:$0xff]   ;;  %v622_v3 = vld [vmem:[%s8918_s30 + $0x428] sm:$0xff]  }
  0x31   : > { %487 = vst [vmem:[%s8923_s12 + $0x108] sm:$0xff] %v486_v33   ;;  %v626_v4 = vld [vmem:[%s8918_s30 + $0x440] sm:$0xff]   ;;  %v630_v5 = vld [vmem:[%s8918_s30 + $0x448] sm:$0xff]  }
  0x32   : > { %491 = vst [vmem:[%s8923_s12 + $0x110] sm:$0xff] %v490_v34   ;;  %v634_v6 = vld [vmem:[%s8918_s30 + $0x460] sm:$0xff]   ;;  %v638_v7 = vld [vmem:[%s8918_s30 + $0x468] sm:$0xff]  }
  0x33   : > { %495 = vst [vmem:[%s8923_s12 + $0x118] sm:$0xff] %v494_v35   ;;  %v642_v8 = vld [vmem:[%s8918_s30 + $0x480] sm:$0xff]   ;;  %v646_v9 = vld [vmem:[%s8918_s30 + $0x488] sm:$0xff]  }
  0x34   : > { %499 = vst [vmem:[%s8923_s12 + $0x120] sm:$0xff] %v498_v36   ;;  %v650_v10 = vld [vmem:[%s8918_s30 + $0x4a0] sm:$0xff]   ;;  %v654_v11 = vld [vmem:[%s8918_s30 + $0x4a8] sm:$0xff]  }
  0x35   : > { %503 = vst [vmem:[%s8923_s12 + $0x128] sm:$0xff] %v502_v37   ;;  %v658_v12 = vld [vmem:[%s8918_s30 + $0x4c0] sm:$0xff]   ;;  %v662_v13 = vld [vmem:[%s8918_s30 + $0x4c8] sm:$0xff]  }
  0x36   : > { %507 = vst [vmem:[%s8923_s12 + $0x130] sm:$0xff] %v506_v38   ;;  %v666_v14 = vld [vmem:[%s8918_s30 + $0x4e0] sm:$0xff]   ;;  %v670_v15 = vld [vmem:[%s8918_s30 + $0x4e8] sm:$0xff]  }
  0x37   : > { %511 = vst [vmem:[%s8923_s12 + $0x138] sm:$0xff] %v510_v39   ;;  %v674_v16 = vld [vmem:[%s8918_s30 + $0x500] sm:$0xff]   ;;  %v678_v17 = vld [vmem:[%s8918_s30 + $0x508] sm:$0xff]  }
  0x38   : > { %515 = vst [vmem:[%s8923_s12 + $0x140] sm:$0xff] %v514_v40   ;;  %v682_v18 = vld [vmem:[%s8918_s30 + $0x520] sm:$0xff]   ;;  %v686_v19 = vld [vmem:[%s8918_s30 + $0x528] sm:$0xff]  }
  0x39   : > { %519 = vst [vmem:[%s8923_s12 + $0x148] sm:$0xff] %v518_v41   ;;  %v690_v20 = vld [vmem:[%s8918_s30 + $0x540] sm:$0xff]   ;;  %v694_v21 = vld [vmem:[%s8918_s30 + $0x548] sm:$0xff]  }
  0x3a   : > { %523 = vst [vmem:[%s8923_s12 + $0x150] sm:$0xff] %v522_v42   ;;  %v698_v22 = vld [vmem:[%s8918_s30 + $0x560] sm:$0xff]   ;;  %v702_v23 = vld [vmem:[%s8918_s30 + $0x568] sm:$0xff]  }
  0x3b   : > { %527 = vst [vmem:[%s8923_s12 + $0x158] sm:$0xff] %v526_v43   ;;  %v706_v24 = vld [vmem:[%s8918_s30 + $0x580] sm:$0xff]   ;;  %v710_v25 = vld [vmem:[%s8918_s30 + $0x588] sm:$0xff]  }
  0x3c   : > { %531 = vst [vmem:[%s8923_s12 + $0x160] sm:$0xff] %v530_v44   ;;  %v714_v26 = vld [vmem:[%s8918_s30 + $0x5a0] sm:$0xff]   ;;  %v718_v27 = vld [vmem:[%s8918_s30 + $0x5a8] sm:$0xff]  }
  0x3d   : > { %535 = vst [vmem:[%s8923_s12 + $0x168] sm:$0xff] %v534_v45   ;;  %v722_v28 = vld [vmem:[%s8918_s30 + $0x5c0] sm:$0xff]   ;;  %v726_v29 = vld [vmem:[%s8918_s30 + $0x5c8] sm:$0xff]  }
  0x3e   : > { %539 = vst [vmem:[%s8923_s12 + $0x170] sm:$0xff] %v538_v46   ;;  %v730_v30 = vld [vmem:[%s8918_s30 + $0x5e0] sm:$0xff]   ;;  %v734_v31 = vld [vmem:[%s8918_s30 + $0x5e8] sm:$0xff]  }
  0x3f   : > { %543 = vst [vmem:[%s8923_s12 + $0x178] sm:$0xff] %v542_v47   ;;  %v738_v32 = vld [vmem:[%s8918_s30 + $0x600] sm:$0xff]   ;;  %v742_v33 = vld [vmem:[%s8918_s30 + $0x608] sm:$0xff]  }
  0x40   : > { %547 = vst [vmem:[%s8923_s12 + $0x180] sm:$0xff] %v546_v48   ;;  %v746_v34 = vld [vmem:[%s8918_s30 + $0x620] sm:$0xff]   ;;  %v750_v35 = vld [vmem:[%s8918_s30 + $0x628] sm:$0xff]  }
  0x41   : > { %551 = vst [vmem:[%s8923_s12 + $0x188] sm:$0xff] %v550_v49   ;;  %v754_v36 = vld [vmem:[%s8918_s30 + $0x640] sm:$0xff]   ;;  %v758_v37 = vld [vmem:[%s8918_s30 + $0x648] sm:$0xff]  }
  0x42   : > { %555 = vst [vmem:[%s8923_s12 + $0x190] sm:$0xff] %v554_v50   ;;  %v762_v38 = vld [vmem:[%s8918_s30 + $0x660] sm:$0xff]   ;;  %v766_v39 = vld [vmem:[%s8918_s30 + $0x668] sm:$0xff]  }
  0x43   : > { %559 = vst [vmem:[%s8923_s12 + $0x198] sm:$0xff] %v558_v51   ;;  %v770_v40 = vld [vmem:[%s8918_s30 + $0x680] sm:$0xff]   ;;  %v774_v41 = vld [vmem:[%s8918_s30 + $0x688] sm:$0xff]  }
  0x44   : > { %563 = vst [vmem:[%s8923_s12 + $0x1a0] sm:$0xff] %v562_v52   ;;  %v778_v42 = vld [vmem:[%s8918_s30 + $0x6a0] sm:$0xff]   ;;  %v782_v43 = vld [vmem:[%s8918_s30 + $0x6a8] sm:$0xff]  }
  0x45   : > { %567 = vst [vmem:[%s8923_s12 + $0x1a8] sm:$0xff] %v566_v53   ;;  %v786_v44 = vld [vmem:[%s8918_s30 + $0x6c0] sm:$0xff]   ;;  %v790_v45 = vld [vmem:[%s8918_s30 + $0x6c8] sm:$0xff]  }
  0x46   : > { %571 = vst [vmem:[%s8923_s12 + $0x1b0] sm:$0xff] %v570_v54   ;;  %v794_v46 = vld [vmem:[%s8918_s30 + $0x6e0] sm:$0xff]   ;;  %v798_v47 = vld [vmem:[%s8918_s30 + $0x6e8] sm:$0xff]  }
  0x47   : > { %575 = vst [vmem:[%s8923_s12 + $0x1b8] sm:$0xff] %v574_v55   ;;  %v802_v48 = vld [vmem:[%s8918_s30 + $0x700] sm:$0xff]   ;;  %v806_v49 = vld [vmem:[%s8918_s30 + $0x708] sm:$0xff]  }
  0x48   : > { %579 = vst [vmem:[%s8923_s12 + $0x1c0] sm:$0xff] %v578_v56   ;;  %v810_v50 = vld [vmem:[%s8918_s30 + $0x720] sm:$0xff]   ;;  %v814_v51 = vld [vmem:[%s8918_s30 + $0x728] sm:$0xff]  }
  0x49   : > { %583 = vst [vmem:[%s8923_s12 + $0x1c8] sm:$0xff] %v582_v57   ;;  %v818_v52 = vld [vmem:[%s8918_s30 + $0x740] sm:$0xff]   ;;  %v822_v53 = vld [vmem:[%s8918_s30 + $0x748] sm:$0xff]  }
  0x4a   : > { %587 = vst [vmem:[%s8923_s12 + $0x1d0] sm:$0xff] %v586_v58   ;;  %v826_v54 = vld [vmem:[%s8918_s30 + $0x760] sm:$0xff]   ;;  %v830_v55 = vld [vmem:[%s8918_s30 + $0x768] sm:$0xff]  }
  0x4b   : > { %591 = vst [vmem:[%s8923_s12 + $0x1d8] sm:$0xff] %v590_v59   ;;  %v834_v56 = vld [vmem:[%s8918_s30 + $0x780] sm:$0xff]   ;;  %v838_v57 = vld [vmem:[%s8918_s30 + $0x788] sm:$0xff]  }
  0x4c   : > { %595 = vst [vmem:[%s8923_s12 + $0x1e0] sm:$0xff] %v594_v60   ;;  %v842_v58 = vld [vmem:[%s8918_s30 + $0x7a0] sm:$0xff]   ;;  %v846_v59 = vld [vmem:[%s8918_s30 + $0x7a8] sm:$0xff]  }
  0x4d   : > { %599 = vst [vmem:[%s8923_s12 + $0x1e8] sm:$0xff] %v598_v61   ;;  %v850_v60 = vld [vmem:[%s8918_s30 + $0x7c0] sm:$0xff]   ;;  %v854_v61 = vld [vmem:[%s8918_s30 + $0x7c8] sm:$0xff]  }
  0x4e   : > { %603 = vst [vmem:[%s8923_s12 + $0x1f0] sm:$0xff] %v602_v62   ;;  %v858_v62 = vld [vmem:[%s8918_s30 + $0x7e0] sm:$0xff]  }
  0x4f   : > { %607 = vst [vmem:[%s8923_s12 + $0x1f8] sm:$0xff] %v606_v63   ;;  %v862_v63 = vld [vmem:[%s8918_s30 + $0x7e8] sm:$0xff]  }
  0x50   : > { %611 = vst [vmem:[%s8923_s12 + $0x200] sm:$0xff] %v610_v0  }
  0x51   : > { %615 = vst [vmem:[%s8923_s12 + $0x208] sm:$0xff] %v614_v1  }
  0x52   : > { %619 = vst [vmem:[%s8923_s12 + $0x210] sm:$0xff] %v618_v2  }
  0x53   : > { %623 = vst [vmem:[%s8923_s12 + $0x218] sm:$0xff] %v622_v3  }
  0x54   : > { %627 = vst [vmem:[%s8923_s12 + $0x220] sm:$0xff] %v626_v4  }
  0x55   : > { %631 = vst [vmem:[%s8923_s12 + $0x228] sm:$0xff] %v630_v5  }
  0x56   : > { %635 = vst [vmem:[%s8923_s12 + $0x230] sm:$0xff] %v634_v6  }
  0x57   : > { %639 = vst [vmem:[%s8923_s12 + $0x238] sm:$0xff] %v638_v7  }
  0x58   : > { %643 = vst [vmem:[%s8923_s12 + $0x240] sm:$0xff] %v642_v8  }
  0x59   : > { %647 = vst [vmem:[%s8923_s12 + $0x248] sm:$0xff] %v646_v9  }
  0x5a   : > { %651 = vst [vmem:[%s8923_s12 + $0x250] sm:$0xff] %v650_v10  }
  0x5b   : > { %655 = vst [vmem:[%s8923_s12 + $0x258] sm:$0xff] %v654_v11  }
  0x5c   : > { %659 = vst [vmem:[%s8923_s12 + $0x260] sm:$0xff] %v658_v12  }
  0x5d   : > { %663 = vst [vmem:[%s8923_s12 + $0x268] sm:$0xff] %v662_v13  }
  0x5e   : > { %667 = vst [vmem:[%s8923_s12 + $0x270] sm:$0xff] %v666_v14  }
  0x5f   : > { %671 = vst [vmem:[%s8923_s12 + $0x278] sm:$0xff] %v670_v15  }
  0x60   : > { %675 = vst [vmem:[%s8923_s12 + $0x280] sm:$0xff] %v674_v16  }
  0x61   : > { %679 = vst [vmem:[%s8923_s12 + $0x288] sm:$0xff] %v678_v17  }
  0x62   : > { %683 = vst [vmem:[%s8923_s12 + $0x290] sm:$0xff] %v682_v18  }
  0x63   : > { %687 = vst [vmem:[%s8923_s12 + $0x298] sm:$0xff] %v686_v19  }
  0x64   : > { %691 = vst [vmem:[%s8923_s12 + $0x2a0] sm:$0xff] %v690_v20  }
  0x65   : > { %695 = vst [vmem:[%s8923_s12 + $0x2a8] sm:$0xff] %v694_v21  }
  0x66   : > { %699 = vst [vmem:[%s8923_s12 + $0x2b0] sm:$0xff] %v698_v22  }
  0x67   : > { %703 = vst [vmem:[%s8923_s12 + $0x2b8] sm:$0xff] %v702_v23  }
  0x68   : > { %707 = vst [vmem:[%s8923_s12 + $0x2c0] sm:$0xff] %v706_v24  }
  0x69   : > { %711 = vst [vmem:[%s8923_s12 + $0x2c8] sm:$0xff] %v710_v25  }
  0x6a   : > { %715 = vst [vmem:[%s8923_s12 + $0x2d0] sm:$0xff] %v714_v26  }
  0x6b   : > { %719 = vst [vmem:[%s8923_s12 + $0x2d8] sm:$0xff] %v718_v27  }
  0x6c   : > { %723 = vst [vmem:[%s8923_s12 + $0x2e0] sm:$0xff] %v722_v28  }
  0x6d   : > { %727 = vst [vmem:[%s8923_s12 + $0x2e8] sm:$0xff] %v726_v29  }
  0x6e   : > { %731 = vst [vmem:[%s8923_s12 + $0x2f0] sm:$0xff] %v730_v30  }
  0x6f   : > { %735 = vst [vmem:[%s8923_s12 + $0x2f8] sm:$0xff] %v734_v31  }
  0x70   : > { %739 = vst [vmem:[%s8923_s12 + $0x300] sm:$0xff] %v738_v32  }
  0x71   : > { %743 = vst [vmem:[%s8923_s12 + $0x308] sm:$0xff] %v742_v33  }
  0x72   : > { %747 = vst [vmem:[%s8923_s12 + $0x310] sm:$0xff] %v746_v34  }
  0x73   : > { %751 = vst [vmem:[%s8923_s12 + $0x318] sm:$0xff] %v750_v35  }
  0x74   : > { %755 = vst [vmem:[%s8923_s12 + $0x320] sm:$0xff] %v754_v36  }
  0x75   : > { %759 = vst [vmem:[%s8923_s12 + $0x328] sm:$0xff] %v758_v37  }
  0x76   : > { %763 = vst [vmem:[%s8923_s12 + $0x330] sm:$0xff] %v762_v38  }
  0x77   : > { %767 = vst [vmem:[%s8923_s12 + $0x338] sm:$0xff] %v766_v39  }
  0x78   : > { %771 = vst [vmem:[%s8923_s12 + $0x340] sm:$0xff] %v770_v40  }
  0x79   : > { %775 = vst [vmem:[%s8923_s12 + $0x348] sm:$0xff] %v774_v41  }
  0x7a   : > { %779 = vst [vmem:[%s8923_s12 + $0x350] sm:$0xff] %v778_v42  }
  0x7b   : > { %783 = vst [vmem:[%s8923_s12 + $0x358] sm:$0xff] %v782_v43  }
  0x7c   : > { %787 = vst [vmem:[%s8923_s12 + $0x360] sm:$0xff] %v786_v44  }
  0x7d   : > { %791 = vst [vmem:[%s8923_s12 + $0x368] sm:$0xff] %v790_v45  }
  0x7e   : > { %795 = vst [vmem:[%s8923_s12 + $0x370] sm:$0xff] %v794_v46  }
  0x7f   : > { %799 = vst [vmem:[%s8923_s12 + $0x378] sm:$0xff] %v798_v47  }
  0x80   : > { %803 = vst [vmem:[%s8923_s12 + $0x380] sm:$0xff] %v802_v48  }
  0x81   : > { %807 = vst [vmem:[%s8923_s12 + $0x388] sm:$0xff] %v806_v49  }
  0x82   : > { %811 = vst [vmem:[%s8923_s12 + $0x390] sm:$0xff] %v810_v50  }
  0x83   : > { %815 = vst [vmem:[%s8923_s12 + $0x398] sm:$0xff] %v814_v51  }
  0x84   : > { %819 = vst [vmem:[%s8923_s12 + $0x3a0] sm:$0xff] %v818_v52  }
  0x85   : > { %823 = vst [vmem:[%s8923_s12 + $0x3a8] sm:$0xff] %v822_v53  }
  0x86   : > { %827 = vst [vmem:[%s8923_s12 + $0x3b0] sm:$0xff] %v826_v54  }
  0x87   : > { %831 = vst [vmem:[%s8923_s12 + $0x3b8] sm:$0xff] %v830_v55  }
  0x88   : > { %835 = vst [vmem:[%s8923_s12 + $0x3c0] sm:$0xff] %v834_v56  }
  0x89   : > { %839 = vst [vmem:[%s8923_s12 + $0x3c8] sm:$0xff] %v838_v57  }
  0x8a   : > { %843 = vst [vmem:[%s8923_s12 + $0x3d0] sm:$0xff] %v842_v58  }
  0x8b   : > { %847 = vst [vmem:[%s8923_s12 + $0x3d8] sm:$0xff] %v846_v59  }
  0x8c   : > { %851 = vst [vmem:[%s8923_s12 + $0x3e0] sm:$0xff] %v850_v60  }
  0x8d   : > { %855 = vst [vmem:[%s8923_s12 + $0x3e8] sm:$0xff] %v854_v61  }
  0x8e   : > { %859 = vst [vmem:[%s8923_s12 + $0x3f0] sm:$0xff] %v858_v62  }
  0x8f   : > { %863 = vst [vmem:[%s8923_s12 + $0x3f8] sm:$0xff] %v862_v63  }
  0x90 PF: > { %p7119_p5 = scmp.ge.s32.totalorder %s8817_s19, 1  ;;  %p2450_p6 = scmp.lt.s32.totalorder %s8817_s19, 3 }
  0x92   : > { %p2451_p7 = pnand %p7119_p5, %p2450_p6 }
  0x94   : > { %2454 = sbr.rel (%p2451_p7) target bundleno = 1714 (0x6b2), region = 112 }
  0x99   : > { %v7133_v0 = vld [vmem:[%s10892_s1] sm:$0xf]  ;;  %v8184_v1 = vld [vmem:[%s10892_s1] sm:$0x30]  ;;  %vm2616_vm0 = vcmask 1045504   ;;  %s2457_s22 = sand.u32 1, %s8809_s17  }
  0x9a   : > { %v7134_v2 = vor.u32 %v8184_v1, %v7133_v0  ;;  %s7120_s23 = sshll.u32 %s2457_s22, 10  ;;  %vm2609_vm1 = vcmask 97280   ;;  %v9282_v36 = vld [vmem:[%s10893_s2] ss:$0 sm:$0xff]  ;;  %s8819_s27 = smov 16   ;;  %vm5660_vm2 = vcmask 261120  }
  0x9b   : > { %s9189_s25 = scalar_lea.vmem [#allocation2], %s7120_s23  ;;  %s8820_s30 = smov 32   ;;  %vm5655_vm3 = vcmask 130048   ;;  %vm5665_vm4 = vcmask 392192   ;;  %vm5696_vm5 = vcmask 523264   ;;  %vm6462_vm6 = vcmask 785408  }
  0x9c   : > { %v9187_v3 = vsel %vm2616_vm0, %v7134_v2, 0  ;;  %v8221_v4 = vld [vmem:[%s9189_s25] sm:$0xff]  ;;  %v8223_v5 = vld [vmem:[%s9189_s25 + $0x10] sm:$0xff]  ;;  %v8222_v8 = vld [vmem:[%s9189_s25 + $0x8] sm:$0xff]  ;;  %s8821_s12 = smov 48   ;;  %s8823_s15 = smov 96  }
  0x9d   : > { %2627 = vmatpush.bf16.msra.mxu0 %v9187_v3  ;;  %2671 = vmatpush.bf16.msra.mxu1 %v9187_v3  ;;  %v8225_v6 = vld [vmem:[%s9189_s25 + $0x20] sm:$0xff]  ;;  %v8227_v7 = vld [vmem:[%s9189_s25 + $0x30] sm:$0xff]  ;;  %v8224_v9 = vld [vmem:[%s9189_s25 + $0x18] sm:$0xff]  ;;  %s7121_s22 = sshll.u32 %s7112_s20, 2 }
  0x9e   : > { %2715 = vmatpush.bf16.msra.mxu2 %v9187_v3  ;;  %2759 = vmatpush.bf16.msra.mxu3 %v9187_v3  ;;  %v8226_v10 = vld [vmem:[%s9189_s25 + $0x28] sm:$0xff]  ;;  %v8228_v11 = vld [vmem:[%s9189_s25 + $0x38] sm:$0xff]  ;;  %v8229_v12 = vld [vmem:[%s9189_s25 + $0x40] sm:$0xff]  ;;  %p2498_p8 = scmp.lt.s32.totalorder %s7121_s22, 7 }
  0x9f   : > { %v8231_v13 = vld [vmem:[%s9189_s25 + $0x50] sm:$0xff]  ;;  %v8233_v14 = vld [vmem:[%s9189_s25 + $0x60] sm:$0xff]  ;;  %v8230_v16 = vld [vmem:[%s9189_s25 + $0x48] sm:$0xff] }
  0xa0   : > { %7135 = vmatmul.msk.bf16.vlgmr.msra.gmra.mxu0 %vm2609_vm1, %v8221_v4  ;;  %7149 = vmatmul.msk.bf16.vlgmr.msra.gmra.mxu1 %vm2609_vm1, %v8223_v5  ;;  %v8235_v15 = vld [vmem:[%s9189_s25 + $0x70] sm:$0xff]  ;;  %v8232_v17 = vld [vmem:[%s9189_s25 + $0x58] sm:$0xff]  ;;  %v8234_v18 = vld [vmem:[%s9189_s25 + $0x68] sm:$0xff]  ;;  %s10956_s22 = smov (!%p2498_p8, %s7121_s22), 7 }
  0xa1   : > { %2803 = vmatpush.bf16.msrb.mxu0 %v9187_v3  ;;  %2847 = vmatpush.bf16.msrb.mxu1 %v9187_v3  ;;  %v8236_v19 = vld [vmem:[%s9189_s25 + $0x78] sm:$0xff]  ;;  %v8237_v20 = vld [vmem:[%s9189_s25 + $0x80] sm:$0xff]  ;;  %v8239_v21 = vld [vmem:[%s9189_s25 + $0x90] sm:$0xff] }
  0xa2   : > { %7163 = vmatmul.msk.bf16.vlgmr.msra.gmra.mxu2 %vm2609_vm1, %v8225_v6  ;;  %7177 = vmatmul.msk.bf16.vlgmr.msra.gmra.mxu3 %vm2609_vm1, %v8227_v7  ;;  %v8241_v22 = vld [vmem:[%s9189_s25 + $0xa0] sm:$0xff]  ;;  %v8243_v23 = vld [vmem:[%s9189_s25 + $0xb0] sm:$0xff]  ;;  %v8238_v24 = vld [vmem:[%s9189_s25 + $0x88] sm:$0xff] }
  0xa3   : > { %2891 = vmatpush.bf16.msrb.mxu2 %v9187_v3  ;;  %2935 = vmatpush.bf16.msrb.mxu3 %v9187_v3  ;;  %v8240_v25 = vld [vmem:[%s9189_s25 + $0x98] sm:$0xff]  ;;  %v8242_v26 = vld [vmem:[%s9189_s25 + $0xa8] sm:$0xff]  ;;  %v8245_v28 = vld [vmem:[%s9189_s25 + $0xc0] sm:$0xff] }
  0xa4   : > { %v8244_v27 = vld [vmem:[%s9189_s25 + $0xb8] sm:$0xff]  ;;  %v8247_v29 = vld [vmem:[%s9189_s25 + $0xd0] sm:$0xff]  ;;  %v8249_v30 = vld [vmem:[%s9189_s25 + $0xe0] sm:$0xff] }
  0xa5   : > { %2979 = vmatpush.bf16.msra.mxu0 %v9187_v3  ;;  %3023 = vmatpush.bf16.msra.mxu1 %v9187_v3  ;;  %v8251_v31 = vld [vmem:[%s9189_s25 + $0xf0] sm:$0xff]  ;;  %v8246_v32 = vld [vmem:[%s9189_s25 + $0xc8] sm:$0xff]  ;;  %v8248_v33 = vld [vmem:[%s9189_s25 + $0xd8] sm:$0xff] }
  0xa6   : > { %v8250_v34 = vld [vmem:[%s9189_s25 + $0xe8] sm:$0xff]  ;;  %v8252_v35 = vld [vmem:[%s9189_s25 + $0xf8] sm:$0xff]  ;;  %v8253_v37 = vld [vmem:[%s9189_s25 + $0x100] sm:$0xff] }
  0xa7   : > { %3067 = vmatpush.bf16.msra.mxu2 %v9187_v3  ;;  %3111 = vmatpush.bf16.msra.mxu3 %v9187_v3  ;;  %v8255_v38 = vld [vmem:[%s9189_s25 + $0x110] sm:$0xff]  ;;  %v8257_v41 = vld [vmem:[%s9189_s25 + $0x120] sm:$0xff]  ;;  %v8254_v0 = vld [vmem:[%s9189_s25 + $0x108] sm:$0xff] }
  0xa8   : > { %v8259_v42 = vld [vmem:[%s9189_s25 + $0x130] sm:$0xff]  ;;  %v8256_v1 = vld [vmem:[%s9189_s25 + $0x118] sm:$0xff]  ;;  %v8258_v7 = vld [vmem:[%s9189_s25 + $0x128] sm:$0xff] }
  0xb0   : > { %7136 = vmatmul.msk.bf16.gmra.mxu0 %vm2609_vm1, %v8222_v8  ;;  %7150 = vmatmul.msk.bf16.gmra.mxu1 %vm2609_vm1, %v8224_v9  ;;  %v8260_v8 = vld [vmem:[%s9189_s25 + $0x138] sm:$0xff] }
  0xb2   : > { %7164 = vmatmul.msk.bf16.gmra.mxu2 %vm2609_vm1, %v8226_v10  ;;  %7178 = vmatmul.msk.bf16.gmra.mxu3 %vm2609_vm1, %v8228_v11 }
  0xc0   : > { %7191 = vmatmul.msk.bf16.vlgmr.msrb.gmra.mxu0 %vm2609_vm1, %v8229_v12  ;;  %7205 = vmatmul.msk.bf16.vlgmr.msrb.gmra.mxu1 %vm2609_vm1, %v8231_v13 }
  0xc1   : > { %3155 = vmatpush.bf16.msrb.mxu0 %v9187_v3  ;;  %3199 = vmatpush.bf16.msrb.mxu1 %v9187_v3 }
  0xc2   : > { %7219 = vmatmul.msk.bf16.vlgmr.msrb.gmra.mxu2 %vm2609_vm1, %v8233_v14  ;;  %7233 = vmatmul.msk.bf16.vlgmr.msrb.gmra.mxu3 %vm2609_vm1, %v8235_v15 }
  0xc3   : > { %3243 = vmatpush.bf16.msrb.mxu2 %v9187_v3  ;;  %3287 = vmatpush.bf16.msrb.mxu3 %v9187_v3 }
  0xd0   : > { %7192 = vmatmul.msk.bf16.gmra.mxu0 %vm2609_vm1, %v8230_v16  ;;  %7206 = vmatmul.msk.bf16.gmra.mxu1 %vm2609_vm1, %v8232_v17 }
  0xd2   : > { %7220 = vmatmul.msk.bf16.gmra.mxu2 %vm2609_vm1, %v8234_v18  ;;  %7234 = vmatmul.msk.bf16.gmra.mxu3 %vm2609_vm1, %v8236_v19 }
  0xe0   : > { %7247 = vmatmul.msk.bf16.vlgmr.msra.gmra.mxu0 %vm2609_vm1, %v8237_v20  ;;  %7261 = vmatmul.msk.bf16.vlgmr.msra.gmra.mxu1 %vm2609_vm1, %v8239_v21 }
  0xe1   : > { %3331 = vmatpush.bf16.msra.mxu0 %v9187_v3  ;;  %3375 = vmatpush.bf16.msra.mxu1 %v9187_v3 }
  0xe2   : > { %7275 = vmatmul.msk.bf16.vlgmr.msra.gmra.mxu2 %vm2609_vm1, %v8241_v22  ;;  %7289 = vmatmul.msk.bf16.vlgmr.msra.gmra.mxu3 %vm2609_vm1, %v8243_v23 }
  0xe3   : > { %3419 = vmatpush.bf16.msra.mxu2 %v9187_v3  ;;  %3463 = vmatpush.bf16.msra.mxu3 %v9187_v3 }
  0xf0   : > { %7248 = vmatmul.msk.bf16.gmra.mxu0 %vm2609_vm1, %v8238_v24  ;;  %7262 = vmatmul.msk.bf16.gmra.mxu1 %vm2609_vm1, %v8240_v25 }
  0xf2   : > { %7276 = vmatmul.msk.bf16.gmra.mxu2 %vm2609_vm1, %v8242_v26  ;;  %7290 = vmatmul.msk.bf16.gmra.mxu3 %vm2609_vm1, %v8244_v27 }
 0x100   : > { %7303 = vmatmul.msk.bf16.vlgmr.msrb.gmra.mxu0 %vm2609_vm1, %v8245_v28  ;;  %7317 = vmatmul.msk.bf16.vlgmr.msrb.gmra.mxu1 %vm2609_vm1, %v8247_v29 }
 0x101   : > { %3507 = vmatpush.bf16.msrb.mxu0 %v9187_v3  ;;  %3551 = vmatpush.bf16.msrb.mxu1 %v9187_v3 }
 0x102   : > { %7331 = vmatmul.msk.bf16.vlgmr.msrb.gmra.mxu2 %vm2609_vm1, %v8249_v30  ;;  %7345 = vmatmul.msk.bf16.vlgmr.msrb.gmra.mxu3 %vm2609_vm1, %v8251_v31 }
 0x103   : > { %3595 = vmatpush.bf16.msrb.mxu2 %v9187_v3  ;;  %3639 = vmatpush.bf16.msrb.mxu3 %v9187_v3 }
 0x110   : > { %7304 = vmatmul.msk.bf16.gmra.mxu0 %vm2609_vm1, %v8246_v32  ;;  %7318 = vmatmul.msk.bf16.gmra.mxu1 %vm2609_vm1, %v8248_v33  ;;  %v8261_v33 = vld [vmem:[%s9189_s25 + $0x140] sm:$0xff] }
 0x112   : > { %7332 = vmatmul.msk.bf16.gmra.mxu2 %vm2609_vm1, %v8250_v34  ;;  %7346 = vmatmul.msk.bf16.gmra.mxu3 %vm2609_vm1, %v8252_v35  ;;  %v8263_v34 = vld [vmem:[%s9189_s25 + $0x150] sm:$0xff] }
 0x11d   : > { %v2629_v39 = vpop.f32.mrf.mxu0  ;;  %v2673_v40 = vpop.f32.mrf.mxu1 }
 0x11e   : > { %v2630_v43 = vadd.f32 %v9282_v36, %v2629_v39  ;;  %v2674_v44 = vadd.f32 %v9282_v36, %v2673_v40  ;;  %v8265_v40 = vld [vmem:[%s9189_s25 + $0x160] sm:$0xff] }
 0x120   : > { %v2639_v45 = vmax.f32 %v2630_v43, 0.0  ;;  %v2683_v46 = vmax.f32 %v2674_v44, 0.0  ;;  %7359 = vmatmul.msk.bf16.vlgmr.msra.gmra.mxu0 %vm2609_vm1, %v8253_v37  ;;  %7373 = vmatmul.msk.bf16.vlgmr.msra.gmra.mxu1 %vm2609_vm1, %v8255_v38 }
 0x121   : > { %3683 = vmatpush.bf16.msra.mxu0 %v9187_v3  ;;  %3727 = vmatpush.bf16.msra.mxu1 %v9187_v3 }
 0x122   : > { %7387 = vmatmul.msk.bf16.vlgmr.msra.gmra.mxu2 %vm2609_vm1, %v8257_v41  ;;  %7401 = vmatmul.msk.bf16.vlgmr.msra.gmra.mxu3 %vm2609_vm1, %v8259_v42  ;;  %v9294_v47 = vmax.f32 %v2639_v45, %v2683_v46  ;;  %v8267_v41 = vld [vmem:[%s9189_s25 + $0x170] sm:$0xff] }
 0x123   : > { %3771 = vmatpush.bf16.msra.mxu2 %v9187_v3  ;;  %3815 = vmatpush.bf16.msra.mxu3 %v9187_v3 }
 0x125   : > { %v2717_v48 = vpop.f32.mrf.mxu2  ;;  %v2761_v49 = vpop.f32.mrf.mxu3 }
 0x126   : > { %v2718_v50 = vadd.f32 %v9282_v36, %v2717_v48  ;;  %v2762_v51 = vadd.f32 %v9282_v36, %v2761_v49  ;;  %v2631_v52 = vpop.f32.mrf.mxu0  ;;  %v2675_v53 = vpop.f32.mrf.mxu1 }
 0x127   : > { %v2632_v54 = vadd.f32 %v9282_v36, %v2631_v52  ;;  %v2676_v55 = vadd.f32 %v9282_v36, %v2675_v53 }
 0x128   : > { %v2727_v56 = vmax.f32 %v2718_v50, 0.0  ;;  %v2771_v57 = vmax.f32 %v2762_v51, 0.0 }
 0x129   : > { %v2640_v58 = vmax.f32 %v2632_v54, 0.0  ;;  %v2684_v59 = vmax.f32 %v2676_v55, 0.0 }
 0x12a   : > { %v9304_v60 = vmax.f32 %v2727_v56, %v2771_v57 }
 0x12b   : > { %v9306_v61 = vmax.f32 %v2640_v58, %v2684_v59 }
 0x12d   : > { %v2719_v62 = vpop.f32.mrf.mxu2  ;;  %v2763_v63 = vpop.f32.mrf.mxu3 }
 0x12e   : > { %v2720_v2 = vadd.f32 %v9282_v36, %v2719_v62  ;;  %v2764_v4 = vadd.f32 %v9282_v36, %v2763_v63  ;;  %v2634_v5 = vpop.f32.mrf.mxu0  ;;  %v2678_v6 = vpop.f32.mrf.mxu1 }
 0x12f   : > { %v2635_v9 = vadd.f32 %v9282_v36, %v2634_v5  ;;  %v2679_v10 = vadd.f32 %v9282_v36, %v2678_v6  ;;  %v8262_v6 = vld [vmem:[%s9189_s25 + $0x148] sm:$0xff] }
 0x130   : > { %v2728_v11 = vmax.f32 %v2720_v2, 0.0  ;;  %v2772_v12 = vmax.f32 %v2764_v4, 0.0  ;;  %7360 = vmatmul.msk.bf16.gmra.mxu0 %vm2609_vm1, %v8254_v0  ;;  %7374 = vmatmul.msk.bf16.gmra.mxu1 %vm2609_vm1, %v8256_v1 }
 0x131   : > { %v2641_v13 = vmax.f32 %v2635_v9, 0.0  ;;  %v2685_v14 = vmax.f32 %v2679_v10, 0.0 }
 0x132   : > { %v9318_v15 = vmax.f32 %v2728_v11, %v2772_v12  ;;  %7388 = vmatmul.msk.bf16.gmra.mxu2 %vm2609_vm1, %v8258_v7  ;;  %7402 = vmatmul.msk.bf16.gmra.mxu3 %vm2609_vm1, %v8260_v8  ;;  %v8264_v7 = vld [vmem:[%s9189_s25 + $0x158] sm:$0xff]  ;;  %v8266_v12 = vld [vmem:[%s9189_s25 + $0x168] sm:$0xff] }
 0x133   : > { %v9322_v16 = vmax.f32 %v2641_v13, %v2685_v14  ;;  %v8268_v13 = vld [vmem:[%s9189_s25 + $0x178] sm:$0xff] }
 0x135   : > { %v2722_v17 = vpop.f32.mrf.mxu2  ;;  %v2766_v18 = vpop.f32.mrf.mxu3 }
 0x136   : > { %v2723_v19 = vadd.f32 %v9282_v36, %v2722_v17  ;;  %v2767_v20 = vadd.f32 %v9282_v36, %v2766_v18  ;;  %v2636_v21 = vpop.f32.mrf.mxu0  ;;  %v2680_v22 = vpop.f32.mrf.mxu1 }
 0x137   : > { %v2637_v23 = vadd.f32 %v9282_v36, %v2636_v21  ;;  %v2681_v24 = vadd.f32 %v9282_v36, %v2680_v22 }
 0x138   : > { %v2729_v25 = vmax.f32 %v2723_v19, 0.0  ;;  %v2773_v26 = vmax.f32 %v2767_v20, 0.0 }
 0x139   : > { %v2642_v27 = vmax.f32 %v2637_v23, 0.0  ;;  %v2686_v28 = vmax.f32 %v2681_v24, 0.0 }
 0x13a   : > { %v9328_v29 = vmax.f32 %v2729_v25, %v2773_v26 }
 0x13b   : > { %v9330_v30 = vmax.f32 %v2642_v27, %v2686_v28 }
 0x13d   : > { %v2724_v31 = vpop.f32.mrf.mxu2  ;;  %v2768_v32 = vpop.f32.mrf.mxu3 }
 0x13e   : > { %v2725_v35 = vadd.f32 %v9282_v36, %v2724_v31  ;;  %v2769_v37 = vadd.f32 %v9282_v36, %v2768_v32  ;;  %v2805_v38 = vpop.f32.mrf.mxu0  ;;  %v2849_v39 = vpop.f32.mrf.mxu1 }
 0x13f   : > { %v2806_v42 = vadd.f32 %v9282_v36, %v2805_v38  ;;  %v2850_v43 = vadd.f32 %v9282_v36, %v2849_v39 }
 0x140   : > { %v2730_v44 = vmax.f32 %v2725_v35, 0.0  ;;  %v2774_v45 = vmax.f32 %v2769_v37, 0.0  ;;  %7415 = vmatmul.msk.bf16.vlgmr.msrb.gmra.mxu0 %vm2609_vm1, %v8261_v33  ;;  %7429 = vmatmul.msk.bf16.vlgmr.msrb.gmra.mxu1 %vm2609_vm1, %v8263_v34 }
 0x141   : > { %v2815_v46 = vmax.f32 %v2806_v42, 0.0  ;;  %v2859_v48 = vmax.f32 %v2850_v43, 0.0  ;;  %3859 = vmatpush.bf16.msrb.mxu0 %v9187_v3  ;;  %3903 = vmatpush.bf16.msrb.mxu1 %v9187_v3  ;;  %v8269_v43 = vld [vmem:[%s9189_s25 + $0x180] sm:$0xff] }
 0x142   : > { %v9342_v49 = vmax.f32 %v2730_v44, %v2774_v45  ;;  %7443 = vmatmul.msk.bf16.vlgmr.msrb.gmra.mxu2 %vm2609_vm1, %v8265_v40  ;;  %7457 = vmatmul.msk.bf16.vlgmr.msrb.gmra.mxu3 %vm2609_vm1, %v8267_v41  ;;  %v8271_v44 = vld [vmem:[%s9189_s25 + $0x190] sm:$0xff] }
 0x143   : > { %v9346_v50 = vmax.f32 %v2815_v46, %v2859_v48  ;;  %3947 = vmatpush.bf16.msrb.mxu2 %v9187_v3  ;;  %3991 = vmatpush.bf16.msrb.mxu3 %v9187_v3 }
 0x145   : > { %v2893_v51 = vpop.f32.mrf.mxu2  ;;  %v2937_v52 = vpop.f32.mrf.mxu3 }
 0x146   : > { %v2894_v53 = vadd.f32 %v9282_v36, %v2893_v51  ;;  %v2938_v54 = vadd.f32 %v9282_v36, %v2937_v52  ;;  %v2807_v55 = vpop.f32.mrf.mxu0  ;;  %v2851_v56 = vpop.f32.mrf.mxu1  ;;  %v8273_v52 = vld [vmem:[%s9189_s25 + $0x1a0] sm:$0xff] }
 0x147   : > { %v2808_v57 = vadd.f32 %v9282_v36, %v2807_v55  ;;  %v2852_v58 = vadd.f32 %v9282_v36, %v2851_v56 }
 0x148   : > { %v2903_v59 = vmax.f32 %v2894_v53, 0.0  ;;  %v2947_v62 = vmax.f32 %v2938_v54, 0.0  ;;  %v8275_v53 = vld [vmem:[%s9189_s25 + $0x1b0] sm:$0xff] }
 0x149   : > { %v2816_v63 = vmax.f32 %v2808_v57, 0.0  ;;  %v2860_v0 = vmax.f32 %v2852_v58, 0.0 }
 0x14a   : > { %v9356_v1 = vmax.f32 %v2903_v59, %v2947_v62 }
 0x14b   : > { %v9358_v2 = vmax.f32 %v2816_v63, %v2860_v0 }
 0x14d   : > { %v2895_v4 = vpop.f32.mrf.mxu2  ;;  %v2939_v5 = vpop.f32.mrf.mxu3 }
 0x14e   : > { %v2896_v8 = vadd.f32 %v9282_v36, %v2895_v4  ;;  %v2940_v9 = vadd.f32 %v9282_v36, %v2939_v5  ;;  %v2810_v10 = vpop.f32.mrf.mxu0  ;;  %v2854_v11 = vpop.f32.mrf.mxu1 }
 0x14f   : > { %v2811_v14 = vadd.f32 %v9282_v36, %v2810_v10  ;;  %v2855_v17 = vadd.f32 %v9282_v36, %v2854_v11 }
 0x150   : > { %v2904_v18 = vmax.f32 %v2896_v8, 0.0  ;;  %v2948_v19 = vmax.f32 %v2940_v9, 0.0  ;;  %7416 = vmatmul.msk.bf16.gmra.mxu0 %vm2609_vm1, %v8262_v6  ;;  %7430 = vmatmul.msk.bf16.gmra.mxu1 %vm2609_vm1, %v8264_v7 }
 0x151   : > { %v2817_v20 = vmax.f32 %v2811_v14, 0.0  ;;  %v2861_v21 = vmax.f32 %v2855_v17, 0.0 }
 0x152   : > { %v9370_v22 = vmax.f32 %v2904_v18, %v2948_v19  ;;  %7444 = vmatmul.msk.bf16.gmra.mxu2 %vm2609_vm1, %v8266_v12  ;;  %7458 = vmatmul.msk.bf16.gmra.mxu3 %vm2609_vm1, %v8268_v13 }
 0x153   : > { %v9374_v23 = vmax.f32 %v2817_v20, %v2861_v21 }
 0x155   : > { %v2898_v24 = vpop.f32.mrf.mxu2  ;;  %v2942_v25 = vpop.f32.mrf.mxu3 }
 0x156   : > { %v2899_v26 = vadd.f32 %v9282_v36, %v2898_v24  ;;  %v2943_v27 = vadd.f32 %v9282_v36, %v2942_v25  ;;  %v2812_v28 = vpop.f32.mrf.mxu0  ;;  %v2856_v31 = vpop.f32.mrf.mxu1  ;;  %v8270_v24 = vld [vmem:[%s9189_s25 + $0x188] sm:$0xff]  ;;  %v8272_v25 = vld [vmem:[%s9189_s25 + $0x198] sm:$0xff] }
 0x157   : > { %v2813_v32 = vadd.f32 %v9282_v36, %v2812_v28  ;;  %v2857_v33 = vadd.f32 %v9282_v36, %v2856_v31 }
 0x158   : > { %v2905_v34 = vmax.f32 %v2899_v26, 0.0  ;;  %v2949_v35 = vmax.f32 %v2943_v27, 0.0 }
 0x159   : > { %v2818_v37 = vmax.f32 %v2813_v32, 0.0  ;;  %v2862_v38 = vmax.f32 %v2857_v33, 0.0  ;;  %v8274_v32 = vld [vmem:[%s9189_s25 + $0x1a8] sm:$0xff]  ;;  %v8276_v33 = vld [vmem:[%s9189_s25 + $0x1b8] sm:$0xff] }
 0x15a   : > { %v9380_v39 = vmax.f32 %v2905_v34, %v2949_v35 }
 0x15b   : > { %v9382_v40 = vmax.f32 %v2818_v37, %v2862_v38 }
 0x15d   : > { %v2900_v41 = vpop.f32.mrf.mxu2  ;;  %v2944_v42 = vpop.f32.mrf.mxu3 }
 0x15e   : > { %v2901_v45 = vadd.f32 %v9282_v36, %v2900_v41  ;;  %v2945_v46 = vadd.f32 %v9282_v36, %v2944_v42  ;;  %v2981_v48 = vpop.f32.mrf.mxu0  ;;  %v3025_v51 = vpop.f32.mrf.mxu1 }
 0x15f   : > { %v2982_v54 = vadd.f32 %v9282_v36, %v2981_v48  ;;  %v3026_v55 = vadd.f32 %v9282_v36, %v3025_v51 }
 0x160   : > { %v2906_v56 = vmax.f32 %v2901_v45, 0.0  ;;  %v2950_v57 = vmax.f32 %v2945_v46, 0.0  ;;  %7471 = vmatmul.msk.bf16.vlgmr.msra.gmra.mxu0 %vm2609_vm1, %v8269_v43  ;;  %7485 = vmatmul.msk.bf16.vlgmr.msra.gmra.mxu1 %vm2609_vm1, %v8271_v44 }
 0x161   : > { %v2991_v58 = vmax.f32 %v2982_v54, 0.0  ;;  %v3035_v59 = vmax.f32 %v3026_v55, 0.0  ;;  %4035 = vmatpush.bf16.msra.mxu0 %v9187_v3  ;;  %4079 = vmatpush.bf16.msra.mxu1 %v9187_v3 }
 0x162   : > { %v9394_v62 = vmax.f32 %v2906_v56, %v2950_v57  ;;  %7499 = vmatmul.msk.bf16.vlgmr.msra.gmra.mxu2 %vm2609_vm1, %v8273_v52  ;;  %7513 = vmatmul.msk.bf16.vlgmr.msra.gmra.mxu3 %vm2609_vm1, %v8275_v53 }
 0x163   : > { %v9398_v63 = vmax.f32 %v2991_v58, %v3035_v59  ;;  %4123 = vmatpush.bf16.msra.mxu2 %v9187_v3  ;;  %4167 = vmatpush.bf16.msra.mxu3 %v9187_v3 }
 0x165   : > { %v3069_v4 = vpop.f32.mrf.mxu2  ;;  %v3113_v5 = vpop.f32.mrf.mxu3 }
 0x166   : > { %v2983_v6 = vpop.f32.mrf.mxu0  ;;  %v3027_v7 = vpop.f32.mrf.mxu1  ;;  %v3070_v10 = vadd.f32 %v9282_v36, %v3069_v4  ;;  %v3114_v11 = vadd.f32 %v9282_v36, %v3113_v5 }
 0x167   : > { %v2984_v8 = vadd.f32 %v9282_v36, %v2983_v6  ;;  %v3028_v9 = vadd.f32 %v9282_v36, %v3027_v7 }
 0x168   : > { %v3079_v17 = vmax.f32 %v3070_v10, 0.0  ;;  %v3123_v18 = vmax.f32 %v3114_v11, 0.0  ;;  %v8277_v11 = vld [vmem:[%s9189_s25 + $0x1c0] sm:$0xff] }
 0x169   : > { %v2992_v12 = vmax.f32 %v2984_v8, 0.0  ;;  %v3036_v13 = vmax.f32 %v3028_v9, 0.0  ;;  %v8333_v8 = vld [vmem:[%s9189_s25 + $0x380] sm:$0xff] }
 0x16a   : > { %v5431_v37 = vmax.f32 %v3079_v17, %v3123_v18 }
 0x16b   : > { %v9410_v14 = vmax.f32 %v2992_v12, %v3036_v13  ;;  %v8279_v12 = vld [vmem:[%s9189_s25 + $0x1d0] sm:$0xff] }
 0x16c   : > { %v9429_v46 = vmax.f32 %v9304_v60, %v5431_v37 }
 0x16d   : > { %v3071_v20 = vpop.f32.mrf.mxu2  ;;  %v3115_v21 = vpop.f32.mrf.mxu3 }
 0x16e   : > { %v3072_v26 = vadd.f32 %v9282_v36, %v3071_v20  ;;  %v3116_v27 = vadd.f32 %v9282_v36, %v3115_v21  ;;  %v2986_v28 = vpop.f32.mrf.mxu0  ;;  %v3030_v31 = vpop.f32.mrf.mxu1  ;;  %v8281_v21 = vld [vmem:[%s9189_s25 + $0x1e0] sm:$0xff] }
 0x16f   : > { %v2987_v34 = vadd.f32 %v9282_v36, %v2986_v28  ;;  %v3031_v35 = vadd.f32 %v9282_v36, %v3030_v31 }
 0x170   : > { %v3080_v38 = vmax.f32 %v3072_v26, 0.0  ;;  %v3124_v41 = vmax.f32 %v3116_v27, 0.0  ;;  %7472 = vmatmul.msk.bf16.gmra.mxu0 %vm2609_vm1, %v8270_v24  ;;  %7486 = vmatmul.msk.bf16.gmra.mxu1 %vm2609_vm1, %v8272_v25  ;;  %v8283_v24 = vld [vmem:[%s9189_s25 + $0x1f0] sm:$0xff] }
 0x171   : > { %v2993_v42 = vmax.f32 %v2987_v34, 0.0  ;;  %v3037_v43 = vmax.f32 %v3031_v35, 0.0 }
 0x172   : > { %v5432_v44 = vmax.f32 %v3080_v38, %v3124_v41  ;;  %7500 = vmatmul.msk.bf16.gmra.mxu2 %vm2609_vm1, %v8274_v32  ;;  %7514 = vmatmul.msk.bf16.gmra.mxu3 %vm2609_vm1, %v8276_v33 }
 0x173   : > { %v9426_v45 = vmax.f32 %v2993_v42, %v3037_v43 }
 0x174   : > { %v9432_v48 = vmax.f32 %v9318_v15, %v5432_v44 }
 0x175   : > { %v3074_v52 = vpop.f32.mrf.mxu2  ;;  %v3118_v53 = vpop.f32.mrf.mxu3 }
 0x176   : > { %v2988_v54 = vpop.f32.mrf.mxu0  ;;  %v3032_v55 = vpop.f32.mrf.mxu1  ;;  %v8378_v56 = vpack.i.bf16 %v9432_v48, %v9429_v46  ;;  %v3075_v58 = vadd.f32 %v9282_v36, %v3074_v52  ;;  %v3119_v15 = vadd.f32 %v9282_v36, %v3118_v53 }
 0x177   : > { %v2989_v57 = vadd.f32 %v9282_v36, %v2988_v54  ;;  %v3033_v60 = vadd.f32 %v9282_v36, %v3032_v55 }
 0x178   : > { %8379 = vrot.lane.b32.xlu0 %v8378_v56, %s8819_s27  ;;  %v3081_v6 = vmax.f32 %v3075_v58, 0.0  ;;  %v3125_v7 = vmax.f32 %v3119_v15, 0.0 }
 0x179   : > { %v2994_v59 = vmax.f32 %v2989_v57, 0.0  ;;  %v3038_v4 = vmax.f32 %v3033_v60, 0.0 }
 0x17a   : > { %v5433_v25 = vmax.f32 %v3081_v6, %v3125_v7  ;;  %v8278_v6 = vld [vmem:[%s9189_s25 + $0x1c8] sm:$0xff]  ;;  %v8280_v7 = vld [vmem:[%s9189_s25 + $0x1d8] sm:$0xff] }
 0x17b   : > { %v9443_v5 = vmax.f32 %v2994_v59, %v3038_v4 }
 0x17c   : > { %v9462_v33 = vmax.f32 %v9328_v29, %v5433_v25 }
 0x17d   : > { %v3076_v9 = vpop.f32.mrf.mxu2  ;;  %v3120_v10 = vpop.f32.mrf.mxu3 }
 0x17e   : > { %v3077_v13 = vadd.f32 %v9282_v36, %v3076_v9  ;;  %v3121_v17 = vadd.f32 %v9282_v36, %v3120_v10  ;;  %v3157_v18 = vpop.f32.mrf.mxu0  ;;  %v3201_v20 = vpop.f32.mrf.mxu1 }
 0x17f   : > { %v3158_v28 = vadd.f32 %v9282_v36, %v3157_v18  ;;  %v3202_v31 = vadd.f32 %v9282_v36, %v3201_v20  ;;  %v8284_v18 = vld [vmem:[%s9189_s25 + $0x1f8] sm:$0xff] }
 0x180   : > { %v3082_v26 = vmax.f32 %v3077_v13, 0.0  ;;  %v3126_v27 = vmax.f32 %v3121_v17, 0.0  ;;  %7527 = vmatmul.msk.bf16.vlgmr.msrb.gmra.mxu0 %vm2609_vm1, %v8277_v11  ;;  %7541 = vmatmul.msk.bf16.vlgmr.msrb.gmra.mxu1 %vm2609_vm1, %v8279_v12  ;;  %v8282_v17 = vld [vmem:[%s9189_s25 + $0x1e8] sm:$0xff] }
 0x181   : > { %4211 = vmatpush.bf16.msrb.mxu0 %v9187_v3  ;;  %4255 = vmatpush.bf16.msrb.mxu1 %v9187_v3  ;;  %v3167_v35 = vmax.f32 %v3158_v28, 0.0  ;;  %v3211_v37 = vmax.f32 %v3202_v31, 0.0 }
 0x182   : > { %v5434_v32 = vmax.f32 %v3082_v26, %v3126_v27  ;;  %7555 = vmatmul.msk.bf16.vlgmr.msrb.gmra.mxu2 %vm2609_vm1, %v8281_v21  ;;  %7569 = vmatmul.msk.bf16.vlgmr.msrb.gmra.mxu3 %vm2609_vm1, %v8283_v24 }
 0x183   : > { %4299 = vmatpush.bf16.msrb.mxu2 %v9187_v3  ;;  %4343 = vmatpush.bf16.msrb.mxu3 %v9187_v3  ;;  %v5443_v54 = vmax.f32 %v3167_v35, %v3211_v37 }
 0x184   : > { %v9465_v34 = vmax.f32 %v9342_v49, %v5434_v32 }
 0x185   : > { %v3245_v38 = vpop.f32.mrf.mxu2  ;;  %v3289_v41 = vpop.f32.mrf.mxu3  ;;  %v9477_v15 = vmax.f32 %v9346_v50, %v5443_v54 }
 0x186   : > { %v3159_v42 = vpop.f32.mrf.mxu0  ;;  %v3203_v43 = vpop.f32.mrf.mxu1  ;;  %v8383_v44 = vpack.i.bf16 %v9465_v34, %v9462_v33  ;;  %v3246_v52 = vadd.f32 %v9282_v36, %v3245_v38  ;;  %v3290_v53 = vadd.f32 %v9282_v36, %v3289_v41 }
 0x187   : > { %v3160_v29 = vadd.f32 %v9282_v36, %v3159_v42  ;;  %v3204_v49 = vadd.f32 %v9282_v36, %v3203_v43 }
 0x188   : > { %8384 = vrot.lane.b32.xlu1 %v8383_v44, %s8819_s27  ;;  %v3255_v60 = vmax.f32 %v3246_v52, 0.0  ;;  %v3299_v58 = vmax.f32 %v3290_v53, 0.0 }
 0x189   : > { %v3168_v55 = vmax.f32 %v3160_v29, 0.0  ;;  %v3212_v56 = vmax.f32 %v3204_v49, 0.0 }
 0x18a   : > { %v5455_v50 = vmax.f32 %v3255_v60, %v3299_v58  ;;  %v8285_v58 = vld [vmem:[%s9189_s25 + $0x200] sm:$0xff] }
 0x18b   : > { %v5444_v57 = vmax.f32 %v3168_v55, %v3212_v56 }
 0x18c   : > { %v5459_v27 = vmax.f32 %v9356_v1, %v5455_v50 }
 0x18d   : > { %v3247_v59 = vpop.f32.mrf.mxu2  ;;  %v3291_v4 = vpop.f32.mrf.mxu3  ;;  %v9482_v9 = vmax.f32 %v9358_v2, %v5444_v57 }
 0x18e   : > { %v3248_v10 = vadd.f32 %v9282_v36, %v3247_v59  ;;  %v3292_v11 = vadd.f32 %v9282_v36, %v3291_v4  ;;  %v3162_v12 = vpop.f32.mrf.mxu0  ;;  %v3206_v13 = vpop.f32.mrf.mxu1  ;;  %v8287_v59 = vld [vmem:[%s9189_s25 + $0x210] sm:$0xff] }
 0x18f   : > { %v8388_v20 = vpack.i.bf16 %v9482_v9, %v9477_v15  ;;  %v3163_v25 = vadd.f32 %v9282_v36, %v3162_v12  ;;  %v3207_v26 = vadd.f32 %v9282_v36, %v3206_v13  ;;  %v8289_v12 = vld [vmem:[%s9189_s25 + $0x220] sm:$0xff]  ;;  %v8291_v13 = vld [vmem:[%s9189_s25 + $0x230] sm:$0xff] }
 0x190   : > { %v3256_v21 = vmax.f32 %v3248_v10, 0.0  ;;  %v3300_v24 = vmax.f32 %v3292_v11, 0.0  ;;  %7528 = vmatmul.msk.bf16.gmra.mxu0 %vm2609_vm1, %v8278_v6  ;;  %7542 = vmatmul.msk.bf16.gmra.mxu1 %vm2609_vm1, %v8280_v7 }
 0x191   : > { %8389 = vrot.lane.b32.xlu0 %v8388_v20, %s8819_s27  ;;  %v3169_v31 = vmax.f32 %v3163_v25, 0.0  ;;  %v3213_v32 = vmax.f32 %v3207_v26, 0.0 }
 0x192   : > { %v5456_v2 = vmax.f32 %v3256_v21, %v3300_v24  ;;  %7556 = vmatmul.msk.bf16.gmra.mxu2 %vm2609_vm1, %v8282_v17  ;;  %7570 = vmatmul.msk.bf16.gmra.mxu3 %vm2609_vm1, %v8284_v18 }
 0x193   : > { %v5445_v1 = vmax.f32 %v3169_v31, %v3213_v32 }
 0x194   : > { %v5460_v28 = vmax.f32 %v9370_v22, %v5456_v2 }
 0x195   : > { %v3250_v35 = vpop.f32.mrf.mxu2  ;;  %v3294_v37 = vpop.f32.mrf.mxu3  ;;  %v9505_v56 = vmax.f32 %v9374_v23, %v5445_v1 }
 0x196   : > { %v3164_v38 = vpop.f32.mrf.mxu0  ;;  %v3208_v41 = vpop.f32.mrf.mxu1  ;;  %v8393_v42 = vpack.i.bf16 %v5460_v28, %v5459_v27  ;;  %v3251_v29 = vadd.f32 %v9282_v36, %v3250_v35  ;;  %v3295_v49 = vadd.f32 %v9282_v36, %v3294_v37 }
 0x197   : > { %v3165_v43 = vadd.f32 %v9282_v36, %v3164_v38  ;;  %v3209_v44 = vadd.f32 %v9282_v36, %v3208_v41 }
 0x198   : > { %v3257_v54 = vmax.f32 %v3251_v29, 0.0  ;;  %v3301_v55 = vmax.f32 %v3295_v49, 0.0 }
 0x199   : > { %v3170_v52 = vmax.f32 %v3165_v43, 0.0  ;;  %v3214_v22 = vmax.f32 %v3209_v44, 0.0  ;;  %8394 = vrot.lane.b32.xlu0 %v8393_v42, %s8819_s27 }
 0x19a   : > { %v5457_v20 = vmax.f32 %v3257_v54, %v3301_v55  ;;  %v8288_v54 = vld [vmem:[%s9189_s25 + $0x218] sm:$0xff] }
 0x19b   : > { %v5446_v53 = vmax.f32 %v3170_v52, %v3214_v22 }
 0x19c   : > { %v5461_v2 = vmax.f32 %v9380_v39, %v5457_v20 }
 0x19d   : > { %v3252_v57 = vpop.f32.mrf.mxu2  ;;  %v3296_v60 = vpop.f32.mrf.mxu3  ;;  %v9510_v4 = vmax.f32 %v9382_v40, %v5446_v53  ;;  %v8286_v53 = vld [vmem:[%s9189_s25 + $0x208] sm:$0xff] }
 0x19e   : > { %v3253_v6 = vadd.f32 %v9282_v36, %v3252_v57  ;;  %v3297_v7 = vadd.f32 %v9282_v36, %v3296_v60  ;;  %v3333_v10 = vpop.f32.mrf.mxu0  ;;  %v3377_v11 = vpop.f32.mrf.mxu1 }
 0x19f   : > { %v3334_v17 = vadd.f32 %v9282_v36, %v3333_v10  ;;  %v3378_v23 = vadd.f32 %v9282_v36, %v3377_v11  ;;  %v8398_v18 = vpack.i.bf16 %v9510_v4, %v9505_v56 }
 0x1a0   : > { %v3258_v50 = vmax.f32 %v3253_v6, 0.0  ;;  %v3302_v21 = vmax.f32 %v3297_v7, 0.0  ;;  %7583 = vmatmul.msk.bf16.vlgmr.msra.gmra.mxu0 %vm2609_vm1, %v8285_v58  ;;  %7597 = vmatmul.msk.bf16.vlgmr.msra.gmra.mxu1 %vm2609_vm1, %v8287_v59  ;;  %v8290_v59 = vld [vmem:[%s9189_s25 + $0x228] sm:$0xff]  ;;  %v8292_v6 = vld [vmem:[%s9189_s25 + $0x238] sm:$0xff] }
 0x1a1   : > { %v3343_v40 = vmax.f32 %v3334_v17, 0.0  ;;  %v3387_v24 = vmax.f32 %v3378_v23, 0.0  ;;  %8399 = vrot.lane.b32.xlu0 %v8398_v18, %s8819_s27  ;;  %4387 = vmatpush.bf16.msra.mxu0 %v9187_v3 }
 0x1a2   : > { %v5458_v25 = vmax.f32 %v3258_v50, %v3302_v21  ;;  %7611 = vmatmul.msk.bf16.vlgmr.msra.gmra.mxu2 %vm2609_vm1, %v8289_v12  ;;  %7625 = vmatmul.msk.bf16.vlgmr.msra.gmra.mxu3 %vm2609_vm1, %v8291_v13 }
 0x1a3   : > { %v9524_v26 = vmax.f32 %v3343_v40, %v3387_v24  ;;  %4431 = vmatpush.bf16.msra.mxu1 %v9187_v3  ;;  %4475 = vmatpush.bf16.msra.mxu2 %v9187_v3 }
 0x1a4   : > { %v5462_v27 = vmax.f32 %v9394_v62, %v5458_v25  ;;  %4519 = vmatpush.bf16.msra.mxu3 %v9187_v3 }
 0x1a5   : > { %v3421_v28 = vpop.f32.mrf.mxu2  ;;  %v3465_v31 = vpop.f32.mrf.mxu3 }
 0x1a6   : > { %v3422_v32 = vadd.f32 %v9282_v36, %v3421_v28  ;;  %v3466_v35 = vadd.f32 %v9282_v36, %v3465_v31  ;;  %v3335_v37 = vpop.f32.mrf.mxu0  ;;  %v3379_v38 = vpop.f32.mrf.mxu1  ;;  %v8403_v41 = vpack.i.bf16 %v5462_v27, %v5461_v2 }
 0x1a7   : > { %v3336_v39 = vadd.f32 %v9282_v36, %v3335_v37  ;;  %v3380_v62 = vadd.f32 %v9282_v36, %v3379_v38 }
 0x1a8   : > { %v3431_v42 = vmax.f32 %v3422_v32, 0.0  ;;  %v3475_v43 = vmax.f32 %v3466_v35, 0.0 }
 0x1a9   : > { %v3344_v44 = vmax.f32 %v3336_v39, 0.0  ;;  %v3388_v29 = vmax.f32 %v3380_v62, 0.0  ;;  %8404 = vrot.lane.b32.xlu0 %v8403_v41, %s8819_s27  ;;  %v8293_v62 = vld [vmem:[%s9189_s25 + $0x240] sm:$0xff] }
 0x1aa   : > { %v9537_v49 = vmax.f32 %v3431_v42, %v3475_v43  ;;  %v8295_v42 = vld [vmem:[%s9189_s25 + $0x250] sm:$0xff] }
 0x1ab   : > { %v9539_v1 = vmax.f32 %v3344_v44, %v3388_v29 }
 0x1ad   : > { %v3423_v52 = vpop.f32.mrf.mxu2  ;;  %v3467_v22 = vpop.f32.mrf.mxu3 }
 0x1ae   : > { %v3424_v55 = vadd.f32 %v9282_v36, %v3423_v52  ;;  %v3468_v57 = vadd.f32 %v9282_v36, %v3467_v22  ;;  %v3338_v60 = vpop.f32.mrf.mxu0  ;;  %v3382_v58 = vpop.f32.mrf.mxu1  ;;  %v8297_v22 = vld [vmem:[%s9189_s25 + $0x260] sm:$0xff] }
 0x1af   : > { %v3339_v7 = vadd.f32 %v9282_v36, %v3338_v60  ;;  %v3383_v10 = vadd.f32 %v9282_v36, %v3382_v58 }
 0x1b0   : > { %v3432_v11 = vmax.f32 %v3424_v55, 0.0  ;;  %v3476_v12 = vmax.f32 %v3468_v57, 0.0  ;;  %7584 = vmatmul.msk.bf16.gmra.mxu0 %vm2609_vm1, %v8286_v53  ;;  %7598 = vmatmul.msk.bf16.gmra.mxu1 %vm2609_vm1, %v8288_v54  ;;  %v8299_v53 = vld [vmem:[%s9189_s25 + $0x270] sm:$0xff] }
 0x1b1   : > { %v3345_v13 = vmax.f32 %v3339_v7, 0.0  ;;  %v3389_v17 = vmax.f32 %v3383_v10, 0.0 }
 0x1b2   : > { %v9552_v23 = vmax.f32 %v3432_v11, %v3476_v12  ;;  %7612 = vmatmul.msk.bf16.gmra.mxu2 %vm2609_vm1, %v8290_v59  ;;  %7626 = vmatmul.msk.bf16.gmra.mxu3 %vm2609_vm1, %v8292_v6 }
 0x1b3   : > { %v9556_v18 = vmax.f32 %v3345_v13, %v3389_v17 }
 0x1b5   : > { %v3426_v20 = vpop.f32.mrf.mxu2  ;;  %v3470_v50 = vpop.f32.mrf.mxu3 }
 0x1b6   : > { %v3427_v21 = vadd.f32 %v9282_v36, %v3426_v20  ;;  %v3471_v40 = vadd.f32 %v9282_v36, %v3470_v50  ;;  %v3340_v24 = vpop.f32.mrf.mxu0  ;;  %v3384_v25 = vpop.f32.mrf.mxu1 }
 0x1b7   : > { %v3341_v2 = vadd.f32 %v9282_v36, %v3340_v24  ;;  %v3385_v27 = vadd.f32 %v9282_v36, %v3384_v25 }
 0x1b8   : > { %v3433_v28 = vmax.f32 %v3427_v21, 0.0  ;;  %v3477_v31 = vmax.f32 %v3471_v40, 0.0 }
 0x1b9   : > { %v3346_v32 = vmax.f32 %v3341_v2, 0.0  ;;  %v3390_v35 = vmax.f32 %v3385_v27, 0.0 }
 0x1ba   : > { %v9562_v37 = vmax.f32 %v3433_v28, %v3477_v31 }
 0x1bb   : > { %v9564_v38 = vmax.f32 %v3346_v32, %v3390_v35  ;;  %v8294_v35 = vld [vmem:[%s9189_s25 + $0x248] sm:$0xff] }
 0x1bd   : > { %v3428_v41 = vpop.f32.mrf.mxu2  ;;  %v3472_v39 = vpop.f32.mrf.mxu3 }
 0x1be   : > { %v3429_v43 = vadd.f32 %v9282_v36, %v3428_v41  ;;  %v3473_v44 = vadd.f32 %v9282_v36, %v3472_v39  ;;  %v3509_v29 = vpop.f32.mrf.mxu0  ;;  %v3553_v52 = vpop.f32.mrf.mxu1  ;;  %v8296_v41 = vld [vmem:[%s9189_s25 + $0x258] sm:$0xff] }
 0x1bf   : > { %v3510_v54 = vadd.f32 %v9282_v36, %v3509_v29  ;;  %v3554_v55 = vadd.f32 %v9282_v36, %v3553_v52  ;;  %v8300_v29 = vld [vmem:[%s9189_s25 + $0x278] sm:$0xff] }
 0x1c0   : > { %v3434_v57 = vmax.f32 %v3429_v43, 0.0  ;;  %v3478_v60 = vmax.f32 %v3473_v44, 0.0  ;;  %7639 = vmatmul.msk.bf16.vlgmr.msrb.gmra.mxu0 %vm2609_vm1, %v8293_v62  ;;  %7653 = vmatmul.msk.bf16.vlgmr.msrb.gmra.mxu1 %vm2609_vm1, %v8295_v42  ;;  %v8298_v44 = vld [vmem:[%s9189_s25 + $0x268] sm:$0xff] }
 0x1c1   : > { %v3519_v58 = vmax.f32 %v3510_v54, 0.0  ;;  %v3563_v59 = vmax.f32 %v3554_v55, 0.0  ;;  %4563 = vmatpush.bf16.msrb.mxu0 %v9187_v3  ;;  %4607 = vmatpush.bf16.msrb.mxu1 %v9187_v3 }
 0x1c2   : > { %v9576_v6 = vmax.f32 %v3434_v57, %v3478_v60  ;;  %7667 = vmatmul.msk.bf16.vlgmr.msrb.gmra.mxu2 %vm2609_vm1, %v8297_v22  ;;  %7681 = vmatmul.msk.bf16.vlgmr.msrb.gmra.mxu3 %vm2609_vm1, %v8299_v53 }
 0x1c3   : > { %v9580_v7 = vmax.f32 %v3519_v58, %v3563_v59  ;;  %4651 = vmatpush.bf16.msrb.mxu2 %v9187_v3  ;;  %4695 = vmatpush.bf16.msrb.mxu3 %v9187_v3 }
 0x1c5   : > { %v3597_v10 = vpop.f32.mrf.mxu2  ;;  %v3641_v11 = vpop.f32.mrf.mxu3 }
 0x1c6   : > { %v3598_v12 = vadd.f32 %v9282_v36, %v3597_v10  ;;  %v3642_v13 = vadd.f32 %v9282_v36, %v3641_v11  ;;  %v3511_v17 = vpop.f32.mrf.mxu0  ;;  %v3555_v20 = vpop.f32.mrf.mxu1 }
 0x1c7   : > { %v3512_v50 = vadd.f32 %v9282_v36, %v3511_v17  ;;  %v3556_v21 = vadd.f32 %v9282_v36, %v3555_v20 }
 0x1c8   : > { %v3607_v40 = vmax.f32 %v3598_v12, 0.0  ;;  %v3651_v24 = vmax.f32 %v3642_v13, 0.0 }
 0x1c9   : > { %v3520_v25 = vmax.f32 %v3512_v50, 0.0  ;;  %v3564_v2 = vmax.f32 %v3556_v21, 0.0 }
 0x1ca   : > { %v9590_v27 = vmax.f32 %v3607_v40, %v3651_v24 }
 0x1cb   : > { %v9592_v28 = vmax.f32 %v3520_v25, %v3564_v2 }
 0x1cd   : > { %v3599_v31 = vpop.f32.mrf.mxu2  ;;  %v3643_v32 = vpop.f32.mrf.mxu3 }
 0x1ce   : > { %v3600_v39 = vadd.f32 %v9282_v36, %v3599_v31  ;;  %v3644_v62 = vadd.f32 %v9282_v36, %v3643_v32  ;;  %v3514_v42 = vpop.f32.mrf.mxu0  ;;  %v3558_v43 = vpop.f32.mrf.mxu1 }
 0x1cf   : > { %v3515_v52 = vadd.f32 %v9282_v36, %v3514_v42  ;;  %v3559_v22 = vadd.f32 %v9282_v36, %v3558_v43 }
 0x1d0   : > { %v3608_v53 = vmax.f32 %v3600_v39, 0.0  ;;  %v3652_v54 = vmax.f32 %v3644_v62, 0.0  ;;  %7640 = vmatmul.msk.bf16.gmra.mxu0 %vm2609_vm1, %v8294_v35  ;;  %7654 = vmatmul.msk.bf16.gmra.mxu1 %vm2609_vm1, %v8296_v41  ;;  %v8301_v41 = vld [vmem:[%s9189_s25 + $0x280] sm:$0xff]  ;;  %v8303_v39 = vld [vmem:[%s9189_s25 + $0x290] sm:$0xff] }
 0x1d1   : > { %v3521_v55 = vmax.f32 %v3515_v52, 0.0  ;;  %v3565_v57 = vmax.f32 %v3559_v22, 0.0  ;;  %v8307_v52 = vld [vmem:[%s9189_s25 + $0x2b0] sm:$0xff] }
 0x1d2   : > { %v9604_v60 = vmax.f32 %v3608_v53, %v3652_v54  ;;  %7668 = vmatmul.msk.bf16.gmra.mxu2 %vm2609_vm1, %v8298_v44  ;;  %7682 = vmatmul.msk.bf16.gmra.mxu3 %vm2609_vm1, %v8300_v29  ;;  %v8305_v29 = vld [vmem:[%s9189_s25 + $0x2a0] sm:$0xff] }
 0x1d3   : > { %v9608_v58 = vmax.f32 %v3521_v55, %v3565_v57 }
 0x1d5   : > { %v3602_v59 = vpop.f32.mrf.mxu2  ;;  %v3646_v10 = vpop.f32.mrf.mxu3 }
 0x1d6   : > { %v3603_v11 = vadd.f32 %v9282_v36, %v3602_v59  ;;  %v3647_v12 = vadd.f32 %v9282_v36, %v3646_v10  ;;  %v3516_v13 = vpop.f32.mrf.mxu0  ;;  %v3560_v17 = vpop.f32.mrf.mxu1 }
 0x1d7   : > { %v3517_v20 = vadd.f32 %v9282_v36, %v3516_v13  ;;  %v3561_v50 = vadd.f32 %v9282_v36, %v3560_v17 }
 0x1d8   : > { %v3609_v21 = vmax.f32 %v3603_v11, 0.0  ;;  %v3653_v40 = vmax.f32 %v3647_v12, 0.0 }
 0x1d9   : > { %v3522_v24 = vmax.f32 %v3517_v20, 0.0  ;;  %v3566_v25 = vmax.f32 %v3561_v50, 0.0 }
 0x1da   : > { %v9614_v2 = vmax.f32 %v3609_v21, %v3653_v40 }
 0x1db   : > { %v9616_v31 = vmax.f32 %v3522_v24, %v3566_v25 }
 0x1dd   : > { %v3604_v32 = vpop.f32.mrf.mxu2  ;;  %v3648_v35 = vpop.f32.mrf.mxu3 }
 0x1de   : > { %v3605_v62 = vadd.f32 %v9282_v36, %v3604_v32  ;;  %v3649_v42 = vadd.f32 %v9282_v36, %v3648_v35  ;;  %v3685_v43 = vpop.f32.mrf.mxu0  ;;  %v3729_v44 = vpop.f32.mrf.mxu1 }
 0x1df   : > { %v3686_v54 = vadd.f32 %v9282_v36, %v3685_v43  ;;  %v3730_v55 = vadd.f32 %v9282_v36, %v3729_v44  ;;  %v8302_v44 = vld [vmem:[%s9189_s25 + $0x288] sm:$0xff] }
 0x1e0   : > { %v3610_v22 = vmax.f32 %v3605_v62, 0.0  ;;  %v3654_v53 = vmax.f32 %v3649_v42, 0.0  ;;  %7695 = vmatmul.msk.bf16.vlgmr.msra.gmra.mxu0 %vm2609_vm1, %v8301_v41  ;;  %7709 = vmatmul.msk.bf16.vlgmr.msra.gmra.mxu1 %vm2609_vm1, %v8303_v39 }
 0x1e1   : > { %4739 = vmatpush.bf16.msra.mxu0 %v9187_v3  ;;  %4783 = vmatpush.bf16.msra.mxu1 %v9187_v3  ;;  %v3695_v59 = vmax.f32 %v3686_v54, 0.0  ;;  %v3739_v10 = vmax.f32 %v3730_v55, 0.0 }
 0x1e2   : > { %v9628_v57 = vmax.f32 %v3610_v22, %v3654_v53  ;;  %7723 = vmatmul.msk.bf16.vlgmr.msra.gmra.mxu2 %vm2609_vm1, %v8305_v29  ;;  %7737 = vmatmul.msk.bf16.vlgmr.msra.gmra.mxu3 %vm2609_vm1, %v8307_v52  ;;  %v8304_v29 = vld [vmem:[%s9189_s25 + $0x298] sm:$0xff] }
 0x1e3   : > { %4827 = vmatpush.bf16.msra.mxu2 %v9187_v3  ;;  %4871 = vmatpush.bf16.msra.mxu3 %v9187_v3  ;;  %v5467_v24 = vmax.f32 %v3695_v59, %v3739_v10  ;;  %v8308_v59 = vld [vmem:[%s9189_s25 + $0x2b8] sm:$0xff] }
 0x1e5   : > { %v3773_v11 = vpop.f32.mrf.mxu2  ;;  %v3817_v12 = vpop.f32.mrf.mxu3  ;;  %v9641_v62 = vmax.f32 %v9524_v26, %v5467_v24  ;;  %v8306_v26 = vld [vmem:[%s9189_s25 + $0x2a8] sm:$0xff] }
 0x1e6   : > { %v3687_v13 = vpop.f32.mrf.mxu0  ;;  %v3731_v17 = vpop.f32.mrf.mxu1  ;;  %v3774_v21 = vadd.f32 %v9282_v36, %v3773_v11  ;;  %v3818_v40 = vadd.f32 %v9282_v36, %v3817_v12 }
 0x1e7   : > { %v3688_v20 = vadd.f32 %v9282_v36, %v3687_v13  ;;  %v3732_v50 = vadd.f32 %v9282_v36, %v3731_v17  ;;  %v9651_v36 = vld [vmem:[%s10893_s2] ss:$0 sm:$0xff] }
 0x1e8   : > { %v3783_v41 = vmax.f32 %v3774_v21, 0.0  ;;  %v3827_v39 = vmax.f32 %v3818_v40, 0.0 }
 0x1e9   : > { %v3696_v25 = vmax.f32 %v3688_v20, 0.0  ;;  %v3740_v32 = vmax.f32 %v3732_v50, 0.0 }
 0x1ea   : > { %v5479_v11 = vmax.f32 %v3783_v41, %v3827_v39 }
 0x1eb   : > { %v5468_v35 = vmax.f32 %v3696_v25, %v3740_v32 }
 0x1ec   : > { %v9667_v50 = vmax.f32 %v9537_v49, %v5479_v11  ;;  %v8311_v11 = vld [vmem:[%s9189_s25 + $0x2d0] sm:$0xff] }
 0x1ed   : > { %v3775_v42 = vpop.f32.mrf.mxu2  ;;  %v3819_v43 = vpop.f32.mrf.mxu3  ;;  %v9646_v52 = vmax.f32 %v9539_v1, %v5468_v35 }
 0x1ee   : > { %v3776_v22 = vadd.f32 %v9651_v36, %v3775_v42  ;;  %v3820_v53 = vadd.f32 %v9651_v36, %v3819_v43  ;;  %v3690_v54 = vpop.f32.mrf.mxu0  ;;  %v3734_v55 = vpop.f32.mrf.mxu1 }
 0x1ef   : > { %v8408_v10 = vpack.i.bf16 %v9646_v52, %v9641_v62  ;;  %v3691_v13 = vadd.f32 %v9651_v36, %v3690_v54  ;;  %v3735_v17 = vadd.f32 %v9651_v36, %v3734_v55 }
 0x1f0   : > { %v3784_v12 = vmax.f32 %v3776_v22, 0.0  ;;  %v3828_v1 = vmax.f32 %v3820_v53, 0.0  ;;  %7696 = vmatmul.msk.bf16.gmra.mxu0 %vm2609_vm1, %v8302_v44  ;;  %7710 = vmatmul.msk.bf16.gmra.mxu1 %vm2609_vm1, %v8304_v29 }
 0x1f1   : > { %8409 = vrot.lane.b32.xlu0 %v8408_v10, %s8820_s30  ;;  %v3697_v40 = vmax.f32 %v3691_v13, 0.0  ;;  %v3741_v24 = vmax.f32 %v3735_v17, 0.0  ;;  %v8309_v10 = vld [vmem:[%s9189_s25 + $0x2c0] sm:$0xff] }
 0x1f2   : > { %v5480_v20 = vmax.f32 %v3784_v12, %v3828_v1  ;;  %7724 = vmatmul.msk.bf16.gmra.mxu2 %vm2609_vm1, %v8306_v26  ;;  %7738 = vmatmul.msk.bf16.gmra.mxu3 %vm2609_vm1, %v8308_v59 }
 0x1f3   : > { %v5469_v44 = vmax.f32 %v3697_v40, %v3741_v24  ;;  %v8313_v24 = vld [vmem:[%s9189_s25 + $0x2e0] sm:$0xff] }
 0x1f4   : > { %v9670_v21 = vmax.f32 %v9552_v23, %v5480_v20 }
 0x1f5   : > { %v3778_v25 = vpop.f32.mrf.mxu2  ;;  %v3822_v32 = vpop.f32.mrf.mxu3  ;;  %v9683_v12 = vmax.f32 %v9556_v18, %v5469_v44 }
 0x1f6   : > { %v3692_v35 = vpop.f32.mrf.mxu0  ;;  %v3736_v41 = vpop.f32.mrf.mxu1  ;;  %v8413_v39 = vpack.i.bf16 %v9670_v21, %v9667_v50  ;;  %v3779_v49 = vadd.f32 %v9651_v36, %v3778_v25  ;;  %v3823_v23 = vadd.f32 %v9651_v36, %v3822_v32  ;;  %v8315_v25 = vld [vmem:[%s9189_s25 + $0x2f0] sm:$0xff] }
 0x1f7   : > { %v3693_v42 = vadd.f32 %v9651_v36, %v3692_v35  ;;  %v3737_v43 = vadd.f32 %v9651_v36, %v3736_v41  ;;  %10917 = vst [vmem:[#allocation3_spill] sm:$0xff] %v9683_v12 }
 0x1f8   : > { %8414 = vrot.lane.b32.xlu1 %v8413_v39, %s8821_s12  ;;  %v3785_v54 = vmax.f32 %v3779_v49, 0.0  ;;  %v3829_v55 = vmax.f32 %v3823_v23, 0.0 }
 0x1f9   : > { %v3698_v29 = vmax.f32 %v3693_v42, 0.0  ;;  %v3742_v22 = vmax.f32 %v3737_v43, 0.0  ;;  %8419 = vrot.lane.b32.xlu0 %v8413_v39, %s8819_s27 }
 0x1fa   : > { %v5481_v35 = vmax.f32 %v3785_v54, %v3829_v55 }
 0x1fb   : > { %v5470_v53 = vmax.f32 %v3698_v29, %v3742_v22 }
 0x1fc   : > { %v9704_v49 = vmax.f32 %v9562_v37, %v5481_v35 }
 0x1fd   : > { %v3780_v26 = vpop.f32.mrf.mxu2  ;;  %v3824_v59 = vpop.f32.mrf.mxu3  ;;  %v9686_v1 = vmax.f32 %v9564_v38, %v5470_v53 }
 0x1fe   : > { %v3781_v13 = vadd.f32 %v9651_v36, %v3780_v26  ;;  %v3825_v17 = vadd.f32 %v9651_v36, %v3824_v59  ;;  %v3861_v20 = vpop.f32.mrf.mxu0  ;;  %v3905_v40 = vpop.f32.mrf.mxu1  ;;  %10918 = vst [vmem:[#allocation4_spill] sm:$0xff] %v9704_v49 }
 0x1ff   : > { %v8428_v32 = vpack.i.bf16 %v9686_v1, %v9683_v12  ;;  %v3862_v38 = vadd.f32 %v9651_v36, %v3861_v20  ;;  %v3906_v43 = vadd.f32 %v9651_v36, %v3905_v40 }
 0x200   : > { %v3786_v41 = vmax.f32 %v3781_v13, 0.0  ;;  %v3830_v42 = vmax.f32 %v3825_v17, 0.0  ;;  %8424 = vrot.lane.b32.xlu1 %v8413_v39, %s8820_s30  ;;  %7751 = vmatmul.msk.bf16.vlgmr.msrb.gmra.mxu0 %vm2609_vm1, %v8309_v10 }
 0x201   : > { %7765 = vmatmul.msk.bf16.vlgmr.msrb.gmra.mxu1 %vm2609_vm1, %v8311_v11  ;;  %8429 = vrot.lane.b32.xlu2 %v8428_v32, %s8820_s30  ;;  %v3871_v53 = vmax.f32 %v3862_v38, 0.0  ;;  %v3915_v54 = vmax.f32 %v3906_v43, 0.0  ;;  %v8312_v32 = vld [vmem:[%s9189_s25 + $0x2d8] sm:$0xff]  ;;  %v8314_v38 = vld [vmem:[%s9189_s25 + $0x2e8] sm:$0xff] }
 0x202   : > { %v5482_v18 = vmax.f32 %v3786_v41, %v3830_v42  ;;  %7779 = vmatmul.msk.bf16.vlgmr.msrb.gmra.mxu2 %vm2609_vm1, %v8313_v24  ;;  %7793 = vmatmul.msk.bf16.vlgmr.msrb.gmra.mxu3 %vm2609_vm1, %v8315_v25  ;;  %v8310_v25 = vld [vmem:[%s9189_s25 + $0x2c8] sm:$0xff]  ;;  %v8316_v43 = vld [vmem:[%s9189_s25 + $0x2f8] sm:$0xff] }
 0x203   : > { %4915 = vmatpush.bf16.msrb.mxu0 %v9187_v3  ;;  %4959 = vmatpush.bf16.msrb.mxu1 %v9187_v3  ;;  %v5491_v13 = vmax.f32 %v3871_v53, %v3915_v54 }
 0x204   : > { %v9707_v39 = vmax.f32 %v9576_v6, %v5482_v18  ;;  %5003 = vmatpush.bf16.msrb.mxu2 %v9187_v3  ;;  %5047 = vmatpush.bf16.msrb.mxu3 %v9187_v3 }
 0x205   : > { %v3949_v23 = vpop.f32.mrf.mxu2  ;;  %v3993_v44 = vpop.f32.mrf.mxu3 }
 0x206   : > { %10919 = vst [vmem:[#allocation5_spill] sm:$0xff] %v9707_v39  ;;  %v3863_v29 = vpop.f32.mrf.mxu0  ;;  %v8443_v22 = vpack.i.bf16 %v9707_v39, %v9704_v49  ;;  %v3907_v6 = vpop.f32.mrf.mxu1  ;;  %v3950_v26 = vadd.f32 %v9651_v36, %v3949_v23  ;;  %v3994_v59 = vadd.f32 %v9651_v36, %v3993_v44  ;;  %v9730_v23 = vmax.f32 %v9580_v7, %v5491_v13 }
 0x207   : > { %v3864_v37 = vadd.f32 %v9651_v36, %v3863_v29  ;;  %v3908_v55 = vadd.f32 %v9651_v36, %v3907_v6 }
 0x208   : > { %8444 = vrot.lane.b32.xlu1 %v8443_v22, %s8820_s30  ;;  %8439 = vrot.lane.b32.xlu0 %v8443_v22, %s8819_s27  ;;  %v3959_v20 = vmax.f32 %v3950_v26, 0.0  ;;  %v4003_v40 = vmax.f32 %v3994_v59, 0.0  ;;  %10921 = vst [vmem:[#allocation7_spill] sm:$0xff] %v9730_v23 }
 0x209   : > { %v3872_v10 = vmax.f32 %v3864_v37, 0.0  ;;  %v3916_v11 = vmax.f32 %v3908_v55, 0.0  ;;  %8434 = vrot.lane.b32.xlu2 %v8443_v22, %s8821_s12 }
 0x20a   : > { %v5503_v53 = vmax.f32 %v3959_v20, %v4003_v40 }
 0x20b   : > { %v5492_v17 = vmax.f32 %v3872_v10, %v3916_v11 }
 0x20c   : > { %v5507_v55 = vmax.f32 %v9590_v27, %v5503_v53 }
 0x20d   : > { %v3951_v24 = vpop.f32.mrf.mxu2  ;;  %v9724_v35 = vmax.f32 %v9592_v28, %v5492_v17  ;;  %v3995_v42 = vpop.f32.mrf.mxu3 }
 0x20e   : > { %v3952_v41 = vadd.f32 %v9651_v36, %v3951_v24  ;;  %v3866_v18 = vpop.f32.mrf.mxu0  ;;  %v3996_v44 = vadd.f32 %v9651_v36, %v3995_v42  ;;  %v3910_v29 = vpop.f32.mrf.mxu1 }
 0x20f   : > { %10920 = vst [vmem:[#allocation6_spill] sm:$0xff] %v9724_v35  ;;  %v8458_v28 = vpack.i.bf16 %v9724_v35, %v9730_v23  ;;  %v3867_v37 = vadd.f32 %v9651_v36, %v3866_v18  ;;  %v3911_v6 = vadd.f32 %v9651_v36, %v3910_v29  ;;  %v8317_v29 = vld [vmem:[%s9189_s25 + $0x300] sm:$0xff] }
 0x210   : > { %v3960_v22 = vmax.f32 %v3952_v41, 0.0  ;;  %v4004_v54 = vmax.f32 %v3996_v44, 0.0  ;;  %7752 = vmatmul.msk.bf16.gmra.mxu0 %vm2609_vm1, %v8310_v25 }
 0x211   : > { %7766 = vmatmul.msk.bf16.gmra.mxu1 %vm2609_vm1, %v8312_v32  ;;  %8459 = vrot.lane.b32.xlu1 %v8458_v28, %s8820_s30  ;;  %v3873_v10 = vmax.f32 %v3867_v37, 0.0  ;;  %v3917_v17 = vmax.f32 %v3911_v6, 0.0  ;;  %v8323_v6 = vld [vmem:[%s9189_s25 + $0x330] sm:$0xff] }
 0x212   : > { %7780 = vmatmul.msk.bf16.gmra.mxu2 %vm2609_vm1, %v8314_v38  ;;  %7794 = vmatmul.msk.bf16.gmra.mxu3 %vm2609_vm1, %v8316_v43  ;;  %v5504_v7 = vmax.f32 %v3960_v22, %v4004_v54  ;;  %v8319_v22 = vld [vmem:[%s9189_s25 + $0x310] sm:$0xff] }
 0x213   : > { %8449 = vrot.lane.b32.xlu2 %v8458_v28, %s8821_s12  ;;  %8454 = vrot.lane.b32.xlu0 %v8458_v28, %s8819_s27  ;;  %v5493_v42 = vmax.f32 %v3873_v10, %v3917_v17 }
 0x214   : > { %v5508_v59 = vmax.f32 %v9604_v60, %v5504_v7  ;;  %v8321_v7 = vld [vmem:[%s9189_s25 + $0x320] sm:$0xff] }
 0x215   : > { %v3954_v26 = vpop.f32.mrf.mxu2  ;;  %v3998_v11 = vpop.f32.mrf.mxu3 }
 0x216   : > { %v3868_v13 = vpop.f32.mrf.mxu0  ;;  %v3912_v40 = vpop.f32.mrf.mxu1  ;;  %v8463_v24 = vpack.i.bf16 %v5508_v59, %v5507_v55  ;;  %v3955_v25 = vadd.f32 %v9651_v36, %v3954_v26  ;;  %v3999_v32 = vadd.f32 %v9651_v36, %v3998_v11  ;;  %v9761_v55 = vmax.f32 %v9608_v58, %v5493_v42 }
 0x217   : > { %v3869_v20 = vadd.f32 %v9651_v36, %v3868_v13  ;;  %v3913_v41 = vadd.f32 %v9651_v36, %v3912_v40 }
 0x218   : > { %v3961_v18 = vmax.f32 %v3955_v25, 0.0  ;;  %v4005_v38 = vmax.f32 %v3999_v32, 0.0  ;;  %10923 = vst [vmem:[#allocation9_spill] sm:$0xff] %v9761_v55 }
 0x219   : > { %v3874_v27 = vmax.f32 %v3869_v20, 0.0  ;;  %v3918_v60 = vmax.f32 %v3913_v41, 0.0 }
 0x21a   : > { %v5505_v11 = vmax.f32 %v3961_v18, %v4005_v38 }
 0x21b   : > { %8464 = vrot.lane.b32.xlu2 %v8463_v24, %s8821_s12  ;;  %v5494_v43 = vmax.f32 %v3874_v27, %v3918_v60  ;;  %8469 = vrot.lane.b32.xlu0 %v8463_v24, %s8819_s27 }
 0x21c   : > { %v5509_v32 = vmax.f32 %v9614_v2, %v5505_v11 }
 0x21d   : > { %v3956_v44 = vpop.f32.mrf.mxu2  ;;  %v9755_v53 = vmax.f32 %v9616_v31, %v5494_v43  ;;  %v4000_v28 = vpop.f32.mrf.mxu3 }
 0x21e   : > { %v3957_v54 = vadd.f32 %v9651_v36, %v3956_v44  ;;  %v4037_v37 = vpop.f32.mrf.mxu0  ;;  %v4001_v26 = vadd.f32 %v9651_v36, %v4000_v28  ;;  %v4081_v10 = vpop.f32.mrf.mxu1 }
 0x21f   : > { %10922 = vst [vmem:[#allocation8_spill] sm:$0xff] %v9755_v53  ;;  %v4038_v59 = vadd.f32 %v9651_v36, %v4037_v37  ;;  %v4082_v17 = vadd.f32 %v9651_v36, %v4081_v10  ;;  %v8483_v40 = vpack.i.bf16 %v9755_v53, %v9761_v55  ;;  %v8339_v53 = vld [vmem:[%s9189_s25 + $0x3b0] sm:$0xff] }
 0x220   : > { %v3962_v13 = vmax.f32 %v3957_v54, 0.0  ;;  %v4006_v31 = vmax.f32 %v4001_v26, 0.0  ;;  %7807 = vmatmul.msk.bf16.vlgmr.msra.gmra.mxu0 %vm2609_vm1, %v8317_v29  ;;  %v8318_v26 = vld [vmem:[%s9189_s25 + $0x308] sm:$0xff] }
 0x221   : > { %v4047_v20 = vmax.f32 %v4038_v59, 0.0  ;;  %7821 = vmatmul.msk.bf16.vlgmr.msra.gmra.mxu1 %vm2609_vm1, %v8319_v22  ;;  %v4091_v58 = vmax.f32 %v4082_v17, 0.0  ;;  %8484 = vrot.lane.b32.xlu1 %v8483_v40, %s8820_s30  ;;  %v8320_v59 = vld [vmem:[%s9189_s25 + $0x318] sm:$0xff]  ;;  %v8322_v17 = vld [vmem:[%s9189_s25 + $0x328] sm:$0xff] }
 0x222   : > { %7835 = vmatmul.msk.bf16.vlgmr.msra.gmra.mxu2 %vm2609_vm1, %v8321_v7  ;;  %7849 = vmatmul.msk.bf16.vlgmr.msra.gmra.mxu3 %vm2609_vm1, %v8323_v6  ;;  %v5506_v24 = vmax.f32 %v3962_v13, %v4006_v31  ;;  %v8324_v31 = vld [vmem:[%s9189_s25 + $0x338] sm:$0xff] }
 0x223   : > { %8474 = vrot.lane.b32.xlu2 %v8483_v40, %s8821_s12  ;;  %v9774_v25 = vmax.f32 %v4047_v20, %v4091_v58  ;;  %8479 = vrot.lane.b32.xlu0 %v8483_v40, %s8819_s27 }
 0x224   : > { %5091 = vmatpush.bf16.msra.mxu0 %v9187_v3  ;;  %v5510_v27 = vmax.f32 %v9628_v57, %v5506_v24  ;;  %5135 = vmatpush.bf16.msra.mxu1 %v9187_v3 }
 0x225   : > { %v4125_v41 = vpop.f32.mrf.mxu2  ;;  %5179 = vmatpush.bf16.msra.mxu2 %v9187_v3  ;;  %v4169_v42 = vpop.f32.mrf.mxu3  ;;  %5223 = vmatpush.bf16.msra.mxu3 %v9187_v3 }
 0x226   : > { %v4126_v60 = vadd.f32 %v9651_v36, %v4125_v41  ;;  %v4039_v18 = vpop.f32.mrf.mxu0  ;;  %v4170_v38 = vadd.f32 %v9651_v36, %v4169_v42  ;;  %v4083_v2 = vpop.f32.mrf.mxu1  ;;  %v8488_v44 = vpack.i.bf16 %v5510_v27, %v5509_v32 }
 0x227   : > { %v4040_v43 = vadd.f32 %v9651_v36, %v4039_v18  ;;  %v4084_v29 = vadd.f32 %v9651_v36, %v4083_v2 }
 0x228   : > { %v4135_v57 = vmax.f32 %v4126_v60, 0.0  ;;  %v4179_v22 = vmax.f32 %v4170_v38, 0.0  ;;  %v9809_v38 = vpop.permute.xlu0 %8379 }
 0x229   : > { %v4048_v54 = vmax.f32 %v4040_v43, 0.0  ;;  %v4092_v28 = vmax.f32 %v4084_v29, 0.0 }
 0x22a   : > { %v9787_v37 = vmax.f32 %v4135_v57, %v4179_v22 }
 0x22b   : > { %8489 = vrot.lane.b32.xlu2 %v8488_v44, %s8821_s12  ;;  %v9790_v7 = vmax.f32 %v4048_v54, %v4092_v28  ;;  %8494 = vrot.lane.b32.xlu0 %v8488_v44, %s8819_s27 }
 0x22d   : > { %v4127_v6 = vpop.f32.mrf.mxu2  ;;  %v4171_v11 = vpop.f32.mrf.mxu3 }
 0x22e   : > { %v4128_v10 = vadd.f32 %v9651_v36, %v4127_v6  ;;  %v4042_v13 = vpop.f32.mrf.mxu0  ;;  %v4172_v20 = vadd.f32 %v9651_v36, %v4171_v11  ;;  %v4086_v58 = vpop.f32.mrf.mxu1 }
 0x22f   : > { %v4043_v40 = vadd.f32 %v9651_v36, %v4042_v13  ;;  %v4087_v32 = vadd.f32 %v9651_v36, %v4086_v58 }
 0x230   : > { %v4136_v24 = vmax.f32 %v4128_v10, 0.0  ;;  %v4180_v41 = vmax.f32 %v4172_v20, 0.0  ;;  %7808 = vmatmul.msk.bf16.gmra.mxu0 %vm2609_vm1, %v8318_v26  ;;  %v8325_v20 = vld [vmem:[%s9189_s25 + $0x340] sm:$0xff] }
 0x231   : > { %v4049_v27 = vmax.f32 %v4043_v40, 0.0  ;;  %7822 = vmatmul.msk.bf16.gmra.mxu1 %vm2609_vm1, %v8320_v59  ;;  %v4093_v60 = vmax.f32 %v4087_v32, 0.0  ;;  %v8327_v40 = vld [vmem:[%s9189_s25 + $0x350] sm:$0xff] }
 0x232   : > { %7836 = vmatmul.msk.bf16.gmra.mxu2 %vm2609_vm1, %v8322_v17  ;;  %7850 = vmatmul.msk.bf16.gmra.mxu3 %vm2609_vm1, %v8324_v31  ;;  %v9805_v42 = vmax.f32 %v4136_v24, %v4180_v41  ;;  %v9819_v17 = vpop.permute.xlu0 %8389  ;;  %v8329_v41 = vld [vmem:[%s9189_s25 + $0x360] sm:$0xff] }
 0x233   : > { %v9807_v18 = vmax.f32 %v4049_v27, %v4093_v60  ;;  %v8331_v27 = vld [vmem:[%s9189_s25 + $0x370] sm:$0xff] }
 0x235   : > { %v4130_v43 = vpop.f32.mrf.mxu2  ;;  %v4174_v44 = vpop.f32.mrf.mxu3 }
 0x236   : > { %v4131_v2 = vadd.f32 %v9651_v36, %v4130_v43  ;;  %v4044_v57 = vpop.f32.mrf.mxu0  ;;  %v4175_v29 = vadd.f32 %v9651_v36, %v4174_v44  ;;  %v4088_v54 = vpop.f32.mrf.mxu1 }
 0x237   : > { %v4045_v22 = vadd.f32 %v9651_v36, %v4044_v57  ;;  %v4089_v6 = vadd.f32 %v9651_v36, %v4088_v54 }
 0x238   : > { %v4137_v28 = vmax.f32 %v4131_v2, 0.0  ;;  %v4181_v26 = vmax.f32 %v4175_v29, 0.0 }
 0x239   : > { %v4050_v59 = vmax.f32 %v4045_v22, 0.0  ;;  %v4094_v10 = vmax.f32 %v4089_v6, 0.0 }
 0x23a   : > { %v9815_v11 = vmax.f32 %v4137_v28, %v4181_v26 }
 0x23b   : > { %v9817_v13 = vmax.f32 %v4050_v59, %v4094_v10 }
 0x23d   : > { %v4132_v31 = vpop.f32.mrf.mxu2  ;;  %v4176_v24 = vpop.f32.mrf.mxu3 }
 0x23e   : > { %v4133_v58 = vadd.f32 %v9651_v36, %v4132_v31  ;;  %v4213_v32 = vpop.f32.mrf.mxu0  ;;  %v4177_v60 = vadd.f32 %v9651_v36, %v4176_v24  ;;  %v4257_v2 = vpop.f32.mrf.mxu1 }
 0x23f   : > { %v4214_v43 = vadd.f32 %v9651_v36, %v4213_v32  ;;  %v4258_v57 = vadd.f32 %v9651_v36, %v4257_v2  ;;  %v9844_v24 = vpop.permute.xlu0 %8394 }
 0x240   : > { %v4138_v44 = vmax.f32 %v4133_v58, 0.0  ;;  %v4182_v29 = vmax.f32 %v4177_v60, 0.0  ;;  %7863 = vmatmul.msk.bf16.vlgmr.msrb.gmra.mxu0 %vm2609_vm1, %v8325_v20 }
 0x241   : > { %v4223_v22 = vmax.f32 %v4214_v43, 0.0  ;;  %7877 = vmatmul.msk.bf16.vlgmr.msrb.gmra.mxu1 %vm2609_vm1, %v8327_v40  ;;  %v4267_v54 = vmax.f32 %v4258_v57, 0.0  ;;  %5267 = vmatpush.bf16.msrb.mxu0 %v9187_v3  ;;  %v8326_v57 = vld [vmem:[%s9189_s25 + $0x348] sm:$0xff] }
 0x242   : > { %7891 = vmatmul.msk.bf16.vlgmr.msrb.gmra.mxu2 %vm2609_vm1, %v8329_v41  ;;  %7905 = vmatmul.msk.bf16.vlgmr.msrb.gmra.mxu3 %vm2609_vm1, %v8331_v27  ;;  %v9833_v28 = vmax.f32 %v4138_v44, %v4182_v29  ;;  %v8328_v29 = vld [vmem:[%s9189_s25 + $0x358] sm:$0xff] }
 0x243   : > { %5311 = vmatpush.bf16.msrb.mxu1 %v9187_v3  ;;  %v9837_v6 = vmax.f32 %v4223_v22, %v4267_v54  ;;  %5355 = vmatpush.bf16.msrb.mxu2 %v9187_v3 }
 0x244   : > { %5399 = vmatpush.bf16.msrb.mxu3 %v9187_v3 }
 0x245   : > { %v4301_v26 = vpop.f32.mrf.mxu2  ;;  %v4345_v10 = vpop.f32.mrf.mxu3 }
 0x246   : > { %v4302_v59 = vadd.f32 %v9651_v36, %v4301_v26  ;;  %v4215_v31 = vpop.f32.mrf.mxu0  ;;  %v4346_v20 = vadd.f32 %v9651_v36, %v4345_v10  ;;  %v4259_v58 = vpop.f32.mrf.mxu1  ;;  %v8330_v10 = vld [vmem:[%s9189_s25 + $0x368] sm:$0xff] }
 0x247   : > { %v4216_v40 = vadd.f32 %v9651_v36, %v4215_v31  ;;  %v4260_v41 = vadd.f32 %v9651_v36, %v4259_v58  ;;  %v8332_v31 = vld [vmem:[%s9189_s25 + $0x378] sm:$0xff] }
 0x248   : > { %v4311_v32 = vmax.f32 %v4302_v59, 0.0  ;;  %v4355_v3 = vmax.f32 %v4346_v20, 0.0 }
 0x249   : > { %v4224_v27 = vmax.f32 %v4216_v40, 0.0  ;;  %v4268_v60 = vmax.f32 %v4260_v41, 0.0 }
 0x24a   : > { %v9847_v43 = vmax.f32 %v4311_v32, %v4355_v3 }
 0x24b   : > { %v9849_v2 = vmax.f32 %v4224_v27, %v4268_v60  ;;  %v9861_v27 = vpop.permute.xlu0 %8399 }
 0x24d   : > { %v4303_v44 = vpop.f32.mrf.mxu2  ;;  %v4347_v54 = vpop.f32.mrf.mxu3 }
 0x24e   : > { %v4304_v22 = vadd.f32 %v9651_v36, %v4303_v44  ;;  %v4218_v26 = vpop.f32.mrf.mxu0  ;;  %v4348_v59 = vadd.f32 %v9651_v36, %v4347_v54  ;;  %v4262_v20 = vpop.f32.mrf.mxu1 }
 0x24f   : > { %v4219_v58 = vadd.f32 %v9651_v36, %v4218_v26  ;;  %v4263_v32 = vadd.f32 %v9651_v36, %v4262_v20 }
 0x250   : > { %v4312_v40 = vmax.f32 %v4304_v22, 0.0  ;;  %v4356_v41 = vmax.f32 %v4348_v59, 0.0  ;;  %7864 = vmatmul.msk.bf16.gmra.mxu0 %vm2609_vm1, %v8326_v57 }
 0x251   : > { %v4225_v3 = vmax.f32 %v4219_v58, 0.0  ;;  %7878 = vmatmul.msk.bf16.gmra.mxu1 %vm2609_vm1, %v8328_v29  ;;  %v4269_v60 = vmax.f32 %v4263_v32, 0.0 }
 0x252   : > { %7892 = vmatmul.msk.bf16.gmra.mxu2 %vm2609_vm1, %v8330_v10  ;;  %7906 = vmatmul.msk.bf16.gmra.mxu3 %vm2609_vm1, %v8332_v31  ;;  %v9865_v44 = vmax.f32 %v4312_v40, %v4356_v41 }
 0x253   : > { %v9867_v54 = vmax.f32 %v4225_v3, %v4269_v60  ;;  %v8385_v60 = vpop.permute.xlu1 %8384 }
 0x255   : > { %v4306_v22 = vpop.f32.mrf.mxu2  ;;  %v4350_v59 = vpop.f32.mrf.mxu3 }
 0x256   : > { %v4307_v26 = vadd.f32 %v9651_v36, %v4306_v22  ;;  %v4220_v58 = vpop.f32.mrf.mxu0  ;;  %v4351_v57 = vadd.f32 %v9651_v36, %v4350_v59  ;;  %v4264_v20 = vpop.f32.mrf.mxu1 }
 0x257   : > { %v4221_v29 = vadd.f32 %v9651_v36, %v4220_v58  ;;  %v4265_v10 = vadd.f32 %v9651_v36, %v4264_v20  ;;  %v9875_v22 = vpop.permute.xlu0 %8404  ;;  %v8335_v58 = vld [vmem:[%s9189_s25 + $0x390] sm:$0xff]  ;;  %v8337_v20 = vld [vmem:[%s9189_s25 + $0x3a0] sm:$0xff] }
 0x258   : > { %v4313_v32 = vmax.f32 %v4307_v26, 0.0  ;;  %v4357_v31 = vmax.f32 %v4351_v57, 0.0 }
 0x259   : > { %v4226_v40 = vmax.f32 %v4221_v29, 0.0  ;;  %v4270_v41 = vmax.f32 %v4265_v10, 0.0  ;;  %v8386_v10 = vunpack.i.l.bf16 %v8385_v60 }
 0x25a   : > { %v9873_v3 = vmax.f32 %v4313_v32, %v4357_v31 }
 0x25b   : > { %v9877_v19 = vmax.f32 %v4226_v40, %v4270_v41  ;;  %v8430_v0 = vpop.permute.xlu2 %8429  ;;  %v8387_v40 = vunpack.i.h.bf16 %v8385_v60  ;;  %v10924_v60 = vmax.f32 %v9322_v16, %v9426_v45 }
 0x25c   : > { %v8431_v41 = vunpack.i.l.bf16 %v8430_v0 }
 0x25d   : > { %v4308_v59 = vpop.f32.mrf.mxu2  ;;  %v4352_v51 = vpop.f32.mrf.mxu3 }
 0x25e   : > { %v4309_v26 = vadd.f32 %v9651_v36, %v4308_v59  ;;  %v4389_v55 = vpop.f32.mrf.mxu0  ;;  %v4353_v57 = vadd.f32 %v9651_v36, %v4352_v51  ;;  %v4433_v29 = vpop.f32.mrf.mxu1  ;;  %v8432_v59 = vunpack.i.h.bf16 %v8430_v0  ;;  %v10925_v0 = vmax.f32 %v9330_v30, %v9443_v5 }
 0x25f   : > { %v4390_v51 = vadd.f32 %v9651_v36, %v4389_v55 }
 0x260   : > { %v4314_v32 = vmax.f32 %v4309_v26, 0.0  ;;  %v4358_v31 = vmax.f32 %v4353_v57, 0.0  ;;  %7919 = vmatmul.msk.bf16.vlgmr.msra.gmra.mxu0 %vm2609_vm1, %v8333_v8  ;;  %v4434_v26 = vadd.f32 %v9651_v36, %v4433_v29  ;;  %v8382_v57 = vunpack.i.h.bf16 %v9809_v38 }
 0x261   : > { %7933 = vmatmul.msk.bf16.vlgmr.msra.gmra.mxu1 %vm2609_vm1, %v8335_v58  ;;  %v8381_v8 = vunpack.i.l.bf16 %v9809_v38  ;;  %v5658_v58 = vsel %vm5655_vm3, %v10924_v60, %v8386_v10  ;;  %v5659_v55 = vsel %vm5655_vm3, %v10925_v0, %v8387_v40  ;;  %v4399_v39 = vmax.f32 %v4390_v51, 0.0 }
 0x262   : > { %7947 = vmatmul.msk.bf16.vlgmr.msra.gmra.mxu2 %vm2609_vm1, %v8337_v20  ;;  %7961 = vmatmul.msk.bf16.vlgmr.msra.gmra.mxu3 %vm2609_vm1, %v8339_v53  ;;  %v9889_v23 = vmax.f32 %v4314_v32, %v4358_v31  ;;  %v5663_v29 = vsel %vm5660_vm2, %v5658_v58, %v8431_v41  ;;  %v5664_v38 = vsel %vm5660_vm2, %v5659_v55, %v8432_v59  ;;  %v4443_v16 = vmax.f32 %v4434_v26, 0.0 }
 0x263   : > { %v8435_v20 = vpop.permute.xlu2 %8434  ;;  %v8410_v53 = vpop.permute.xlu0 %8409  ;;  %v10926_v0 = vmax.f32 %v9294_v47, %v9398_v63  ;;  %v10927_v55 = vmax.f32 %v9306_v61, %v9410_v14  ;;  %v8334_v63 = vld [vmem:[%s9189_s25 + $0x388] sm:$0xff]  ;;  %v8336_v61 = vld [vmem:[%s9189_s25 + $0x398] sm:$0xff] }
 0x264   : > { %v8437_v32 = vunpack.i.h.bf16 %v8435_v20  ;;  %v8436_v31 = vunpack.i.l.bf16 %v8435_v20  ;;  %v8412_v45 = vunpack.i.h.bf16 %v8410_v53  ;;  %v8411_v5 = vunpack.i.l.bf16 %v8410_v53 }
 0x265   : > { %v4477_v35 = vpop.f32.mrf.mxu2  ;;  %v4521_v49 = vpop.f32.mrf.mxu3  ;;  %v5656_v53 = vsel %vm5655_vm3, %v10926_v0, %v8381_v8 }
 0x266   : > { %v4391_v10 = vpop.f32.mrf.mxu0  ;;  %v4435_v60 = vpop.f32.mrf.mxu1  ;;  %v9906_v12 = vsel %vm5665_vm4, %v5663_v29, %v8436_v31  ;;  %v9909_v30 = vsel %vm5665_vm4, %v5664_v38, %v8437_v32  ;;  %v4478_v59 = vadd.f32 %v9651_v36, %v4477_v35  ;;  %v4522_v51 = vadd.f32 %v9651_v36, %v4521_v49 }
 0x267   : > { %v4392_v40 = vadd.f32 %v9651_v36, %v4391_v10  ;;  %v4436_v58 = vadd.f32 %v9651_v36, %v4435_v60  ;;  %v5657_v29 = vsel %vm5655_vm3, %v10927_v55, %v8382_v57  ;;  %v5515_v31 = vmax.f32 %v4399_v39, %v4443_v16 }
 0x268   : > { %v5661_v49 = vsel %vm5660_vm2, %v5656_v53, %v8411_v5  ;;  %v5662_v38 = vsel %vm5660_vm2, %v5657_v29, %v8412_v45  ;;  %v4487_v14 = vmax.f32 %v4478_v59, 0.0  ;;  %v4531_v57 = vmax.f32 %v4522_v51, 0.0  ;;  %v8338_v5 = vld [vmem:[%s9189_s25 + $0x3a8] sm:$0xff] }
 0x269   : > { %v4400_v26 = vmax.f32 %v4392_v40, 0.0  ;;  %v4444_v10 = vmax.f32 %v4436_v58, 0.0  ;;  %v9942_v55 = vmax.f32 %v9774_v25, %v5515_v31 }
 0x26a   : > { %v8415_v20 = vpop.permute.xlu1 %8414  ;;  %v5527_v29 = vmax.f32 %v4487_v14, %v4531_v57 }
 0x26b   : > { %v8417_v32 = vunpack.i.h.bf16 %v8415_v20  ;;  %v8416_v35 = vunpack.i.l.bf16 %v8415_v20  ;;  %v5516_v8 = vmax.f32 %v4400_v26, %v4444_v10  ;;  %v8340_v20 = vld [vmem:[%s9189_s25 + $0x3b8] sm:$0xff]  ;;  %10928 = vst [vmem:[#allocation10_spill] sm:$0xff] %v9942_v55 }
 0x26d   : > { %v9928_v60 = vsel %vm5665_vm4, %v5661_v49, %v8416_v35  ;;  %v9931_v47 = vsel %vm5665_vm4, %v5662_v38, %v8417_v32  ;;  %v4479_v39 = vpop.f32.mrf.mxu2  ;;  %v4523_v16 = vpop.f32.mrf.mxu3  ;;  %v9945_v59 = vmax.f32 %v9790_v7, %v5516_v8  ;;  %v9960_v49 = vmax.f32 %v9787_v37, %v5527_v29  ;;  %v8343_v29 = vld [vmem:[%s9189_s25 + $0x3d0] sm:$0xff] }
 0x26e   : > { %v4480_v45 = vadd.f32 %v9651_v36, %v4479_v39  ;;  %v4524_v58 = vadd.f32 %v9651_v36, %v4523_v16  ;;  %v4394_v0 = vpop.f32.mrf.mxu0  ;;  %v4438_v53 = vpop.f32.mrf.mxu1 }
 0x26f   : > { %10929 = vst [vmem:[#allocation11_spill] sm:$0xff] %v9945_v59  ;;  %v8498_v32 = vpack.i.bf16 %v9945_v59, %v9942_v55  ;;  %v4395_v25 = vadd.f32 %v9651_v36, %v4394_v0  ;;  %v4439_v7 = vadd.f32 %v9651_v36, %v4438_v53 }
 0x270   : > { %v4488_v51 = vmax.f32 %v4480_v45, 0.0  ;;  %v4532_v26 = vmax.f32 %v4524_v58, 0.0  ;;  %7920 = vmatmul.msk.bf16.gmra.mxu0 %vm2609_vm1, %v8334_v63  ;;  %v9965_v63 = vld [vmem:[%s10894_s3 + $0x18] sm:$0xff] }
 0x271   : > { %7934 = vmatmul.msk.bf16.gmra.mxu1 %vm2609_vm1, %v8336_v61  ;;  %8499 = vrot.lane.b32.xlu1 %v8498_v32, %s8820_s30  ;;  %v4401_v61 = vmax.f32 %v4395_v25, 0.0  ;;  %v4445_v14 = vmax.f32 %v4439_v7, 0.0  ;;  %v8345_v25 = vld [vmem:[%s9189_s25 + $0x3e0] sm:$0xff]  ;;  %v8347_v7 = vld [vmem:[%s9189_s25 + $0x3f0] sm:$0xff] }
 0x272   : > { %7948 = vmatmul.msk.bf16.gmra.mxu2 %vm2609_vm1, %v8338_v5  ;;  %7962 = vmatmul.msk.bf16.gmra.mxu3 %vm2609_vm1, %v8340_v20  ;;  %v5528_v35 = vmax.f32 %v4488_v51, %v4532_v26  ;;  %v9981_v20 = vld [vmem:[%s10894_s3 + $0x10] sm:$0xff]  ;;  %v9988_v53 = vpop.permute.xlu1 %8424  ;;  %v8341_v26 = vld [vmem:[%s9189_s25 + $0x3c0] sm:$0xff] }
 0x273   : > { %5707 = vmatpush.bf16.msra.mxu0 %v9965_v63  ;;  %5794 = vmatpush.bf16.msra.mxu1 %v9965_v63  ;;  %v5517_v45 = vmax.f32 %v4401_v61, %v4445_v14 }
 0x274   : > { %v9957_v31 = vmax.f32 %v9805_v42, %v5528_v35  ;;  %5881 = vmatpush.bf16.msra.mxu2 %v9965_v63  ;;  %5968 = vmatpush.bf16.msra.mxu3 %v9965_v63 }
 0x275   : > { %v4482_v38 = vpop.f32.mrf.mxu2  ;;  %v4526_v10 = vpop.f32.mrf.mxu3  ;;  %v10004_v61 = vmax.f32 %v9807_v18, %v5517_v45 }
 0x276   : > { %v4396_v57 = vpop.f32.mrf.mxu0  ;;  %v4440_v8 = vpop.f32.mrf.mxu1  ;;  %v9971_v42 = vpack.i.bf16 %v9957_v31, %v9960_v49  ;;  %v4483_v58 = vadd.f32 %v9651_v36, %v4482_v38  ;;  %v4527_v51 = vadd.f32 %v9651_v36, %v4526_v10  ;;  %v10000_v38 = vld [vmem:[%s10894_s3 + $0x8] sm:$0xff] }
 0x277   : > { %v4397_v39 = vadd.f32 %v9651_v36, %v4396_v57  ;;  %v4441_v16 = vadd.f32 %v9651_v36, %v4440_v8  ;;  %5708 = vmatpush.bf16.msra.mxu0 %v9981_v20  ;;  %5795 = vmatpush.bf16.msra.mxu1 %v9981_v20  ;;  %10930 = vst [vmem:[#allocation12_spill] sm:$0xff] %v10004_v61 }
 0x278   : > { %8504 = vrot.lane.b32.xlu2 %v9971_v42, %s8821_s12  ;;  %5882 = vmatpush.bf16.msra.mxu2 %v9981_v20 }
 0x279   : > { %v4402_v37 = vmax.f32 %v4397_v39, 0.0  ;;  %v4446_v5 = vmax.f32 %v4441_v16, 0.0  ;;  %8509 = vrot.lane.b32.xlu1 %v9971_v42, %s8820_s30  ;;  %5969 = vmatpush.bf16.msra.mxu3 %v9981_v20  ;;  %v4489_v16 = vmax.f32 %v4483_v58, 0.0 }
 0x27b   : > { %v5518_v0 = vmax.f32 %v4402_v37, %v4446_v5  ;;  %5709 = vmatpush.bf16.msra.mxu0 %v10000_v38  ;;  %v4533_v37 = vmax.f32 %v4527_v51, 0.0  ;;  %5796 = vmatpush.bf16.msra.mxu1 %v10000_v38 }
 0x27c   : > { %5883 = vmatpush.bf16.msra.mxu2 %v10000_v38 }
 0x27d   : > { %v4484_v32 = vpop.f32.mrf.mxu2  ;;  %v4528_v35 = vpop.f32.mrf.mxu3  ;;  %v10009_v39 = vmax.f32 %v9817_v13, %v5518_v0  ;;  %v10021_v13 = vld [vmem:[%s10894_s3] sm:$0xff]  ;;  %v5529_v58 = vmax.f32 %v4489_v16, %v4533_v37  ;;  %5970 = vmatpush.bf16.msra.mxu3 %v10000_v38 }
 0x27e   : > { %v4485_v10 = vadd.f32 %v9651_v36, %v4484_v32  ;;  %v4529_v14 = vadd.f32 %v9651_v36, %v4528_v35  ;;  %v4565_v57 = vpop.f32.mrf.mxu0  ;;  %v4609_v8 = vpop.f32.mrf.mxu1 }
 0x27f   : > { %10931 = vst [vmem:[#allocation13_spill] sm:$0xff] %v10009_v39  ;;  %v8513_v18 = vpack.i.bf16 %v10009_v39, %v10004_v61  ;;  %5710 = vmatpush.bf16.msra.mxu0 %v10021_v13  ;;  %v4566_v0 = vadd.f32 %v9651_v36, %v4565_v57  ;;  %v4610_v51 = vadd.f32 %v9651_v36, %v4609_v8 }
 0x280   : > { %v4490_v5 = vmax.f32 %v4485_v10, 0.0  ;;  %v4534_v41 = vmax.f32 %v4529_v14, 0.0  ;;  %7975 = vmatmul.msk.bf16.vlgmr.msrb.gmra.mxu0 %vm2609_vm1, %v8341_v26  ;;  %5797 = vmatpush.bf16.msra.mxu1 %v10021_v13  ;;  %v10041_v10 = vpop.permute.xlu1 %8444 }
 0x281   : > { %7989 = vmatmul.msk.bf16.vlgmr.msrb.gmra.mxu1 %vm2609_vm1, %v8343_v29  ;;  %8514 = vrot.lane.b32.xlu1 %v8513_v18, %s8820_s30  ;;  %v4575_v14 = vmax.f32 %v4566_v0, 0.0  ;;  %v4619_v57 = vmax.f32 %v4610_v51, 0.0  ;;  %v8344_v0 = vld [vmem:[%s9189_s25 + $0x3d8] sm:$0xff] }
 0x282   : > { %8003 = vmatmul.msk.bf16.vlgmr.msrb.gmra.mxu2 %vm2609_vm1, %v8345_v25  ;;  %8017 = vmatmul.msk.bf16.vlgmr.msrb.gmra.mxu3 %vm2609_vm1, %v8347_v7  ;;  %v5530_v45 = vmax.f32 %v4490_v5, %v4534_v41  ;;  %v10039_v7 = vmax.f32 %v9815_v11, %v5529_v58  ;;  %v8342_v58 = vld [vmem:[%s9189_s25 + $0x3c8] sm:$0xff] }
 0x283   : > { %6051 = vmatpush.bf16.msrb.mxu0 %v9965_v63  ;;  %5884 = vmatpush.bf16.msra.mxu2 %v10021_v13  ;;  %v5539_v18 = vmax.f32 %v4575_v14, %v4619_v57 }
 0x284   : > { %v10032_v41 = vmax.f32 %v9833_v28, %v5530_v45  ;;  %6134 = vmatpush.bf16.msrb.mxu1 %v9965_v63  ;;  %10932 = vst [vmem:[#allocation14_spill] sm:$0xff] %v10039_v7  ;;  %5971 = vmatpush.bf16.msra.mxu3 %v10021_v13  ;;  %v10044_v28 = vpop.permute.xlu2 %8449 }
 0x285   : > { %v4653_v26 = vpop.f32.mrf.mxu2  ;;  %v4697_v29 = vpop.f32.mrf.mxu3 }
 0x286   : > { %v4567_v32 = vpop.f32.mrf.mxu0  ;;  %v4611_v25 = vpop.f32.mrf.mxu1  ;;  %v4654_v8 = vadd.f32 %v9651_v36, %v4653_v26  ;;  %v4698_v16 = vadd.f32 %v9651_v36, %v4697_v29  ;;  %v10053_v5 = vpack.i.bf16 %v10032_v41, %v10039_v7  ;;  %v8346_v29 = vld [vmem:[%s9189_s25 + $0x3e8] sm:$0xff] }
 0x287   : > { %v4568_v35 = vadd.f32 %v9651_v36, %v4567_v32  ;;  %6052 = vmatpush.bf16.msrb.mxu0 %v9981_v20  ;;  %v4612_v37 = vadd.f32 %v9651_v36, %v4611_v25  ;;  %6221 = vmatpush.bf16.msrb.mxu2 %v9965_v63  ;;  %v8348_v32 = vld [vmem:[%s9189_s25 + $0x3f8] sm:$0xff]  ;;  %v10070_v25 = vld [vmem:[%s10893_s2] ss:$0 sm:$0xff] }
 0x288   : > { %6304 = vmatpush.bf16.msrb.mxu3 %v9965_v63  ;;  %6135 = vmatpush.bf16.msrb.mxu1 %v9981_v20  ;;  %v4663_v51 = vmax.f32 %v4654_v8, 0.0  ;;  %v4707_v36 = vmax.f32 %v4698_v16, 0.0  ;;  %v8392_v8 = vunpack.i.h.bf16 %v9819_v17  ;;  %v8391_v16 = vunpack.i.l.bf16 %v9819_v17  ;;  %v8460_v39 = vpop.permute.xlu1 %8459 }
 0x289   : > { %v4576_v11 = vmax.f32 %v4568_v35, 0.0  ;;  %v4620_v45 = vmax.f32 %v4612_v37, 0.0  ;;  %8519 = vrot.lane.b32.xlu2 %v10053_v5, %s8821_s12  ;;  %8524 = vrot.lane.b32.xlu1 %v10053_v5, %s8820_s30  ;;  %v8396_v17 = vunpack.i.l.bf16 %v9844_v24 }
 0x28a   : > { %v5551_v59 = vmax.f32 %v4663_v51, %v4707_v36  ;;  %v5770_v51 = vsel %vm5655_vm3, %v9429_v46, %v8391_v16  ;;  %v8462_v36 = vunpack.i.h.bf16 %v8460_v39  ;;  %v8451_v46 = vunpack.i.l.bf16 %v10044_v28 }
 0x28b   : > { %6053 = vmatpush.bf16.msrb.mxu0 %v10000_v38  ;;  %v5540_v35 = vmax.f32 %v4576_v11, %v4620_v45  ;;  %6222 = vmatpush.bf16.msrb.mxu2 %v9981_v20  ;;  %v8397_v11 = vunpack.i.h.bf16 %v9844_v24  ;;  %v10080_v45 = vmax.f32 %v9837_v6, %v5539_v18  ;;  %v8426_v6 = vunpack.i.l.bf16 %v9988_v53 }
 0x28c   : > { %6305 = vmatpush.bf16.msrb.mxu3 %v9981_v20  ;;  %6136 = vmatpush.bf16.msrb.mxu1 %v10000_v38  ;;  %v8465_v18 = vpop.permute.xlu2 %8464 }
 0x28d   : > { %v4655_v26 = vpop.f32.mrf.mxu2  ;;  %v4699_v57 = vpop.f32.mrf.mxu3 }
 0x28e   : > { %v4656_v14 = vadd.f32 %v10070_v25, %v4655_v26  ;;  %v4570_v37 = vpop.f32.mrf.mxu0  ;;  %v4700_v40 = vadd.f32 %v10070_v25, %v4699_v57  ;;  %v4614_v61 = vpop.f32.mrf.mxu1  ;;  %v10083_v26 = vmax.f32 %v9849_v2, %v5540_v35  ;;  %v8427_v57 = vunpack.i.h.bf16 %v9988_v53 }
 0x28f   : > { %6054 = vmatpush.bf16.msrb.mxu0 %v10021_v13  ;;  %6223 = vmatpush.bf16.msrb.mxu2 %v10000_v38  ;;  %v5771_v53 = vsel %vm5655_vm3, %v9432_v48, %v8392_v8  ;;  %v8467_v35 = vunpack.i.h.bf16 %v8465_v18 }
 0x290   : > { %v4664_v55 = vmax.f32 %v4656_v14, 0.0  ;;  %7976 = vmatmul.msk.bf16.gmra.mxu0 %vm2609_vm1, %v8342_v58  ;;  %v4708_v7 = vmax.f32 %v4700_v40, 0.0  ;;  %v8538_v2 = vpack.i.bf16 %v10083_v26, %v10080_v45  ;;  %6306 = vmatpush.bf16.msrb.mxu3 %v10000_v38  ;;  %v8461_v58 = vunpack.i.l.bf16 %v8460_v39 }
 0x291   : > { %7990 = vmatmul.msk.bf16.gmra.mxu1 %vm2609_vm1, %v8344_v0  ;;  %v4571_v0 = vadd.f32 %v10070_v25, %v4570_v37  ;;  %v4615_v40 = vadd.f32 %v10070_v25, %v4614_v61  ;;  %v5857_v61 = vsel %vm5655_vm3, %v9477_v15, %v8396_v17  ;;  %v5774_v39 = vsel %vm5660_vm2, %v5770_v51, %v8426_v6 }
 0x292   : > { %8004 = vmatmul.msk.bf16.gmra.mxu2 %vm2609_vm1, %v8346_v29  ;;  %8018 = vmatmul.msk.bf16.gmra.mxu3 %vm2609_vm1, %v8348_v32  ;;  %v5552_v24 = vmax.f32 %v4664_v55, %v4708_v7  ;;  %v5858_v55 = vsel %vm5655_vm3, %v9482_v9, %v8397_v11  ;;  %v8452_v7 = vunpack.i.h.bf16 %v10044_v28  ;;  %v5775_v32 = vsel %vm5660_vm2, %v5771_v53, %v8427_v57 }
 0x293   : > { %6137 = vmatpush.bf16.msrb.mxu1 %v10021_v13  ;;  %8539 = vrot.lane.b32.xlu1 %v8538_v2, %s8820_s30  ;;  %v5861_v15 = vsel %vm5660_vm2, %v5857_v61, %v8461_v58  ;;  %v5555_v9 = vmax.f32 %v9847_v43, %v5551_v59  ;;  %v4577_v8 = vmax.f32 %v4571_v0, 0.0  ;;  %v4621_v16 = vmax.f32 %v4615_v40, 0.0 }
 0x294   : > { %8529 = vrot.lane.b32.xlu2 %v8538_v2, %s8821_s12  ;;  %8534 = vrot.lane.b32.xlu0 %v8538_v2, %s8819_s27  ;;  %v5556_v48 = vmax.f32 %v9865_v44, %v5552_v24  ;;  %v5862_v44 = vsel %vm5660_vm2, %v5858_v55, %v8462_v36  ;;  %v8466_v6 = vunpack.i.l.bf16 %v8465_v18  ;;  %v5778_v58 = vsel %vm5665_vm4, %v5774_v39, %v8451_v46  ;;  %v10130_v61 = vpop.permute.xlu2 %8474 }
 0x295   : > { %v4658_v29 = vpop.f32.mrf.mxu2  ;;  %v4702_v14 = vpop.f32.mrf.mxu3  ;;  %6307 = vmatpush.bf16.msrb.mxu3 %v10021_v13  ;;  %6224 = vmatpush.bf16.msrb.mxu2 %v10021_v13  ;;  %v5779_v43 = vsel %vm5665_vm4, %v5775_v32, %v8452_v7  ;;  %v5866_v40 = vsel %vm5665_vm4, %v5862_v44, %v8467_v35  ;;  %v5541_v53 = vmax.f32 %v4577_v8, %v4621_v16  ;;  %v8402_v7 = vunpack.i.h.bf16 %v9861_v27 }
 0x296   : > { %v4572_v37 = vpop.f32.mrf.mxu0  ;;  %v4616_v11 = vpop.f32.mrf.mxu1  ;;  %v4659_v28 = vadd.f32 %v10070_v25, %v4658_v29  ;;  %v4703_v17 = vadd.f32 %v10070_v25, %v4702_v14  ;;  %v8543_v24 = vpack.i.bf16 %v5556_v48, %v5555_v9  ;;  %v5865_v0 = vsel %vm5665_vm4, %v5861_v15, %v8466_v6 }
 0x297   : > { %v4573_v57 = vadd.f32 %v10070_v25, %v4572_v37  ;;  %v4617_v2 = vadd.f32 %v10070_v25, %v4616_v11  ;;  %v5782_v48 = vpack.c.bf16 %v5779_v43, %v5778_v58  ;;  %v5869_v46 = vpack.c.bf16 %v5866_v40, %v5865_v0 }
 0x298   : > { %v4665_v36 = vmax.f32 %v4659_v28, 0.0  ;;  %v4709_v55 = vmax.f32 %v4703_v17, 0.0  ;;  %v10136_v14 = vmax.f32 %v9867_v54, %v5541_v53  ;;  %v10935_v28 = vpack.c.bf16 %v9931_v47, %v9928_v60 }
 0x299   : > { %v4578_v59 = vmax.f32 %v4573_v57, 0.0  ;;  %v4622_v51 = vmax.f32 %v4617_v2, 0.0  ;;  %v8401_v57 = vunpack.i.l.bf16 %v9861_v27  ;;  %v8407_v6 = vunpack.i.h.bf16 %v9875_v22  ;;  %v8485_v2 = vpop.permute.xlu1 %8484 }
 0x29a   : > { %10933 = vst [vmem:[#allocation15_spill] sm:$0xff] %v10136_v14  ;;  %v5553_v16 = vmax.f32 %v4665_v36, %v4709_v55  ;;  %v5773_v47 = vsel %vm5655_vm3, %v9465_v34, %v8402_v7  ;;  %v8406_v58 = vunpack.i.l.bf16 %v9875_v22  ;;  %v8447_v43 = vunpack.i.h.bf16 %v10041_v10 }
 0x29b   : > { %v5542_v18 = vmax.f32 %v4578_v59, %v4622_v51  ;;  %v8446_v59 = vunpack.i.l.bf16 %v10041_v10  ;;  %v8487_v27 = vunpack.i.h.bf16 %v8485_v2  ;;  %v5772_v22 = vsel %vm5655_vm3, %v9462_v33, %v8401_v57 }
 0x29c   : > { %8544 = vrot.lane.b32.xlu2 %v8543_v24, %s8821_s12  ;;  %8549 = vrot.lane.b32.xlu0 %v8543_v24, %s8819_s27  ;;  %v5557_v40 = vmax.f32 %v9873_v3, %v5553_v16  ;;  %v5860_v10 = vsel %vm5655_vm3, %v9510_v4, %v8407_v6  ;;  %v8477_v51 = vunpack.i.h.bf16 %v10130_v61  ;;  %v5859_v33 = vsel %vm5655_vm3, %v9505_v56, %v8406_v58 }
 0x29d   : > { %v4660_v29 = vpop.f32.mrf.mxu2  ;;  %v4704_v32 = vpop.f32.mrf.mxu3  ;;  %v10139_v37 = vmax.f32 %v9877_v19, %v5542_v18  ;;  %v8476_v18 = vunpack.i.l.bf16 %v10130_v61  ;;  %v5776_v4 = vsel %vm5660_vm2, %v5772_v22, %v8446_v59 }
 0x29e   : > { %v4661_v39 = vadd.f32 %v10070_v25, %v4660_v29  ;;  %v4741_v35 = vpop.f32.mrf.mxu0  ;;  %v4705_v15 = vadd.f32 %v10070_v25, %v4704_v32  ;;  %v4785_v8 = vpop.f32.mrf.mxu1  ;;  %v5864_v32 = vsel %vm5660_vm2, %v5860_v10, %v8487_v27 }
 0x29f   : > { %10934 = vst [vmem:[#allocation16_spill] sm:$0xff] %v10139_v37  ;;  %v4742_v9 = vadd.f32 %v10070_v25, %v4741_v35  ;;  %v4786_v44 = vadd.f32 %v10070_v25, %v4785_v8  ;;  %v10151_v19 = vpack.i.bf16 %v10139_v37, %v10136_v14  ;;  %v8490_v29 = vpop.permute.xlu2 %8489 }
 0x2a0   : > { %v4666_v11 = vmax.f32 %v4661_v39, 0.0  ;;  %8035 = vmatmul.msk.bf16.vlgmr.msra.gmra.mxu0 %vm5696_vm5, %v10935_v28  ;;  %v4710_v54 = vmax.f32 %v4705_v15, 0.0  ;;  %v8492_v35 = vunpack.i.h.bf16 %v8490_v29  ;;  %v8491_v15 = vunpack.i.l.bf16 %v8490_v29 }
 0x2a1   : > { %8037 = vmatmul.msk.bf16.vlgmr.msra.gmra.mxu1 %vm5696_vm5, %v5782_v48  ;;  %v4751_v17 = vmax.f32 %v4742_v9, 0.0  ;;  %6387 = vmatpush.bf16.msra.mxu0 %v9965_v63  ;;  %v4795_v60 = vmax.f32 %v4786_v44, 0.0  ;;  %v8486_v63 = vunpack.i.l.bf16 %v8485_v2  ;;  %v5777_v48 = vsel %vm5660_vm2, %v5773_v47, %v8447_v43 }
 0x2a2   : > { %8039 = vmatmul.msk.bf16.vlgmr.msra.gmra.mxu2 %vm5696_vm5, %v5869_v46  ;;  %v5554_v24 = vmax.f32 %v4666_v11, %v4710_v54  ;;  %v5780_v9 = vsel %vm5665_vm4, %v5776_v4, %v8476_v18  ;;  %v5781_v8 = vsel %vm5665_vm4, %v5777_v48, %v8477_v51  ;;  %v5868_v11 = vsel %vm5665_vm4, %v5864_v32, %v8492_v35 }
 0x2a3   : > { %v10162_v0 = vmax.f32 %v4751_v17, %v4795_v60  ;;  %v5863_v39 = vsel %vm5660_vm2, %v5859_v33, %v8486_v63  ;;  %v10936_v60 = vpack.c.bf16 %v9909_v30, %v9906_v12 }
 0x2a4   : > { %8554 = vrot.lane.b32.xlu2 %v10151_v19, %s8821_s12  ;;  %8559 = vrot.lane.b32.xlu0 %v10151_v19, %s8819_s27  ;;  %v5558_v53 = vmax.f32 %v9889_v23, %v5554_v24  ;;  %v5867_v56 = vsel %vm5665_vm4, %v5863_v39, %v8491_v15 }
 0x2a5   : > { %v4829_v34 = vpop.f32.mrf.mxu2  ;;  %6388 = vmatpush.bf16.msra.mxu0 %v9981_v20  ;;  %v4873_v55 = vpop.f32.mrf.mxu3  ;;  %v5870_v6 = vpack.c.bf16 %v5868_v11, %v5867_v56 }
 0x2a6   : > { %v4830_v36 = vadd.f32 %v10070_v25, %v4829_v34  ;;  %v10177_v3 = vpop.f32.mrf.mxu0  ;;  %v4874_v23 = vadd.f32 %v10070_v25, %v4873_v55  ;;  %v10181_v7 = vpop.f32.mrf.mxu1  ;;  %v10183_v20 = vpack.i.bf16 %v5558_v53, %v5557_v40 }
 0x2a7   : > { %v8420_v11 = vpop.permute.xlu0 %8419 }
 0x2a8   : > { %v4839_v46 = vmax.f32 %v4830_v36, 0.0  ;;  %v4883_v61 = vmax.f32 %v4874_v23, 0.0 }
 0x2a9   : > { %6389 = vmatpush.bf16.msra.mxu0 %v10000_v38  ;;  %v5783_v38 = vpack.c.bf16 %v5781_v8, %v5780_v9 }
 0x2aa   : > { %v10194_v16 = vmax.f32 %v4839_v46, %v4883_v61 }
 0x2ac   : > { %8594 = vrot.lane.b32.xlu0 %v10183_v20, %s8819_s27 }
 0x2ad   : > { %v10200_v44 = vpop.f32.mrf.mxu2  ;;  %6390 = vmatpush.bf16.msra.mxu0 %v10021_v13  ;;  %v10203_v28 = vpop.f32.mrf.mxu3 }
 0x2ae   : > { %v4746_v54 = vpop.f32.mrf.mxu0  ;;  %v4790_v57 = vpop.f32.mrf.mxu1 }
 0x2af   : > { %v4747_v17 = vadd.f32 %v10070_v25, %v4746_v54  ;;  %v4791_v2 = vadd.f32 %v10070_v25, %v4790_v57 }
 0x2b0   : > { %8036 = vmatmul.msk.bf16.gmra.mxu0 %vm5696_vm5, %v10936_v60 }
 0x2b1   : > { %8038 = vmatmul.msk.bf16.gmra.mxu1 %vm5696_vm5, %v5783_v38  ;;  %v4753_v47 = vmax.f32 %v4747_v17, 0.0  ;;  %v4797_v13 = vmax.f32 %v4791_v2, 0.0 }
 0x2b2   : > { %8040 = vmatmul.msk.bf16.gmra.mxu2 %vm5696_vm5, %v5870_v6 }
 0x2b3   : > { %v10213_v24 = vmax.f32 %v4753_v47, %v4797_v13 }
 0x2b4   : > { %8619 = vrot.lane.b32.xlu0 %v9971_v42, %s8819_s27 }
 0x2b5   : > { %v4834_v58 = vpop.f32.mrf.mxu2  ;;  %v4878_v59 = vpop.f32.mrf.mxu3 }
 0x2b6   : > { %v4835_v43 = vadd.f32 %v10070_v25, %v4834_v58  ;;  %v10218_v27 = vpop.f32.mrf.mxu0  ;;  %v4879_v12 = vadd.f32 %v10070_v25, %v4878_v59  ;;  %v10221_v30 = vpop.f32.mrf.mxu1 }
 0x2b8   : > { %v4841_v63 = vmax.f32 %v4835_v43, 0.0  ;;  %v4885_v40 = vmax.f32 %v4879_v12, 0.0  ;;  %v10257_v43 = vpop.permute.xlu0 %8439 }
 0x2ba   : > { %v10223_v34 = vmax.f32 %v4841_v63, %v4885_v40 }
 0x2bc   : > { %8634 = vrot.lane.b32.xlu0 %v10053_v5, %s8819_s27 }
 0x2bd   : > { %v10227_v53 = vpop.f32.mrf.mxu2  ;;  %v10229_v42 = vpop.f32.mrf.mxu3 }
 0x2be   : > { %v4917_v22 = vpop.f32.mrf.mxu0  ;;  %v4961_v51 = vpop.f32.mrf.mxu1 }
 0x2bf   : > { %v4918_v10 = vadd.f32 %v10070_v25, %v4917_v22  ;;  %v4962_v36 = vadd.f32 %v10070_v25, %v4961_v51 }
 0x2c1   : > { %v4927_v55 = vmax.f32 %v4918_v10, 0.0  ;;  %v4971_v18 = vmax.f32 %v4962_v36, 0.0 }
 0x2c3   : > { %v10233_v29 = vmax.f32 %v4927_v55, %v4971_v18  ;;  %v8455_v18 = vpop.permute.xlu0 %8454 }
 0x2c5   : > { %v5005_v23 = vpop.f32.mrf.mxu2  ;;  %v5049_v4 = vpop.f32.mrf.mxu3 }
 0x2c6   : > { %v5006_v33 = vadd.f32 %v10070_v25, %v5005_v23  ;;  %v10236_v48 = vpop.f32.mrf.mxu0  ;;  %v5050_v5 = vadd.f32 %v10070_v25, %v5049_v4  ;;  %v10239_v46 = vpop.f32.mrf.mxu1 }
 0x2c8   : > { %v5015_v39 = vmax.f32 %v5006_v33, 0.0  ;;  %v5059_v32 = vmax.f32 %v5050_v5, 0.0  ;;  %v8422_v5 = vunpack.i.h.bf16 %v8420_v11 }
 0x2ca   : > { %v10241_v61 = vmax.f32 %v5015_v39, %v5059_v32  ;;  %v8421_v39 = vunpack.i.l.bf16 %v8420_v11 }
 0x2cd   : > { %v10243_v35 = vpop.f32.mrf.mxu2  ;;  %v10245_v15 = vpop.f32.mrf.mxu3 }
 0x2ce   : > { %v4922_v9 = vpop.f32.mrf.mxu0  ;;  %v4966_v56 = vpop.f32.mrf.mxu1 }
 0x2cf   : > { %v4923_v8 = vadd.f32 %v10070_v25, %v4922_v9  ;;  %v4967_v38 = vadd.f32 %v10070_v25, %v4966_v56 }
 0x2d1   : > { %v4929_v54 = vmax.f32 %v4923_v8, 0.0  ;;  %v4973_v17 = vmax.f32 %v4967_v38, 0.0 }
 0x2d2   : > { %v8505_v40 = vpop.permute.xlu2 %8504 }
 0x2d3   : > { %v10249_v57 = vmax.f32 %v4929_v54, %v4973_v17  ;;  %v8506_v11 = vunpack.i.l.bf16 %v8505_v40 }
 0x2d5   : > { %v5010_v6 = vpop.f32.mrf.mxu2  ;;  %v5054_v60 = vpop.f32.mrf.mxu3 }
 0x2d6   : > { %v5011_v2 = vadd.f32 %v10070_v25, %v5010_v6  ;;  %v10252_v47 = vpop.f32.mrf.mxu0  ;;  %v5055_v13 = vadd.f32 %v10070_v25, %v5054_v60  ;;  %v10255_v58 = vpop.f32.mrf.mxu1  ;;  %v5944_v60 = vsel %vm5655_vm3, %v9641_v62, %v8421_v39 }
 0x2d8   : > { %v5017_v59 = vmax.f32 %v5011_v2, 0.0  ;;  %v5061_v12 = vmax.f32 %v5055_v13, 0.0  ;;  %v5945_v2 = vsel %vm5655_vm3, %v9646_v52, %v8422_v5  ;;  %v8507_v13 = vunpack.i.h.bf16 %v8505_v40 }
 0x2d9   : > { %v4876_v52 = vadd.f32 %v10070_v25, %v10203_v28 }
 0x2da   : > { %v10259_v63 = vmax.f32 %v5017_v59, %v5061_v12 }
 0x2dd   : > { %v10261_v22 = vpop.f32.mrf.mxu2  ;;  %v10263_v10 = vpop.f32.mrf.mxu3 }
 0x2de   : > { %v5093_v51 = vpop.f32.mrf.mxu0  ;;  %v5137_v55 = vpop.f32.mrf.mxu1 }
 0x2df   : > { %v5094_v36 = vadd.f32 %v10070_v25, %v5093_v51  ;;  %v5138_v23 = vadd.f32 %v10070_v25, %v5137_v55  ;;  %v8457_v51 = vunpack.i.h.bf16 %v8455_v18 }
 0x2e1   : > { %v5103_v33 = vmax.f32 %v5094_v36, 0.0  ;;  %v5147_v4 = vmax.f32 %v5138_v23, 0.0  ;;  %v8456_v36 = vunpack.i.l.bf16 %v8455_v18 }
 0x2e3   : > { %v10267_v32 = vmax.f32 %v5103_v33, %v5147_v4  ;;  %v8500_v9 = vpop.permute.xlu1 %8499  ;;  %v10271_v38 = vpop.permute.xlu2 %8519  ;;  %v4832_v33 = vadd.f32 %v10070_v25, %v10200_v44  ;;  %v6027_v44 = vsel %vm5655_vm3, %v9667_v50, %v8456_v36 }
 0x2e4   : > { %v8502_v54 = vunpack.i.h.bf16 %v8500_v9  ;;  %v8501_v17 = vunpack.i.l.bf16 %v8500_v9  ;;  %v10289_v4 = vpop.permute.xlu0 %8469  ;;  %v6028_v9 = vsel %vm5655_vm3, %v9670_v21, %v8457_v51 }
 0x2e5   : > { %v5181_v8 = vpop.f32.mrf.mxu2  ;;  %v5225_v6 = vpop.f32.mrf.mxu3  ;;  %v4840_v28 = vmax.f32 %v4832_v33, 0.0 }
 0x2e6   : > { %v10277_v59 = vpop.f32.mrf.mxu0  ;;  %v10279_v12 = vpop.f32.mrf.mxu1  ;;  %v5948_v55 = vsel %vm5660_vm2, %v5944_v60, %v8501_v17  ;;  %v5949_v23 = vsel %vm5660_vm2, %v5945_v2, %v8502_v54  ;;  %v5182_v39 = vadd.f32 %v10070_v25, %v5181_v8  ;;  %v5226_v18 = vadd.f32 %v10070_v25, %v5225_v6 }
 0x2e7   : > { %v5952_v62 = vsel %vm5665_vm4, %v5948_v55, %v8506_v11  ;;  %v5953_v40 = vsel %vm5665_vm4, %v5949_v23, %v8507_v13  ;;  %v4884_v54 = vmax.f32 %v4876_v52, 0.0 }
 0x2e8   : > { %v5956_v5 = vpack.c.bf16 %v5953_v40, %v5952_v62  ;;  %v5191_v60 = vmax.f32 %v5182_v39, 0.0  ;;  %v5235_v6 = vmax.f32 %v5226_v18, 0.0  ;;  %v8442_v18 = vunpack.i.h.bf16 %v10257_v43 }
 0x2ea   : > { %8041 = vmatmul.msk.bf16.vlgmr.msra.gmra.mxu3 %vm5696_vm5, %v5956_v5  ;;  %v5575_v56 = vmax.f32 %v5191_v60, %v5235_v6  ;;  %v8522_v6 = vunpack.i.h.bf16 %v10271_v38 }
 0x2eb   : > { %v8510_v17 = vpop.permute.xlu1 %8509 }
 0x2ec   : > { %v8512_v13 = vunpack.i.h.bf16 %v8510_v17  ;;  %v8511_v11 = vunpack.i.l.bf16 %v8510_v17  ;;  %v8480_v37 = vpop.permute.xlu0 %8479 }
 0x2ed   : > { %v5183_v2 = vpop.f32.mrf.mxu2  ;;  %v5227_v23 = vpop.f32.mrf.mxu3 }
 0x2ee   : > { %v8530_v55 = vpop.permute.xlu2 %8529  ;;  %v5184_v8 = vadd.f32 %v10070_v25, %v5183_v2  ;;  %v5228_v5 = vadd.f32 %v10070_v25, %v5227_v23  ;;  %v10300_v21 = vpop.f32.mrf.mxu0  ;;  %v6031_v50 = vsel %vm5660_vm2, %v6027_v44, %v8511_v11  ;;  %v6032_v36 = vsel %vm5660_vm2, %v6028_v9, %v8512_v13 }
 0x2ef   : > { %v8532_v62 = vunpack.i.h.bf16 %v8530_v55  ;;  %v8531_v40 = vunpack.i.l.bf16 %v8530_v55  ;;  %v10302_v51 = vpop.f32.mrf.mxu1  ;;  %v8441_v55 = vunpack.i.l.bf16 %v10257_v43  ;;  %v5572_v23 = vmax.f32 %v4840_v28, %v4884_v54 }
 0x2f0   : > { %v5192_v33 = vmax.f32 %v5184_v8, 0.0  ;;  %v5236_v17 = vmax.f32 %v5228_v5, 0.0  ;;  %v5947_v5 = vsel %vm5655_vm3, %v9686_v1, %v8442_v18  ;;  %v8521_v28 = vunpack.i.l.bf16 %v10271_v38 }
 0x2f1   : > { %v6035_v52 = vsel %vm5665_vm4, %v6031_v50, %v8531_v40  ;;  %v6036_v39 = vsel %vm5665_vm4, %v6032_v36, %v8532_v62  ;;  %v10937_v50 = vld [vmem:[#allocation3_spill] sm:$0xff]  ;;  %v5579_v54 = vmax.f32 %v10194_v16, %v5575_v56  ;;  %v4837_v16 = vadd.f32 %v10070_v25, %v10227_v53  ;;  %v10939_v53 = vld [vmem:[#allocation4_spill] sm:$0xff] }
 0x2f2   : > { %v6039_v2 = vpack.c.bf16 %v6036_v39, %v6035_v52  ;;  %v5576_v14 = vmax.f32 %v5192_v33, %v5236_v17  ;;  %v5946_v43 = vsel %vm5655_vm3, %v10937_v50, %v8441_v55  ;;  %v8482_v39 = vunpack.i.h.bf16 %v8480_v37 }
 0x2f3   : > { %v8515_v11 = vpop.permute.xlu1 %8514  ;;  %v8481_v17 = vunpack.i.l.bf16 %v8480_v37  ;;  %v4881_v38 = vadd.f32 %v10070_v25, %v10229_v42  ;;  %v8471_v55 = vunpack.i.l.bf16 %v10289_v4 }
 0x2f4   : > { %8043 = vmatmul.msk.bf16.vlgmr.msrb.gmra.mxu0 %vm5696_vm5, %v6039_v2  ;;  %v5580_v44 = vmax.f32 %v5572_v23, %v5576_v14  ;;  %v8517_v13 = vunpack.i.h.bf16 %v8515_v11  ;;  %v8516_v8 = vunpack.i.l.bf16 %v8515_v11  ;;  %v8472_v2 = vunpack.i.h.bf16 %v10289_v4 }
 0x2f5   : > { %v5186_v9 = vpop.f32.mrf.mxu2  ;;  %v5230_v62 = vpop.f32.mrf.mxu3 }
 0x2f6   : > { %v10311_v40 = vpop.permute.xlu2 %8544  ;;  %v10319_v60 = vpop.f32.mrf.mxu0  ;;  %v5950_v36 = vsel %vm5660_vm2, %v5946_v43, %v8516_v8  ;;  %v5951_v33 = vsel %vm5660_vm2, %v5947_v5, %v8517_v13  ;;  %v10326_v52 = vpack.i.bf16 %v5580_v44, %v5579_v54  ;;  %v5187_v23 = vadd.f32 %v10070_v25, %v5186_v9  ;;  %v10938_v44 = vld [vmem:[#allocation5_spill] sm:$0xff] }
 0x2f7   : > { %v10321_v14 = vpop.f32.mrf.mxu1  ;;  %v5954_v1 = vsel %vm5665_vm4, %v5950_v36, %v8521_v28  ;;  %v5955_v18 = vsel %vm5665_vm4, %v5951_v33, %v8522_v6  ;;  %v6030_v11 = vsel %vm5655_vm3, %v10938_v44, %v8482_v39  ;;  %v6029_v13 = vsel %vm5655_vm3, %v10939_v53, %v8481_v17 }
 0x2f8   : > { %8564 = vrot.lane.b32.xlu1 %v10326_v52, %s8820_s30  ;;  %v5957_v56 = vpack.c.bf16 %v5955_v18, %v5954_v1  ;;  %v5231_v8 = vadd.f32 %v10070_v25, %v5230_v62  ;;  %v4842_v43 = vmax.f32 %v4837_v16, 0.0  ;;  %v4886_v36 = vmax.f32 %v4881_v38, 0.0 }
 0x2f9   : > { %v4920_v17 = vadd.f32 %v10070_v25, %v10236_v48  ;;  %v5193_v62 = vmax.f32 %v5187_v23, 0.0  ;;  %v10940_v23 = vld [vmem:[#allocation6_spill] sm:$0xff] }
 0x2fa   : > { %8042 = vmatmul.msk.bf16.gmra.mxu3 %vm5696_vm5, %v5957_v56  ;;  %v5237_v16 = vmax.f32 %v5231_v8, 0.0  ;;  %v10941_v8 = vld [vmem:[#allocation7_spill] sm:$0xff] }
 0x2fb   : > { %v8525_v5 = vpop.permute.xlu1 %8524 }
 0x2fc   : > { %v8527_v28 = vunpack.i.h.bf16 %v8525_v5  ;;  %v8526_v4 = vunpack.i.l.bf16 %v8525_v5 }
 0x2fd   : > { %v5188_v37 = vpop.f32.mrf.mxu2  ;;  %v5232_v9 = vpop.f32.mrf.mxu3 }
 0x2fe   : > { %v8555_v50 = vpop.permute.xlu2 %8554  ;;  %v5189_v42 = vadd.f32 %v10070_v25, %v5188_v37  ;;  %v5269_v6 = vpop.f32.mrf.mxu0  ;;  %v5233_v39 = vadd.f32 %v10070_v25, %v5232_v9  ;;  %v6033_v56 = vsel %vm5660_vm2, %v6029_v13, %v8526_v4  ;;  %v6034_v37 = vsel %vm5660_vm2, %v6030_v11, %v8527_v28 }
 0x2ff   : > { %v8557_v54 = vunpack.i.h.bf16 %v8555_v50  ;;  %v8556_v33 = vunpack.i.l.bf16 %v8555_v50  ;;  %v5313_v18 = vpop.f32.mrf.mxu1  ;;  %v5270_v50 = vadd.f32 %v10070_v25, %v5269_v6  ;;  %v4964_v9 = vadd.f32 %v10070_v25, %v10239_v46 }
 0x300   : > { %v5194_v1 = vmax.f32 %v5189_v42, 0.0  ;;  %v5238_v5 = vmax.f32 %v5233_v39, 0.0  ;;  %v5314_v42 = vadd.f32 %v10070_v25, %v5313_v18  ;;  %v6111_v13 = vsel %vm5655_vm3, %v10940_v23, %v8472_v2 }
 0x301   : > { %v6037_v44 = vsel %vm5665_vm4, %v6033_v56, %v8556_v33  ;;  %v6038_v53 = vsel %vm5665_vm4, %v6034_v37, %v8557_v54  ;;  %v6110_v28 = vsel %vm5655_vm3, %v10941_v8, %v8471_v55  ;;  %v5574_v4 = vmax.f32 %v4842_v43, %v4886_v36 }
 0x302   : > { %v6040_v38 = vpack.c.bf16 %v6038_v53, %v6037_v44  ;;  %v5578_v48 = vmax.f32 %v5194_v1, %v5238_v5  ;;  %v4928_v54 = vmax.f32 %v4920_v17, 0.0  ;;  %v5577_v33 = vmax.f32 %v5193_v62, %v5237_v16 }
 0x303   : > { %v5279_v6 = vmax.f32 %v5270_v50, 0.0  ;;  %v5323_v56 = vmax.f32 %v5314_v42, 0.0  ;;  %v4972_v46 = vmax.f32 %v4964_v9, 0.0  ;;  %v8547_v1 = vunpack.i.h.bf16 %v10311_v40 }
 0x304   : > { %8044 = vmatmul.msk.bf16.gmra.mxu0 %vm5696_vm5, %v6040_v38  ;;  %v8546_v2 = vunpack.i.l.bf16 %v10311_v40  ;;  %v5582_v53 = vmax.f32 %v5574_v4, %v5578_v48  ;;  %v5581_v17 = vmax.f32 %v10223_v34, %v5577_v33 }
 0x305   : > { %v5357_v11 = vpop.f32.mrf.mxu2  ;;  %v8540_v39 = vpop.permute.xlu1 %8539  ;;  %v5587_v50 = vmax.f32 %v5279_v6, %v5323_v56  ;;  %v5584_v8 = vmax.f32 %v4928_v54, %v4972_v46  ;;  %v5008_v54 = vadd.f32 %v10070_v25, %v10243_v35  ;;  %v5052_v46 = vadd.f32 %v10070_v25, %v10245_v15 }
 0x306   : > { %v8542_v18 = vunpack.i.h.bf16 %v8540_v39  ;;  %v8541_v37 = vunpack.i.l.bf16 %v8540_v39  ;;  %v5401_v44 = vpop.f32.mrf.mxu3  ;;  %v5271_v5 = vpop.f32.mrf.mxu0  ;;  %v10371_v48 = vpack.i.bf16 %v5582_v53, %v5581_v17 }
 0x307   : > { %v5315_v38 = vpop.f32.mrf.mxu1  ;;  %v5272_v43 = vadd.f32 %v10070_v25, %v5271_v5  ;;  %v5591_v34 = vmax.f32 %v10233_v29, %v5587_v50  ;;  %v4925_v29 = vadd.f32 %v10070_v25, %v10252_v47  ;;  %v5016_v15 = vmax.f32 %v5008_v54, 0.0 }
 0x308   : > { %v6114_v23 = vsel %vm5660_vm2, %v6110_v28, %v8541_v37  ;;  %v6115_v55 = vsel %vm5660_vm2, %v6111_v13, %v8542_v18  ;;  %v5316_v36 = vadd.f32 %v10070_v25, %v5315_v38  ;;  %8569 = vrot.lane.b32.xlu1 %v10371_v48, %s8820_s30  ;;  %v4969_v38 = vadd.f32 %v10070_v25, %v10255_v58 }
 0x309   : > { %v6118_v62 = vsel %vm5665_vm4, %v6114_v23, %v8546_v2  ;;  %v6119_v16 = vsel %vm5665_vm4, %v6115_v55, %v8547_v1  ;;  %v5280_v40 = vmax.f32 %v5272_v43, 0.0  ;;  %v5358_v1 = vadd.f32 %v10070_v25, %v5357_v11 }
 0x30a   : > { %v6122_v42 = vpack.c.bf16 %v6119_v16, %v6118_v62  ;;  %v5324_v9 = vmax.f32 %v5316_v36, 0.0  ;;  %v5402_v2 = vadd.f32 %v10070_v25, %v5401_v44  ;;  %v5060_v11 = vmax.f32 %v5052_v46, 0.0 }
 0x30b   : > { %v5367_v44 = vmax.f32 %v5358_v1, 0.0  ;;  %v4930_v17 = vmax.f32 %v4925_v29, 0.0 }
 0x30c   : > { %v5588_v28 = vmax.f32 %v5280_v40, %v5324_v9  ;;  %8045 = vmatmul.msk.bf16.vlgmr.msrb.gmra.mxu1 %vm5696_vm5, %v6122_v42  ;;  %v5411_v43 = vmax.f32 %v5402_v2, 0.0  ;;  %v4974_v42 = vmax.f32 %v4969_v38, 0.0 }
 0x30d   : > { %v5359_v13 = vpop.f32.mrf.mxu2 }
 0x30e   : > { %v5592_v4 = vmax.f32 %v5584_v8, %v5588_v28  ;;  %v5403_v33 = vpop.f32.mrf.mxu3  ;;  %v5274_v39 = vpop.f32.mrf.mxu0  ;;  %v5360_v6 = vadd.f32 %v10070_v25, %v5359_v13  ;;  %v5596_v8 = vmax.f32 %v5016_v15, %v5060_v11  ;;  %v5599_v28 = vmax.f32 %v5367_v44, %v5411_v43 }
 0x30f   : > { %v5318_v18 = vpop.f32.mrf.mxu1  ;;  %v5404_v56 = vadd.f32 %v10070_v25, %v5403_v33  ;;  %v5275_v53 = vadd.f32 %v10070_v25, %v5274_v39  ;;  %v5096_v33 = vadd.f32 %v10070_v25, %v10277_v59  ;;  %v5140_v39 = vadd.f32 %v10070_v25, %v10279_v12 }
 0x310   : > { %v8573_v37 = vpack.i.bf16 %v5592_v4, %v5591_v34  ;;  %v5319_v5 = vadd.f32 %v10070_v25, %v5318_v18  ;;  %v5368_v35 = vmax.f32 %v5360_v6, 0.0  ;;  %v4744_v4 = vadd.f32 %v10070_v25, %v10177_v3 }
 0x311   : > { %v5412_v23 = vmax.f32 %v5404_v56, 0.0  ;;  %v5281_v62 = vmax.f32 %v5275_v53, 0.0  ;;  %v4788_v6 = vadd.f32 %v10070_v25, %v10181_v7  ;;  %v5586_v56 = vmax.f32 %v4930_v17, %v4974_v42 }
 0x312   : > { %8574 = vrot.lane.b32.xlu2 %v8573_v37, %s8821_s12  ;;  %8579 = vrot.lane.b32.xlu1 %v8573_v37, %s8820_s30  ;;  %v5325_v47 = vmax.f32 %v5319_v5, 0.0  ;;  %v4752_v2 = vmax.f32 %v4744_v4, 0.0  ;;  %v5104_v59 = vmax.f32 %v5096_v33, 0.0  ;;  %v5148_v29 = vmax.f32 %v5140_v39, 0.0 }
 0x313   : > { %v5600_v40 = vmax.f32 %v5368_v35, %v5412_v23  ;;  %v4796_v5 = vmax.f32 %v4788_v6, 0.0  ;;  %v5013_v23 = vadd.f32 %v10070_v25, %v10261_v22  ;;  %v5101_v43 = vadd.f32 %v10070_v25, %v10319_v60 }
 0x314   : > { %v5589_v18 = vmax.f32 %v5281_v62, %v5325_v47  ;;  %v5564_v44 = vmax.f32 %v5104_v59, %v5148_v29  ;;  %v5145_v22 = vadd.f32 %v10070_v25, %v10321_v14  ;;  %v4793_v47 = vadd.f32 %v10070_v25, %v10221_v30 }
 0x315   : > { %v5362_v55 = vpop.f32.mrf.mxu2  ;;  %v5604_v37 = vmax.f32 %v5596_v8, %v5600_v40  ;;  %v5560_v17 = vmax.f32 %v4752_v2, %v4796_v5  ;;  %v5143_v60 = vadd.f32 %v10070_v25, %v10302_v51 }
 0x316   : > { %v5406_v36 = vpop.f32.mrf.mxu3  ;;  %v5276_v16 = vpop.f32.mrf.mxu0  ;;  %v5593_v12 = vmax.f32 %v10249_v57, %v5589_v18  ;;  %v5363_v15 = vadd.f32 %v10070_v25, %v5362_v55  ;;  %v10420_v57 = vld [vmem:[%s10895_s4] ss:$0 sm:$0xff]  ;;  %v5150_v8 = vmax.f32 %v5145_v22, 0.0 }
 0x317   : > { %v5320_v50 = vpop.f32.mrf.mxu1  ;;  %v5277_v9 = vadd.f32 %v10070_v25, %v5276_v16  ;;  %v5407_v11 = vadd.f32 %v10070_v25, %v5406_v36  ;;  %v5018_v16 = vmax.f32 %v5013_v23, 0.0 }
 0x318   : > { %v5321_v58 = vadd.f32 %v10070_v25, %v5320_v50  ;;  %v5099_v50 = vadd.f32 %v10070_v25, %v10300_v21  ;;  %v5369_v42 = vmax.f32 %v5363_v15, 0.0 }
 0x319   : > { %v5282_v13 = vmax.f32 %v5277_v9, 0.0  ;;  %v5413_v40 = vmax.f32 %v5407_v11, 0.0  ;;  %v5568_v9 = vmax.f32 %v5560_v17, %v5564_v44 }
 0x31a   : > { %v5326_v34 = vmax.f32 %v5321_v58, 0.0  ;;  %8589 = vrot.lane.b32.xlu2 %v10183_v20, %s8821_s12  ;;  %8584 = vrot.lane.b32.xlu1 %v10151_v19, %s8820_s30  ;;  %v5603_v20 = vmax.f32 %v10241_v61, %v5599_v28  ;;  %v5057_v61 = vadd.f32 %v10070_v25, %v10263_v10  ;;  %v4749_v10 = vadd.f32 %v10070_v25, %v10218_v27 }
 0x31b   : > { %v5106_v58 = vmax.f32 %v5101_v43, 0.0  ;;  %v5105_v4 = vmax.f32 %v5099_v50, 0.0  ;;  %v5601_v33 = vmax.f32 %v5369_v42, %v5413_v40 }
 0x31c   : > { %v5590_v54 = vmax.f32 %v5282_v13, %v5326_v34  ;;  %v8598_v35 = vpack.i.bf16 %v5604_v37, %v5603_v20  ;;  %v5062_v14 = vmax.f32 %v5057_v61, 0.0  ;;  %v4754_v21 = vmax.f32 %v4749_v10, 0.0 }
 0x31d   : > { %v5364_v46 = vpop.f32.mrf.mxu2  ;;  %v4798_v34 = vmax.f32 %v4793_v47, 0.0  ;;  %v5566_v6 = vmax.f32 %v5106_v58, %v5150_v8  ;;  %v10942_v37 = vmax.f32 %v10162_v0, %v10267_v32  ;;  %v5605_v29 = vmax.f32 %v10259_v63, %v5601_v33 }
 0x31e   : > { %v5594_v3 = vmax.f32 %v5586_v56, %v5590_v54  ;;  %v5408_v1 = vpop.f32.mrf.mxu3  ;;  %v5365_v7 = vadd.f32 %v10070_v25, %v5364_v46  ;;  %v5598_v51 = vmax.f32 %v5018_v16, %v5062_v14  ;;  %v10466_v63 = vpop.f32.mrf.mxu0 }
 0x31f   : > { %v5799_v53 = vpop.f32.mrf.mxu1  ;;  %v5409_v38 = vadd.f32 %v10070_v25, %v5408_v1  ;;  %v5149_v25 = vmax.f32 %v5143_v60, 0.0  ;;  %v8623_v54 = vpack.i.bf16 %v5568_v9, %v10942_v37  ;;  %v5562_v1 = vmax.f32 %v4754_v21, %v4798_v34 }
 0x320   : > { %v8608_v19 = vpack.i.bf16 %v5594_v3, %v5593_v12  ;;  %v5370_v55 = vmax.f32 %v5365_v7, 0.0  ;;  %v10437_v27 = vadd.f32 %v10420_v57, %v5799_v53 }
 0x321   : > { %v5414_v36 = vmax.f32 %v5409_v38, 0.0  ;;  %v5565_v2 = vmax.f32 %v5105_v4, %v5149_v25  ;;  %v5570_v12 = vmax.f32 %v5562_v1, %v5566_v6 }
 0x322   : > { %8599 = vrot.lane.b32.xlu2 %v8598_v35, %s8821_s12  ;;  %8609 = vrot.lane.b32.xlu1 %v8608_v19, %s8820_s30  ;;  %v5809_v39 = vmax.f32 %v10437_v27, 0.0 }
 0x323   : > { %v5602_v30 = vmax.f32 %v5370_v55, %v5414_v36  ;;  %v5569_v5 = vmax.f32 %v10213_v24, %v5565_v2  ;;  %v10472_v24 = vpop.permute.xlu0 %8494 }
 0x325   : > { %v5886_v62 = vpop.f32.mrf.mxu2  ;;  %v5606_v46 = vmax.f32 %v5598_v51, %v5602_v30  ;;  %v8638_v38 = vpack.i.bf16 %v5570_v12, %v5569_v5 }
 0x326   : > { %v5887_v56 = vadd.f32 %v10420_v57, %v5886_v62  ;;  %v10468_v35 = vpop.f32.mrf.mxu0 }
 0x327   : > { %v5801_v28 = vpop.f32.mrf.mxu1  ;;  %v8613_v32 = vpack.i.bf16 %v5606_v46, %v5605_v29 }
 0x328   : > { %v10440_v13 = vadd.f32 %v10420_v57, %v5801_v28  ;;  %v5896_v53 = vmax.f32 %v5887_v56, 0.0 }
 0x32a   : > { %v5810_v18 = vmax.f32 %v10440_v13, 0.0  ;;  %8604 = vrot.lane.b32.xlu2 %v8608_v19, %s8821_s12  ;;  %8624 = vrot.lane.b32.xlu1 %v8623_v54, %s8820_s30 }
 0x32b   : > { %v8535_v19 = vpop.permute.xlu0 %8534 }
 0x32c   : > { %v10453_v20 = vpack.i.bf16 %v5810_v18, %v5809_v39  ;;  %v8537_v15 = vunpack.i.h.bf16 %v8535_v19  ;;  %v8536_v11 = vunpack.i.l.bf16 %v8535_v19 }
 0x32d   : > { %v5888_v3 = vpop.f32.mrf.mxu2 }
 0x32e   : > { %v5889_v59 = vadd.f32 %v10420_v57, %v5888_v3  ;;  %v10470_v23 = vpop.f32.mrf.mxu0  ;;  %v6280_v55 = vsel %vm5655_vm3, %v9960_v49, %v8536_v11  ;;  %v10943_v3 = vld [vmem:[#allocation14_spill] sm:$0xff] }
 0x32f   : > { %v10487_v40 = vpop.f32.mrf.mxu1 }
 0x330   : > { %v5897_v0 = vmax.f32 %v5889_v59, 0.0 }
 0x332   : > { %v8648_v7 = vpack.i.bf16 %v5897_v0, %v5896_v53  ;;  %8614 = vrot.lane.b32.xlu2 %v8613_v32, %s8821_s12  ;;  %8639 = vrot.lane.b32.xlu1 %v8638_v38, %s8820_s30 }
 0x333   : > { %v8550_v14 = vpop.permute.xlu0 %8549 }
 0x334   : > { %8649 = vrot.lane.b32.xlu0 %v8648_v7, %s8820_s30  ;;  %v8552_v56 = vunpack.i.h.bf16 %v8550_v14  ;;  %v8551_v37 = vunpack.i.l.bf16 %v8550_v14  ;;  %v10945_v14 = vld [vmem:[#allocation9_spill] sm:$0xff] }
 0x336   : > { %v10474_v61 = vpop.f32.mrf.mxu0  ;;  %v6363_v19 = vsel %vm5655_vm3, %v10080_v45, %v8551_v37 }
 0x337   : > { %v10505_v51 = vpop.f32.mrf.mxu1 }
 0x33a   : > { %8629 = vrot.lane.b32.xlu2 %v10326_v52, %s8821_s12 }
 0x33b   : > { %v8560_v21 = vpop.permute.xlu0 %8559 }
 0x33c   : > { %v8562_v4 = vunpack.i.h.bf16 %v8560_v21  ;;  %v8561_v25 = vunpack.i.l.bf16 %v8560_v21 }
 0x33e   : > { %v6283_v46 = vsel %vm5655_vm3, %v10032_v41, %v8562_v4  ;;  %v6282_v1 = vsel %vm5655_vm3, %v10943_v3, %v8561_v25  ;;  %v6364_v41 = vsel %vm5655_vm3, %v10083_v26, %v8552_v56  ;;  %v8497_v26 = vunpack.i.h.bf16 %v10472_v24 }
 0x342   : > { %8644 = vrot.lane.b32.xlu2 %v10371_v48, %s8821_s12  ;;  %v6281_v48 = vsel %vm5655_vm3, %v9957_v31, %v8537_v15  ;;  %s8822_s12 = smov 64   ;;  %v5891_v15 = vpop.f32.mrf.mxu2 }
 0x36a   : > { %v8565_v44 = vpop.permute.xlu1 %8564 }
 0x36b   : > { %v8567_v22 = vunpack.i.h.bf16 %v8565_v44  ;;  %v8566_v52 = vunpack.i.l.bf16 %v8565_v44 }
 0x36c   : > { %v8575_v43 = vpop.permute.xlu2 %8574 }
 0x36d   : > { %v8577_v17 = vunpack.i.h.bf16 %v8575_v43  ;;  %v8576_v10 = vunpack.i.l.bf16 %v8575_v43  ;;  %v6284_v36 = vsel %vm5660_vm2, %v6280_v55, %v8566_v52  ;;  %v6285_v62 = vsel %vm5660_vm2, %v6281_v48, %v8567_v22 }
 0x36e   : > { %v8496_v55 = vunpack.i.l.bf16 %v10472_v24 }
 0x36f   : > { %v6288_v47 = vsel %vm5665_vm4, %v6284_v36, %v8576_v10  ;;  %v6289_v16 = vsel %vm5665_vm4, %v6285_v62, %v8577_v17  ;;  %v8595_v36 = vpop.permute.xlu0 %8594 }
 0x370   : > { %v6292_v60 = vpack.c.bf16 %v6289_v16, %v6288_v47 }
 0x371   : > { %v6056_v50 = vpop.f32.mrf.mxu0 }
 0x372   : > { %8049 = vmatmul.msk.bf16.vlgmr.msrb.gmra.mxu3 %vm5696_vm5, %v6292_v60  ;;  %v10490_v31 = vadd.f32 %v10420_v57, %v6056_v50  ;;  %v10944_v50 = vld [vmem:[#allocation8_spill] sm:$0xff] }
 0x373   : > { %v6113_v60 = vsel %vm5655_vm3, %v10944_v50, %v8497_v26 }
 0x374   : > { %v10485_v42 = vpop.permute.xlu2 %8589  ;;  %v6066_v58 = vmax.f32 %v10490_v31, 0.0 }
 0x375   : > { %v8591_v21 = vunpack.i.l.bf16 %v10485_v42 }
 0x379   : > { %v6058_v49 = vpop.f32.mrf.mxu0 }
 0x37a   : > { %v10493_v9 = vadd.f32 %v10420_v57, %v6058_v49  ;;  %v8570_v34 = vpop.permute.xlu1 %8569  ;;  %v6112_v49 = vsel %vm5655_vm3, %v10945_v14, %v8496_v55  ;;  %v10948_v14 = vld [vmem:[#allocation11_spill] sm:$0xff] }
 0x37b   : > { %v8572_v33 = vunpack.i.h.bf16 %v8570_v34  ;;  %v8571_v6 = vunpack.i.l.bf16 %v8570_v34 }
 0x37c   : > { %v6067_v8 = vmax.f32 %v10493_v9, 0.0  ;;  %v8600_v28 = vpop.permute.xlu2 %8599  ;;  %v10712_v9 = vld [vmem:[%s10897_s6] ss:$0 sm:$0xff] }
 0x37d   : > { %v6286_v29 = vsel %vm5660_vm2, %v6282_v1, %v8571_v6  ;;  %v6287_v12 = vsel %vm5660_vm2, %v6283_v46, %v8572_v33  ;;  %v8602_v11 = vunpack.i.h.bf16 %v8600_v28  ;;  %v8601_v44 = vunpack.i.l.bf16 %v8600_v28  ;;  %v5893_v33 = vpop.f32.mrf.mxu2 }
 0x37e   : > { %v10501_v30 = vpack.i.bf16 %v6067_v8, %v6066_v58  ;;  %v8592_v28 = vunpack.i.h.bf16 %v10485_v42  ;;  %v8597_v1 = vunpack.i.h.bf16 %v8595_v36  ;;  %v5894_v42 = vadd.f32 %v10420_v57, %v5893_v33 }
 0x380   : > { %8654 = vrot.lane.b32.xlu1 %v10501_v30, %s8822_s12 }
 0x384   : > { %v8605_v54 = vpop.permute.xlu2 %8604  ;;  %v8580_v53 = vpop.permute.xlu1 %8579 }
 0x385   : > { %v8607_v2 = vunpack.i.h.bf16 %v8605_v54  ;;  %v8606_v59 = vunpack.i.l.bf16 %v8605_v54  ;;  %v8582_v5 = vunpack.i.h.bf16 %v8580_v53  ;;  %v8581_v7 = vunpack.i.l.bf16 %v8580_v53 }
 0x386   : > { %v5892_v53 = vadd.f32 %v10420_v57, %v5891_v15  ;;  %v8195_v15 = vld [vmem:[%s10896_s5 + $0x30] sm:$0xff] }
 0x387   : > { %v6290_v0 = vsel %vm5665_vm4, %v6286_v29, %v8606_v59  ;;  %v6291_v32 = vsel %vm5665_vm4, %v6287_v12, %v8607_v2  ;;  %v6367_v22 = vsel %vm5660_vm2, %v6363_v19, %v8581_v7  ;;  %v6368_v52 = vsel %vm5660_vm2, %v6364_v41, %v8582_v5  ;;  %v8196_v29 = vld [vmem:[%s10896_s5 + $0x38] sm:$0xff]  ;;  %v10946_v5 = vld [vmem:[#allocation16_spill] sm:$0xff] }
 0x388   : > { %v6293_v38 = vpack.c.bf16 %v6291_v32, %v6290_v0  ;;  %v6371_v17 = vsel %vm5665_vm4, %v6367_v22, %v8601_v44  ;;  %v6372_v10 = vsel %vm5665_vm4, %v6368_v52, %v8602_v11  ;;  %v8596_v2 = vunpack.i.l.bf16 %v8595_v36  ;;  %6598 = vmatpush.bf16.msra.mxu2 %v8196_v29  ;;  %6756 = vmatpush.bf16.msrb.mxu0 %v8196_v29  ;;  %v8620_v44 = vpop.permute.xlu0 %8619  ;;  %v8194_v36 = vld [vmem:[%s10896_s5 + $0x28] sm:$0xff] }
 0x389   : > { %v6139_v43 = vpop.f32.mrf.mxu1  ;;  %v6375_v48 = vpack.c.bf16 %v6372_v10, %v6371_v17  ;;  %v6366_v7 = vsel %vm5655_vm3, %v10946_v5, %v8597_v1  ;;  %6679 = vmatpush.bf16.msra.mxu3 %v8196_v29  ;;  %6517 = vmatpush.bf16.msra.mxu1 %v8196_v29  ;;  %v8622_v55 = vunpack.i.h.bf16 %v8620_v44 }
 0x38a   : > { %8050 = vmatmul.msk.bf16.gmra.mxu3 %vm5696_vm5, %v6293_v38  ;;  %v6140_v62 = vadd.f32 %v10420_v57, %v6139_v43  ;;  %v10947_v38 = vld [vmem:[#allocation15_spill] sm:$0xff]  ;;  %v5899_v43 = vmax.f32 %v5894_v42, 0.0  ;;  %v8191_v42 = vld [vmem:[%s10896_s5 + $0x10] sm:$0xff] }
 0x38b   : > { %8051 = vmatmul.msk.bf16.vlgmr.msra.gmra.mxu0 %vm5696_vm5, %v6375_v48  ;;  %v6365_v41 = vsel %vm5655_vm3, %v10947_v38, %v8596_v2  ;;  %v5898_v48 = vmax.f32 %v5892_v53, 0.0  ;;  %v10950_v53 = vld [vmem:[#allocation13_spill] sm:$0xff] }
 0x38c   : > { %v8585_v45 = vpop.permute.xlu1 %8584  ;;  %v6149_v37 = vmax.f32 %v6140_v62, 0.0  ;;  %v8615_v54 = vpop.permute.xlu2 %8614  ;;  %6599 = vmatpush.bf16.msra.mxu2 %v8195_v15  ;;  %6757 = vmatpush.bf16.msrb.mxu0 %v8195_v15 }
 0x38d   : > { %v8587_v47 = vunpack.i.h.bf16 %v8585_v45  ;;  %v8586_v16 = vunpack.i.l.bf16 %v8585_v45  ;;  %v8617_v19 = vunpack.i.h.bf16 %v8615_v54  ;;  %v8616_v11 = vunpack.i.l.bf16 %v8615_v54  ;;  %6680 = vmatpush.bf16.msra.mxu3 %v8195_v15  ;;  %6518 = vmatpush.bf16.msra.mxu1 %v8195_v15  ;;  %v8192_v54 = vld [vmem:[%s10896_s5 + $0x18] sm:$0xff] }
 0x38e   : > { %v8621_v45 = vunpack.i.l.bf16 %v8620_v44  ;;  %v8668_v62 = vpack.i.bf16 %v5899_v43, %v5898_v48 }
 0x38f   : > { %v6116_v24 = vsel %vm5660_vm2, %v6112_v49, %v8586_v16  ;;  %v6117_v4 = vsel %vm5660_vm2, %v6113_v60, %v8587_v47  ;;  %v6198_v49 = vsel %vm5655_vm3, %v10948_v14, %v8622_v55 }
 0x390   : > { %v6120_v6 = vsel %vm5665_vm4, %v6116_v24, %v8591_v21  ;;  %v6121_v56 = vsel %vm5665_vm4, %v6117_v4, %v8592_v28  ;;  %v10949_v28 = vld [vmem:[#allocation10_spill] sm:$0xff]  ;;  %6600 = vmatpush.bf16.msra.mxu2 %v8194_v36  ;;  %v8193_v4 = vld [vmem:[%s10896_s5 + $0x20] sm:$0xff]  ;;  %6758 = vmatpush.bf16.msrb.mxu0 %v8194_v36 }
 0x391   : > { %v6141_v34 = vpop.f32.mrf.mxu1  ;;  %v6123_v3 = vpack.c.bf16 %v6121_v56, %v6120_v6  ;;  %v6197_v21 = vsel %vm5655_vm3, %v10949_v28, %v8621_v45  ;;  %6681 = vmatpush.bf16.msra.mxu3 %v8194_v36  ;;  %6519 = vmatpush.bf16.msra.mxu1 %v8194_v36 }
 0x392   : > { %v6142_v25 = vadd.f32 %v10420_v57, %v6141_v34 }
 0x393   : > { %8046 = vmatmul.msk.bf16.gmra.mxu1 %vm5696_vm5, %v6123_v3 }
 0x394   : > { %v6150_v46 = vmax.f32 %v6142_v25, 0.0  ;;  %v8610_v12 = vpop.permute.xlu1 %8609  ;;  %v8630_v47 = vpop.permute.xlu2 %8629  ;;  %6601 = vmatpush.bf16.msra.mxu2 %v8193_v4  ;;  %6759 = vmatpush.bf16.msrb.mxu0 %v8193_v4 }
 0x395   : > { %v8612_v0 = vunpack.i.h.bf16 %v8610_v12  ;;  %v8611_v32 = vunpack.i.l.bf16 %v8610_v12  ;;  %v8632_v34 = vunpack.i.h.bf16 %v8630_v47  ;;  %v8631_v24 = vunpack.i.l.bf16 %v8630_v47  ;;  %6682 = vmatpush.bf16.msra.mxu3 %v8193_v4  ;;  %6520 = vmatpush.bf16.msra.mxu1 %v8193_v4  ;;  %v6061_v4 = vpop.f32.mrf.mxu0 }
 0x396   : > { %v8663_v59 = vpack.i.bf16 %v6150_v46, %v6149_v37  ;;  %v8635_v46 = vpop.permute.xlu0 %8634 }
 0x397   : > { %v6369_v22 = vsel %vm5660_vm2, %v6365_v41, %v8611_v32  ;;  %v6370_v52 = vsel %vm5660_vm2, %v6366_v7, %v8612_v0  ;;  %v8637_v1 = vunpack.i.h.bf16 %v8635_v46  ;;  %v8636_v2 = vunpack.i.l.bf16 %v8635_v46  ;;  %v10951_v32 = vld [vmem:[#allocation12_spill] sm:$0xff] }
 0x398   : > { %8664 = vrot.lane.b32.xlu0 %v8663_v59, %s8820_s30  ;;  %8659 = vrot.lane.b32.xlu2 %v8663_v59, %s8823_s15  ;;  %v6373_v17 = vsel %vm5665_vm4, %v6369_v22, %v8616_v11  ;;  %v6374_v10 = vsel %vm5665_vm4, %v6370_v52, %v8617_v19  ;;  %v8190_v7 = vld [vmem:[%s10896_s5 + $0x8] sm:$0xff]  ;;  %v10593_v22 = vpop.f32.mrf.mxu3  ;;  %v8189_v52 = vld [vmem:[%s10896_s5] sm:$0xff]  ;;  %v10620_v46 = vadd.f32 %v10420_v57, %v6061_v4 }
 0x399   : > { %v6376_v26 = vpack.c.bf16 %v6374_v10, %v6373_v17  ;;  %6602 = vmatpush.bf16.msra.mxu2 %v8192_v54  ;;  %6760 = vmatpush.bf16.msrb.mxu0 %v8192_v54  ;;  %v6200_v0 = vsel %vm5655_vm3, %v10950_v53, %v8637_v1  ;;  %v6199_v5 = vsel %vm5655_vm3, %v10951_v32, %v8636_v2 }
 0x39a   : > { %6683 = vmatpush.bf16.msra.mxu3 %v8192_v54  ;;  %6521 = vmatpush.bf16.msra.mxu1 %v8192_v54  ;;  %v6068_v1 = vmax.f32 %v10620_v46, 0.0 }
 0x39b   : > { %8052 = vmatmul.msk.bf16.gmra.mxu0 %vm5696_vm5, %v6376_v26 }
 0x39c   : > { %v8625_v16 = vpop.permute.xlu1 %8624  ;;  %v8645_v12 = vpop.permute.xlu2 %8644 }
 0x39d   : > { %v8627_v50 = vunpack.i.h.bf16 %v8625_v16  ;;  %v8626_v60 = vunpack.i.l.bf16 %v8625_v16  ;;  %6603 = vmatpush.bf16.msra.mxu2 %v8191_v42  ;;  %6761 = vmatpush.bf16.msrb.mxu0 %v8191_v42  ;;  %v8647_v19 = vunpack.i.h.bf16 %v8645_v12  ;;  %v8646_v11 = vunpack.i.l.bf16 %v8645_v12 }
 0x39e   : > { %6684 = vmatpush.bf16.msra.mxu3 %v8191_v42  ;;  %6522 = vmatpush.bf16.msra.mxu1 %v8191_v42 }
 0x39f   : > { %v6201_v25 = vsel %vm5660_vm2, %v6197_v21, %v8626_v60  ;;  %v6202_v33 = vsel %vm5660_vm2, %v6198_v49, %v8627_v50 }
 0x3a0   : > { %8669 = vrot.lane.b32.xlu0 %v8668_v62, %s8820_s30  ;;  %v6205_v6 = vsel %vm5665_vm4, %v6201_v25, %v8631_v24  ;;  %v6206_v56 = vsel %vm5665_vm4, %v6202_v33, %v8632_v34  ;;  %v10598_v17 = vpop.f32.mrf.mxu3 }
 0x3a1   : > { %v6209_v37 = vpack.c.bf16 %v6206_v56, %v6205_v6  ;;  %6604 = vmatpush.bf16.msra.mxu2 %v8190_v7  ;;  %6762 = vmatpush.bf16.msrb.mxu0 %v8190_v7 }
 0x3a2   : > { %6685 = vmatpush.bf16.msra.mxu3 %v8190_v7  ;;  %6523 = vmatpush.bf16.msra.mxu1 %v8190_v7 }
 0x3a3   : > { %8047 = vmatmul.msk.bf16.vlgmr.msrb.gmra.mxu2 %vm5696_vm5, %v6209_v37 }
 0x3a4   : > { %v8640_v3 = vpop.permute.xlu1 %8639 }
 0x3a5   : > { %v8642_v59 = vunpack.i.h.bf16 %v8640_v3  ;;  %v8641_v29 = vunpack.i.l.bf16 %v8640_v3  ;;  %6605 = vmatpush.bf16.msra.mxu2 %v8189_v52  ;;  %6763 = vmatpush.bf16.msrb.mxu0 %v8189_v52 }
 0x3a6   : > { %6686 = vmatpush.bf16.msra.mxu3 %v8189_v52  ;;  %6524 = vmatpush.bf16.msra.mxu1 %v8189_v52  ;;  %v8650_v48 = vpop.permute.xlu0 %8649 }
 0x3a7   : > { %v6203_v38 = vsel %vm5660_vm2, %v6199_v5, %v8641_v29  ;;  %v6204_v41 = vsel %vm5660_vm2, %v6200_v0, %v8642_v59  ;;  %v8652_v55 = vunpack.i.h.bf16 %v8650_v48  ;;  %v8651_v45 = vunpack.i.l.bf16 %v8650_v48 }
 0x3a8   : > { %v6207_v15 = vsel %vm5665_vm4, %v6203_v38, %v8646_v11  ;;  %v6208_v44 = vsel %vm5665_vm4, %v6204_v41, %v8647_v19  ;;  %v10600_v10 = vpop.f32.mrf.mxu3 }
 0x3a9   : > { %v6210_v43 = vpack.c.bf16 %v6208_v44, %v6207_v15  ;;  %v6584_v50 = vsel %vm5660_vm2, %v5809_v39, %v8651_v45  ;;  %v6585_v60 = vsel %vm5660_vm2, %v5810_v18, %v8652_v55  ;;  %v6063_v18 = vpop.f32.mrf.mxu0 }
 0x3aa   : > { %v10617_v37 = vadd.f32 %v10420_v57, %v6063_v18 }
 0x3ac   : > { %v6069_v3 = vmax.f32 %v10617_v37, 0.0 }
 0x3ae   : > { %v10629_v42 = vpack.i.bf16 %v6069_v3, %v6068_v1 }
 0x3b0   : > { %v10602_v26 = vpop.f32.mrf.mxu3 }
 0x3b3   : > { %8048 = vmatmul.msk.bf16.gmra.mxu2 %vm5696_vm5, %v6210_v43 }
 0x3f2   : > { %v8655_v36 = vpop.permute.xlu1 %8654  ;;  %v8660_v62 = vpop.permute.xlu2 %8659 }
 0x3f3   : > { %v8657_v47 = vunpack.i.h.bf16 %v8655_v36  ;;  %v8656_v16 = vunpack.i.l.bf16 %v8655_v36  ;;  %v8662_v14 = vunpack.i.h.bf16 %v8660_v62  ;;  %v8661_v49 = vunpack.i.l.bf16 %v8660_v62 }
 0x3f5   : > { %v6589_v28 = vsel %vm5696_vm5, %v6585_v60, %v8657_v47  ;;  %v6588_v21 = vsel %vm5696_vm5, %v6584_v50, %v8656_v16  ;;  %v6309_v33 = vpop.f32.mrf.mxu3 }
 0x3f6   : > { %v6593_v34 = vsel %vm6462_vm6, %v6589_v28, %v8662_v14  ;;  %v6592_v24 = vsel %vm6462_vm6, %v6588_v21, %v8661_v49  ;;  %v6310_v27 = vadd.f32 %v10420_v57, %v6309_v33  ;;  %v10655_v33 = vadd.f32 %v10420_v57, %v10598_v17 }
 0x3f7   : > { %v6596_v25 = vpack.c.bf16 %v6593_v34, %v6592_v24 }
 0x3f8   : > { %v6319_v6 = vmax.f32 %v6310_v27, 0.0 }
 0x3f9   : > { %6606 = vmatmul.bf16.vlgmr.msra.gmra.mxu2 %v6596_v25 }
 0x3fd   : > { %v6311_v39 = vpop.f32.mrf.mxu3 }
 0x3fe   : > { %v6312_v13 = vadd.f32 %v10420_v57, %v6311_v39  ;;  %v5807_v39 = vadd.f32 %v10420_v57, %v10505_v51 }
 0x400   : > { %v6320_v56 = vmax.f32 %v6312_v13, 0.0  ;;  %v10661_v13 = vadd.f32 %v10420_v57, %v10593_v22  ;;  %v5812_v17 = vmax.f32 %v5807_v39, 0.0 }
 0x402   : > { %v8673_v54 = vpack.i.bf16 %v6320_v56, %v6319_v6  ;;  %v5984_v6 = vmax.f32 %v10655_v33, 0.0  ;;  %v5983_v51 = vmax.f32 %v10661_v13, 0.0 }
 0x404   : > { %8674 = vrot.lane.b32.xlu1 %v8673_v54, %s8822_s12  ;;  %v8728_v22 = vpack.i.bf16 %v5984_v6, %v5983_v51 }
 0x408   : > { %v6392_v2 = vpop.f32.mrf.mxu0 }
 0x409   : > { %v6393_v29 = vadd.f32 %v10420_v57, %v6392_v2 }
 0x40b   : > { %v6402_v7 = vmax.f32 %v6393_v29, 0.0 }
 0x40c   : > { %8679 = vrot.lane.b32.xlu1 %v10629_v42, %s8822_s12 }
 0x40d   : > { %v6314_v59 = vpop.f32.mrf.mxu3 }
 0x40e   : > { %v6315_v0 = vadd.f32 %v10420_v57, %v6314_v59 }
 0x410   : > { %v6144_v12 = vpop.f32.mrf.mxu1  ;;  %v6394_v53 = vpop.f32.mrf.mxu0  ;;  %v6321_v19 = vmax.f32 %v6315_v0, 0.0  ;;  %v10687_v0 = vadd.f32 %v10420_v57, %v10600_v10 }
 0x411   : > { %v6395_v32 = vadd.f32 %v10420_v57, %v6394_v53  ;;  %v6145_v44 = vadd.f32 %v10420_v57, %v6144_v12  ;;  %v10683_v12 = vadd.f32 %v10420_v57, %v10602_v26 }
 0x413   : > { %v6403_v38 = vmax.f32 %v6395_v32, 0.0  ;;  %v6151_v45 = vmax.f32 %v6145_v44, 0.0  ;;  %v5986_v32 = vmax.f32 %v10683_v12, 0.0 }
 0x415   : > { %v6316_v5 = vpop.f32.mrf.mxu3  ;;  %v8683_v11 = vpack.i.bf16 %v6403_v38, %v6402_v7  ;;  %v8665_v7 = vpop.permute.xlu0 %8664 }
 0x416   : > { %v6317_v41 = vadd.f32 %v10420_v57, %v6316_v5  ;;  %v5985_v5 = vmax.f32 %v10687_v0, 0.0  ;;  %v8667_v10 = vunpack.i.h.bf16 %v8665_v7 }
 0x417   : > { %8684 = vrot.lane.b32.xlu2 %v8683_v11, %s8823_s15 }
 0x418   : > { %v6322_v15 = vmax.f32 %v6317_v41, 0.0  ;;  %v6146_v52 = vpop.f32.mrf.mxu1  ;;  %v6397_v48 = vpop.f32.mrf.mxu0  ;;  %v8758_v26 = vpack.i.bf16 %v5986_v32, %v5985_v5  ;;  %v8666_v41 = vunpack.i.l.bf16 %v8665_v7  ;;  %v6743_v44 = vsel %vm5660_vm2, %v6067_v8, %v8667_v10 }
 0x419   : > { %v6147_v55 = vadd.f32 %v10420_v57, %v6146_v52  ;;  %v6398_v47 = vadd.f32 %v10420_v57, %v6397_v48 }
 0x41a   : > { %v8698_v43 = vpack.i.bf16 %v6322_v15, %v6321_v19 }
 0x41b   : > { %v6152_v36 = vmax.f32 %v6147_v55, 0.0  ;;  %v6404_v60 = vmax.f32 %v6398_v47, 0.0 }
 0x41c   : > { %8699 = vrot.lane.b32.xlu1 %v8698_v43, %s8822_s12 }
 0x41d   : > { %v8693_v62 = vpack.i.bf16 %v6152_v36, %v6151_v45  ;;  %v8670_v48 = vpop.permute.xlu0 %8669 }
 0x41e   : > { %v8672_v31 = vunpack.i.h.bf16 %v8670_v48 }
 0x41f   : > { %8694 = vrot.lane.b32.xlu0 %v8693_v62, %s8820_s30  ;;  %8689 = vrot.lane.b32.xlu2 %v8693_v62, %s8823_s15 }
 0x420   : > { %v6399_v16 = vpop.f32.mrf.mxu0 }
 0x421   : > { %v6400_v50 = vadd.f32 %v10420_v57, %v6399_v16 }
 0x423   : > { %v6405_v14 = vmax.f32 %v6400_v50, 0.0  ;;  %v8671_v50 = vunpack.i.l.bf16 %v8670_v48 }
 0x425   : > { %v8703_v49 = vpack.i.bf16 %v6405_v14, %v6404_v60 }
 0x426   : > { %v6226_v28 = vpop.f32.mrf.mxu2 }
 0x427   : > { %8704 = vrot.lane.b32.xlu2 %v8703_v49, %s8823_s15  ;;  %8709 = vrot.lane.b32.xlu0 %v10501_v30, %s8820_s30  ;;  %v6227_v21 = vadd.f32 %v10420_v57, %v6226_v28  ;;  %v6587_v28 = vsel %vm5660_vm2, %v5812_v17, %v8672_v31 }
 0x429   : > { %v6236_v4 = vmax.f32 %v6227_v21, 0.0 }
 0x42e   : > { %v6228_v34 = vpop.f32.mrf.mxu2 }
 0x42f   : > { %v6229_v24 = vadd.f32 %v10420_v57, %v6228_v34  ;;  %8719 = vrot.lane.b32.xlu2 %v8673_v54, %s8823_s15  ;;  %8724 = vrot.lane.b32.xlu0 %v10453_v20, %s8820_s30  ;;  %v5805_v20 = vadd.f32 %v10420_v57, %v10487_v40 }
 0x431   : > { %v6237_v25 = vmax.f32 %v6229_v24, 0.0  ;;  %v5811_v56 = vmax.f32 %v5805_v20, 0.0 }
 0x433   : > { %v8713_v27 = vpack.i.bf16 %v6237_v25, %v6236_v4  ;;  %v8753_v54 = vpack.i.bf16 %v5812_v17, %v5811_v56  ;;  %v6586_v49 = vsel %vm5660_vm2, %v5811_v56, %v8671_v50 }
 0x435   : > { %8714 = vrot.lane.b32.xlu1 %v8713_v27, %s8822_s12 }
 0x436   : > { %v6231_v18 = vpop.f32.mrf.mxu2 }
 0x437   : > { %8734 = vrot.lane.b32.xlu2 %v10501_v30, %s8823_s15  ;;  %8739 = vrot.lane.b32.xlu0 %v10629_v42, %s8820_s30  ;;  %v6232_v40 = vadd.f32 %v10420_v57, %v6231_v18 }
 0x439   : > { %v6238_v59 = vmax.f32 %v6232_v40, 0.0 }
 0x43d   : > { %8729 = vrot.lane.b32.xlu1 %v8728_v22, %s8822_s12 }
 0x43e   : > { %v6233_v2 = vpop.f32.mrf.mxu2 }
 0x43f   : > { %v6234_v30 = vadd.f32 %v10420_v57, %v6233_v2  ;;  %8749 = vrot.lane.b32.xlu2 %v8698_v43, %s8823_s15  ;;  %8754 = vrot.lane.b32.xlu0 %v8753_v54, %s8820_s30 }
 0x441   : > { %v6239_v29 = vmax.f32 %v6234_v30, 0.0 }
 0x443   : > { %v8743_v53 = vpack.i.bf16 %v6239_v29, %v6238_v59 }
 0x445   : > { %8744 = vrot.lane.b32.xlu1 %v8743_v53, %s8822_s12 }
 0x447   : > { %8764 = vrot.lane.b32.xlu2 %v10629_v42, %s8823_s15  ;;  %v6742_v42 = vsel %vm5660_vm2, %v6066_v58, %v8666_v41 }
 0x44d   : > { %8759 = vrot.lane.b32.xlu1 %v8758_v26, %s8822_s12 }
 0x471   : > { %v8685_v38 = vpop.permute.xlu2 %8684 }
 0x472   : > { %v8687_v43 = vunpack.i.h.bf16 %v8685_v38  ;;  %v8686_v52 = vunpack.i.l.bf16 %v8685_v38 }
 0x476   : > { %v8675_v19 = vpop.permute.xlu1 %8674 }
 0x477   : > { %v8677_v11 = vunpack.i.h.bf16 %v8675_v19  ;;  %v8676_v15 = vunpack.i.l.bf16 %v8675_v19 }
 0x479   : > { %v6747_v55 = vsel %vm5696_vm5, %v6743_v44, %v8677_v11  ;;  %v6746_v45 = vsel %vm5696_vm5, %v6742_v42, %v8676_v15  ;;  %v8690_v58 = vpop.permute.xlu2 %8689 }
 0x47a   : > { %v6751_v36 = vsel %vm6462_vm6, %v6747_v55, %v8687_v43  ;;  %v6750_v62 = vsel %vm6462_vm6, %v6746_v45, %v8686_v52  ;;  %v8692_v21 = vunpack.i.h.bf16 %v8690_v58  ;;  %v8691_v34 = vunpack.i.l.bf16 %v8690_v58 }
 0x47b   : > { %v6754_v16 = vpack.c.bf16 %v6751_v36, %v6750_v62  ;;  %v5713_v58 = vadd.f32 %v10420_v57, %v10466_v63 }
 0x47c   : > { %v6607_v47 = vpop.f32.mrf.mxu2 }
 0x47d   : > { %6764 = vmatmul.bf16.vlgmr.msrb.gmra.mxu0 %v6754_v16  ;;  %v6608_v24 = vadd.f32 %v10712_v9, %v6607_v47 }
 0x47e   : > { %v8680_v8 = vpop.permute.xlu1 %8679 }
 0x47f   : > { %v8682_v60 = vunpack.i.h.bf16 %v8680_v8  ;;  %v8681_v14 = vunpack.i.l.bf16 %v8680_v8  ;;  %v6617_v54 = vmax.f32 %v6608_v24, 0.0  ;;  %v5715_v8 = vadd.f32 %v10420_v57, %v10468_v35 }
 0x481   : > { %v6591_v4 = vsel %vm5696_vm5, %v6587_v28, %v8682_v60  ;;  %v6590_v25 = vsel %vm5696_vm5, %v6586_v49, %v8681_v14  ;;  %v8705_v2 = vpop.permute.xlu2 %8704  ;;  %v5723_v49 = vmax.f32 %v5715_v8, 0.0 }
 0x482   : > { %v6594_v39 = vsel %vm6462_vm6, %v6590_v25, %v8691_v34  ;;  %v6595_v18 = vsel %vm6462_vm6, %v6591_v4, %v8692_v21  ;;  %v8707_v7 = vunpack.i.h.bf16 %v8705_v2  ;;  %v8706_v38 = vunpack.i.l.bf16 %v8705_v2 }
 0x483   : > { %v6597_v22 = vpack.c.bf16 %v6595_v18, %v6594_v39 }
 0x484   : > { %v6609_v27 = vpop.f32.mrf.mxu2 }
 0x485   : > { %v6610_v20 = vadd.f32 %v10712_v9, %v6609_v27  ;;  %6611 = vmatmul.bf16.gmra.mxu2 %v6597_v22 }
 0x487   : > { %v6618_v56 = vmax.f32 %v6610_v20, 0.0 }
 0x489   : > { %v8773_v17 = vpack.i.bf16 %v6618_v56, %v6617_v54  ;;  %v8720_v52 = vpop.permute.xlu2 %8719 }
 0x48a   : > { %v8722_v36 = vunpack.i.h.bf16 %v8720_v52 }
 0x48b   : > { %8774 = vrot.lane.b32.xlu1 %v8773_v17, %s8822_s12 }
 0x48e   : > { %v8700_v40 = vpop.permute.xlu1 %8699 }
 0x48f   : > { %v8702_v53 = vunpack.i.h.bf16 %v8700_v40  ;;  %v8701_v26 = vunpack.i.l.bf16 %v8700_v40 }
 0x491   : > { %v8695_v30 = vpop.permute.xlu0 %8694  ;;  %v8735_v16 = vpop.permute.xlu2 %8734 }
 0x492   : > { %v8697_v59 = vunpack.i.h.bf16 %v8695_v30  ;;  %v8696_v29 = vunpack.i.l.bf16 %v8695_v30  ;;  %v8737_v4 = vunpack.i.h.bf16 %v8735_v16  ;;  %v8736_v25 = vunpack.i.l.bf16 %v8735_v16 }
 0x494   : > { %v6744_v10 = vsel %vm5660_vm2, %v6068_v1, %v8696_v29  ;;  %v6745_v41 = vsel %vm5660_vm2, %v6069_v3, %v8697_v59  ;;  %v8721_v3 = vunpack.i.l.bf16 %v8720_v52 }
 0x495   : > { %v6748_v19 = vsel %vm5696_vm5, %v6744_v10, %v8701_v26  ;;  %v6749_v11 = vsel %vm5696_vm5, %v6745_v41, %v8702_v53  ;;  %v5718_v41 = vadd.f32 %v10420_v57, %v10470_v23 }
 0x496   : > { %v6752_v15 = vsel %vm6462_vm6, %v6748_v19, %v8706_v38  ;;  %v6753_v42 = vsel %vm6462_vm6, %v6749_v11, %v8707_v7  ;;  %v5720_v19 = vadd.f32 %v10420_v57, %v10474_v61 }
 0x497   : > { %v6755_v44 = vpack.c.bf16 %v6753_v42, %v6752_v15 }
 0x499   : > { %6769 = vmatmul.bf16.gmra.mxu0 %v6755_v44  ;;  %v8710_v43 = vpop.permute.xlu0 %8709  ;;  %v8750_v22 = vpop.permute.xlu2 %8749  ;;  %v5725_v44 = vmax.f32 %v5720_v19, 0.0 }
 0x49a   : > { %v8712_v48 = vunpack.i.h.bf16 %v8710_v43  ;;  %v8711_v46 = vunpack.i.l.bf16 %v8710_v43  ;;  %v8752_v59 = vunpack.i.h.bf16 %v8750_v22  ;;  %v8751_v29 = vunpack.i.l.bf16 %v8750_v22 }
 0x49c   : > { %v6666_v62 = vsel %vm5660_vm2, %v5984_v6, %v8712_v48  ;;  %v6665_v47 = vsel %vm5660_vm2, %v5983_v51, %v8711_v46  ;;  %v5722_v51 = vmax.f32 %v5713_v58, 0.0  ;;  %v8204_v58 = vld [vmem:[%s10898_s7 + $0x38] sm:$0xff] }
 0x49d   : > { %6923 = vmatpush.bf16.msrb.mxu1 %v8204_v58 }
 0x4a1   : > { %v8725_v55 = vpop.permute.xlu0 %8724  ;;  %v8765_v42 = vpop.permute.xlu2 %8764 }
 0x4a2   : > { %v8727_v14 = vunpack.i.h.bf16 %v8725_v55  ;;  %v8726_v13 = vunpack.i.l.bf16 %v8725_v55  ;;  %v8767_v46 = vunpack.i.h.bf16 %v8765_v42  ;;  %v8766_v55 = vunpack.i.l.bf16 %v8765_v42  ;;  %v8205_v42 = vld [vmem:[%s10898_s7 + $0x40] sm:$0xff] }
 0x4a4   : > { %v6454_v63 = vsel %vm5660_vm2, %v5722_v51, %v8726_v13  ;;  %v6455_v35 = vsel %vm5660_vm2, %v5723_v49, %v8727_v14  ;;  %v8201_v13 = vld [vmem:[%s10898_s7 + $0x20] sm:$0xff] }
 0x4a7   : > { %v8715_v1 = vpop.permute.xlu1 %8714 }
 0x4a8   : > { %v8717_v45 = vunpack.i.h.bf16 %v8715_v1  ;;  %v8716_v37 = vunpack.i.l.bf16 %v8715_v1 }
 0x4a9   : > { %v8740_v21 = vpop.permute.xlu0 %8739 }
 0x4aa   : > { %v6670_v31 = vsel %vm5696_vm5, %v6666_v62, %v8717_v45  ;;  %v6669_v50 = vsel %vm5696_vm5, %v6665_v47, %v8716_v37  ;;  %v8742_v56 = vunpack.i.h.bf16 %v8740_v21  ;;  %v8741_v17 = vunpack.i.l.bf16 %v8740_v21 }
 0x4ab   : > { %v6674_v60 = vsel %vm6462_vm6, %v6670_v31, %v8722_v36  ;;  %v6673_v33 = vsel %vm6462_vm6, %v6669_v50, %v8721_v3 }
 0x4ac   : > { %v6677_v6 = vpack.c.bf16 %v6674_v60, %v6673_v33  ;;  %v6668_v53 = vsel %vm5660_vm2, %v5986_v32, %v8742_v56  ;;  %v6667_v26 = vsel %vm5660_vm2, %v5985_v5, %v8741_v17  ;;  %v5724_v5 = vmax.f32 %v5718_v41, 0.0  ;;  %v8203_v60 = vld [vmem:[%s10898_s7 + $0x30] sm:$0xff]  ;;  %v8212_v56 = vld [vmem:[%s10898_s7 + $0x78] sm:$0xff] }
 0x4ad   : > { %6924 = vmatpush.bf16.msrb.mxu1 %v8203_v60  ;;  %6942 = vmatpush.bf16.msrb.mxu2 %v8212_v56  ;;  %v8211_v17 = vld [vmem:[%s10898_s7 + $0x70] sm:$0xff] }
 0x4ae   : > { %6687 = vmatmul.bf16.vlgmr.msra.gmra.mxu3 %v6677_v6  ;;  %v8202_v6 = vld [vmem:[%s10898_s7 + $0x28] sm:$0xff] }
 0x4af   : > { %v8730_v28 = vpop.permute.xlu1 %8729 }
 0x4b0   : > { %v8732_v34 = vunpack.i.h.bf16 %v8730_v28  ;;  %v8731_v24 = vunpack.i.l.bf16 %v8730_v28 }
 0x4b1   : > { %v8755_v7 = vpop.permute.xlu0 %8754  ;;  %6925 = vmatpush.bf16.msrb.mxu1 %v8202_v6  ;;  %6943 = vmatpush.bf16.msrb.mxu2 %v8211_v17 }
 0x4b2   : > { %v6458_v27 = vsel %vm5696_vm5, %v6454_v63, %v8731_v24  ;;  %v6459_v39 = vsel %vm5696_vm5, %v6455_v35, %v8732_v34  ;;  %v8757_v15 = vunpack.i.h.bf16 %v8755_v7  ;;  %v8756_v0 = vunpack.i.l.bf16 %v8755_v7  ;;  %v8200_v24 = vld [vmem:[%s10898_s7 + $0x18] sm:$0xff]  ;;  %v8198_v63 = vld [vmem:[%s10898_s7 + $0x8] sm:$0xff] }
 0x4b3   : > { %v6463_v18 = vsel %vm6462_vm6, %v6458_v27, %v8736_v25  ;;  %v6464_v20 = vsel %vm6462_vm6, %v6459_v39, %v8737_v4  ;;  %v8199_v25 = vld [vmem:[%s10898_s7 + $0x10] sm:$0xff] }
 0x4b4   : > { %v6467_v54 = vpack.c.bf16 %v6464_v20, %v6463_v18  ;;  %v6456_v23 = vsel %vm5660_vm2, %v5724_v5, %v8756_v0  ;;  %v6457_v57 = vsel %vm5660_vm2, %v5725_v44, %v8757_v15  ;;  %v8197_v18 = vld [vmem:[%s10898_s7] sm:$0xff]  ;;  %v8206_v0 = vld [vmem:[%s10898_s7 + $0x48] sm:$0xff] }
 0x4b5   : > { %6926 = vmatpush.bf16.msrb.mxu1 %v8201_v13 }
 0x4b6   : > { %6525 = vmatmul.bf16.vlgmr.msra.gmra.mxu1 %v6467_v54 }
 0x4b7   : > { %v8745_v40 = vpop.permute.xlu1 %8744 }
 0x4b8   : > { %v8747_v2 = vunpack.i.h.bf16 %v8745_v40  ;;  %v8746_v30 = vunpack.i.l.bf16 %v8745_v40 }
 0x4b9   : > { %6927 = vmatpush.bf16.msrb.mxu1 %v8200_v24 }
 0x4ba   : > { %v6672_v38 = vsel %vm5696_vm5, %v6668_v53, %v8747_v2  ;;  %v6671_v10 = vsel %vm5696_vm5, %v6667_v26, %v8746_v30  ;;  %v8210_v2 = vld [vmem:[%s10898_s7 + $0x68] sm:$0xff] }
 0x4bb   : > { %v6675_v11 = vsel %vm6462_vm6, %v6671_v10, %v8751_v29  ;;  %v6676_v12 = vsel %vm6462_vm6, %v6672_v38, %v8752_v59  ;;  %6944 = vmatpush.bf16.msrb.mxu2 %v8210_v2  ;;  %v8209_v59 = vld [vmem:[%s10898_s7 + $0x60] sm:$0xff]  ;;  %v8208_v38 = vld [vmem:[%s10898_s7 + $0x58] sm:$0xff] }
 0x4bc   : > { %v6678_v32 = vpack.c.bf16 %v6676_v12, %v6675_v11 }
 0x4bd   : > { %6928 = vmatpush.bf16.msrb.mxu1 %v8199_v25 }
 0x4be   : > { %6692 = vmatmul.bf16.gmra.mxu3 %v6678_v32  ;;  %v8207_v32 = vld [vmem:[%s10898_s7 + $0x50] sm:$0xff] }
 0x4bf   : > { %v8760_v43 = vpop.permute.xlu1 %8759  ;;  %6945 = vmatpush.bf16.msrb.mxu2 %v8209_v59 }
 0x4c0   : > { %v8762_v52 = vunpack.i.h.bf16 %v8760_v43  ;;  %v8761_v48 = vunpack.i.l.bf16 %v8760_v43 }
 0x4c1   : > { %6929 = vmatpush.bf16.msrb.mxu1 %v8198_v63  ;;  %v8220_v63 = vld [vmem:[%s10900_s9 + $0x38] sm:$0xff] }
 0x4c2   : > { %v6460_v61 = vsel %vm5696_vm5, %v6456_v23, %v8761_v48  ;;  %v6461_v1 = vsel %vm5696_vm5, %v6457_v57, %v8762_v52  ;;  %7019 = vmatpush.bf16.msrb.mxu3 %v8220_v63 }
 0x4c3   : > { %v6465_v45 = vsel %vm6462_vm6, %v6460_v61, %v8766_v55  ;;  %v6466_v37 = vsel %vm6462_vm6, %v6461_v1, %v8767_v46  ;;  %6946 = vmatpush.bf16.msrb.mxu2 %v8208_v38 }
 0x4c4   : > { %v6468_v36 = vpack.c.bf16 %v6466_v37, %v6465_v45 }
 0x4c5   : > { %6930 = vmatpush.bf16.msrb.mxu1 %v8197_v18  ;;  %v8216_v18 = vld [vmem:[%s10900_s9 + $0x18] sm:$0xff] }
 0x4c6   : > { %6530 = vmatmul.bf16.gmra.mxu1 %v6468_v36 }
 0x4c7   : > { %6947 = vmatpush.bf16.msrb.mxu2 %v8207_v32 }
 0x4cb   : > { %6948 = vmatpush.bf16.msrb.mxu2 %v8206_v0 }
 0x4cf   : > { %6949 = vmatpush.bf16.msrb.mxu2 %v8205_v42 }
 0x4fa   : > { %v6765_v3 = vpop.f32.mrf.mxu0 }
 0x4fb   : > { %v6766_v62 = vadd.f32 %v10712_v9, %v6765_v3 }
 0x4fd   : > { %v6775_v31 = vmax.f32 %v6766_v62, 0.0  ;;  %v8775_v29 = vpop.permute.xlu1 %8774 }
 0x4fe   : > { %v8777_v10 = vunpack.i.h.bf16 %v8775_v29  ;;  %v8776_v41 = vunpack.i.l.bf16 %v8775_v29 }
 0x502   : > { %v6767_v47 = vpop.f32.mrf.mxu0 }
 0x503   : > { %v6768_v16 = vadd.f32 %v10712_v9, %v6767_v47 }
 0x505   : > { %v6776_v50 = vmax.f32 %v6768_v16, 0.0 }
 0x507   : > { %v8768_v8 = vpack.i.bf16 %v6776_v50, %v6775_v31 }
 0x508   : > { %v6612_v33 = vpop.f32.mrf.mxu2 }
 0x509   : > { %8769 = vrot.lane.b32.xlu0 %v8768_v8, %s8822_s12  ;;  %v6613_v14 = vadd.f32 %v10712_v9, %v6612_v33 }
 0x50b   : > { %v6619_v28 = vmax.f32 %v6613_v14, 0.0 }
 0x510   : > { %v6614_v51 = vpop.f32.mrf.mxu2 }
 0x511   : > { %v6615_v49 = vadd.f32 %v10712_v9, %v6614_v51 }
 0x513   : > { %v6620_v21 = vmax.f32 %v6615_v49, 0.0 }
 0x515   : > { %v8783_v34 = vpack.i.bf16 %v6620_v21, %v6619_v28 }
 0x516   : > { %v6770_v4 = vpop.f32.mrf.mxu0 }
 0x517   : > { %8784 = vrot.lane.b32.xlu0 %v8783_v34, %s8822_s12  ;;  %v6771_v35 = vadd.f32 %v10712_v9, %v6770_v4 }
 0x519   : > { %v6777_v20 = vmax.f32 %v6771_v35, 0.0  ;;  %v8219_v35 = vld [vmem:[%s10900_s9 + $0x30] sm:$0xff] }
 0x51a   : > { %7020 = vmatpush.bf16.msrb.mxu3 %v8219_v35 }
 0x51e   : > { %v6772_v27 = vpop.f32.mrf.mxu0 }
 0x51f   : > { %v6773_v39 = vadd.f32 %v10712_v9, %v6772_v27  ;;  %v8218_v27 = vld [vmem:[%s10900_s9 + $0x28] sm:$0xff] }
 0x520   : > { %7021 = vmatpush.bf16.msrb.mxu3 %v8218_v27 }
 0x521   : > { %v6778_v22 = vmax.f32 %v6773_v39, 0.0  ;;  %v8217_v39 = vld [vmem:[%s10900_s9 + $0x20] sm:$0xff] }
 0x523   : > { %v8778_v54 = vpack.i.bf16 %v6778_v22, %v6777_v20  ;;  %v8215_v20 = vld [vmem:[%s10900_s9 + $0x10] sm:$0xff]  ;;  %v8214_v22 = vld [vmem:[%s10900_s9 + $0x8] sm:$0xff] }
 0x524   : > { %7022 = vmatpush.bf16.msrb.mxu3 %v8217_v39 }
 0x525   : > { %8779 = vrot.lane.b32.xlu2 %v8778_v54, %s8822_s12  ;;  %v8213_v54 = vld [vmem:[%s10900_s9] sm:$0xff]  ;;  %s7122_s12 = sshll.u32 %s10956_s22, 3 }
 0x526   : > { %s2501_s26 = scalar_lea.vmem %s10902_s11, %s7122_s12 }
 0x528   : > { %7023 = vmatpush.bf16.msrb.mxu3 %v8216_v18 }
 0x52c   : > { %7024 = vmatpush.bf16.msrb.mxu3 %v8215_v20 }
 0x530   : > { %7025 = vmatpush.bf16.msrb.mxu3 %v8214_v22 }
 0x531   : > { %v6688_v5 = vpop.f32.mrf.mxu3 }
 0x532   : > { %v6689_v43 = vadd.f32 %v10712_v9, %v6688_v5 }
 0x533   : > { %v6526_v40 = vpop.f32.mrf.mxu1 }
 0x534   : > { %v6527_v30 = vadd.f32 %v10712_v9, %v6526_v40  ;;  %v6698_v23 = vmax.f32 %v6689_v43, 0.0  ;;  %7026 = vmatpush.bf16.msrb.mxu3 %v8213_v54  ;;  %v8791_v40 = vld [vmem:[%s10899_s8] ss:$0 sm:$0xff] }
 0x536   : > { %v6536_v26 = vmax.f32 %v6527_v30, 0.0 }
 0x538   : > { %v6811_v11 = vsel %vm5696_vm5, %v6536_v26, %v8776_v41 }
 0x539   : > { %v6690_v44 = vpop.f32.mrf.mxu3 }
 0x53a   : > { %v6691_v52 = vadd.f32 %v10712_v9, %v6690_v44 }
 0x53b   : > { %v6528_v53 = vpop.f32.mrf.mxu1 }
 0x53c   : > { %v6529_v7 = vadd.f32 %v10712_v9, %v6528_v53  ;;  %v6699_v57 = vmax.f32 %v6691_v52, 0.0  ;;  %v8792_v52 = vld [vmem:[%s10901_s10] ss:$0 sm:$0xff] }
 0x53e   : > { %v6537_v19 = vmax.f32 %v6529_v7, 0.0 }
 0x540   : > { %v6812_v12 = vsel %vm5696_vm5, %v6537_v19, %v8777_v10 }
 0x541   : > { %v6819_v15 = vpack.c.bf16 %v6812_v12, %v6811_v11  ;;  %v6693_v48 = vpop.f32.mrf.mxu3 }
 0x542   : > { %v6694_v47 = vadd.f32 %v10712_v9, %v6693_v48 }
 0x543   : > { %6931 = vmatmul.bf16.vlgmr.msrb.gmra.mxu1 %v6819_v15  ;;  %v6531_v46 = vpop.f32.mrf.mxu1 }
 0x544   : > { %v6532_v16 = vadd.f32 %v10712_v9, %v6531_v46  ;;  %v6700_v33 = vmax.f32 %v6694_v47, 0.0 }
 0x546   : > { %v6538_v6 = vmax.f32 %v6532_v16, 0.0 }
 0x549   : > { %v6695_v3 = vpop.f32.mrf.mxu3 }
 0x54a   : > { %v6696_v50 = vadd.f32 %v10712_v9, %v6695_v3 }
 0x54b   : > { %v6533_v62 = vpop.f32.mrf.mxu1 }
 0x54c   : > { %v6534_v58 = vadd.f32 %v10712_v9, %v6533_v62  ;;  %v6701_v13 = vmax.f32 %v6696_v50, 0.0 }
 0x54e   : > { %v6539_v51 = vmax.f32 %v6534_v58, 0.0 }
 0x57b   : > { %v8770_v55 = vpop.permute.xlu0 %8769 }
 0x57c   : > { %v8772_v61 = vunpack.i.h.bf16 %v8770_v55  ;;  %v8771_v1 = vunpack.i.l.bf16 %v8770_v55 }
 0x57e   : > { %v6816_v45 = vsel %vm5696_vm5, %v6699_v57, %v8772_v61  ;;  %v6815_v37 = vsel %vm5696_vm5, %v6698_v23, %v8771_v1 }
 0x57f   : > { %v6820_v36 = vpack.c.bf16 %v6816_v45, %v6815_v37  ;;  %v8780_v31 = vpop.permute.xlu2 %8779 }
 0x580   : > { %v8782_v8 = vunpack.i.h.bf16 %v8780_v31  ;;  %v8781_v60 = vunpack.i.l.bf16 %v8780_v31 }
 0x581   : > { %6950 = vmatmul.bf16.vlgmr.msrb.gmra.mxu2 %v6820_v36 }
 0x582   : > { %v6817_v24 = vsel %vm5696_vm5, %v6700_v33, %v8781_v60  ;;  %v6818_v4 = vsel %vm5696_vm5, %v6701_v13, %v8782_v8 }
 0x583   : > { %v6822_v9 = vpack.c.bf16 %v6818_v4, %v6817_v24 }
 0x589   : > { %v8785_v14 = vpop.permute.xlu0 %8784 }
 0x58a   : > { %v8787_v49 = vunpack.i.h.bf16 %v8785_v14  ;;  %v8786_v28 = vunpack.i.l.bf16 %v8785_v14 }
 0x58c   : > { %v6813_v21 = vsel %vm5696_vm5, %v6538_v6, %v8786_v28  ;;  %v6814_v34 = vsel %vm5696_vm5, %v6539_v51, %v8787_v49 }
 0x58d   : > { %v6821_v25 = vpack.c.bf16 %v6814_v34, %v6813_v21 }
 0x58f   : > { %6936 = vmatmul.bf16.gmra.mxu1 %v6821_v25 }
 0x591   : > { %6955 = vmatmul.bf16.gmra.mxu2 %v6822_v9 }
 0x5c0   : > { %v6932_v56 = vpop.f32.mrf.mxu1 }
 0x5c1   : > { %v6933_v30 = vadd.f32 %v8791_v40, %v6932_v56 }
 0x5c8   : > { %v6934_v2 = vpop.f32.mrf.mxu1 }
 0x5c9   : > { %v6935_v59 = vadd.f32 %v8791_v40, %v6934_v2 }
 0x604   : > { %v6951_v17 = vpop.f32.mrf.mxu2 }
 0x605   : > { %v6952_v29 = vadd.f32 %v6951_v17, %v6933_v30 }
 0x607   : > { %v6961_v38 = vmax.f32 %v6952_v29, 0.0 }
 0x60c   : > { %v6953_v53 = vpop.f32.mrf.mxu2  ;;  %v6937_v7 = vpop.f32.mrf.mxu1 }
 0x60d   : > { %v6954_v26 = vadd.f32 %v6953_v53, %v6935_v59  ;;  %v6938_v12 = vadd.f32 %v8791_v40, %v6937_v7 }
 0x60f   : > { %v6962_v10 = vmax.f32 %v6954_v26, 0.0 }
 0x611   : > { %v6965_v41 = vpack.c.bf16 %v6962_v10, %v6961_v38 }
 0x613   : > { %7027 = vmatmul.bf16.vlgmr.msrb.gmra.mxu3 %v6965_v41 }
 0x614   : > { %v6956_v19 = vpop.f32.mrf.mxu2  ;;  %v6939_v11 = vpop.f32.mrf.mxu1 }
 0x615   : > { %v6940_v32 = vadd.f32 %v8791_v40, %v6939_v11  ;;  %v6957_v15 = vadd.f32 %v6956_v19, %v6938_v12 }
 0x617   : > { %v6963_v5 = vmax.f32 %v6957_v15, 0.0 }
 0x61c   : > { %v6958_v0 = vpop.f32.mrf.mxu2 }
 0x61d   : > { %v6959_v42 = vadd.f32 %v6958_v0, %v6940_v32 }
 0x61f   : > { %v6964_v44 = vmax.f32 %v6959_v42, 0.0 }
 0x621   : > { %v6966_v43 = vpack.c.bf16 %v6964_v44, %v6963_v5 }
 0x623   : > { %7032 = vmatmul.bf16.gmra.mxu3 %v6966_v43 }
 0x696   : > { %v7028_v48 = vpop.f32.mrf.mxu3 }
 0x697   : > { %v7029_v46 = vadd.f32 %v8792_v52, %v7028_v48 }
 0x699   : > { %7038 = vst [vmem:[%s2501_s26] sm:$0xff] %v7029_v46 }
 0x69e   : > { %v7030_v55 = vpop.f32.mrf.mxu3 }
 0x69f   : > { %v7031_v23 = vadd.f32 %v8792_v52, %v7030_v55 }
 0x6a1   : > { %7039 = vst [vmem:[%s2501_s26 + $0x8] sm:$0xff] %v7031_v23 }
 0x6a6   : > { %v7033_v57 = vpop.f32.mrf.mxu3 }
 0x6a7   : > { %v7034_v61 = vadd.f32 %v8792_v52, %v7033_v57 }
 0x6a9   : > { %7040 = vst [vmem:[%s2501_s26 + $0x10] sm:$0xff] %v7034_v61 }
 0x6ae   : > { %v7035_v1 = vpop.f32.mrf.mxu3 }
 0x6af   : > { %v7036_v45 = vadd.f32 %v8792_v52, %v7035_v1 }
 0x6b1   : > { %7041 = vst [vmem:[%s2501_s26 + $0x18] sm:$0xff] %v7036_v45 }
 0x6b2 PF: > { %p18_p9 = scmp.ge.s32.totalorder %s8901_s21, 4   ;;  %s10952_s17 = smov %s8813_s18 }
 0x6b3   : > { %s10953_s18 = smov %s8910_s24  ;;  %s10954_s19 = smov %s8901_s21 }
 0x6b4   :  { %20 = sbr.rel (!%p18_p9) target bundleno = 2 (0x2), region = 218 }

</bundles_post_ra>
